<compile_context>
chip_gen: v7x
topology: tpu7x:2x2x1
jax: 0.10.0
libtpu: 0.0.40
codegen_flags: <defaults>
</compile_context>

<pallas_src>
import jax
import jax.numpy as jnp
from jax.experimental import pallas as pl
from jax.experimental.pallas import tpu as pltpu

EPS = 1e-5          # PyTorch BatchNorm default eps
K = 5               # ConvTranspose2d kernel size


# ------------------------------ device / tiling ------------------------------

def _round_up(x, m):
    return ((x + m - 1) // m) * m


def _vmem_limit_and_budget():
    """Scoped-VMEM limit to request and planning budget for block sizing,
    derived from the device (v5e/v6e: 128 MiB physical -> 96 MiB limit,
    v7x: 64 MiB -> 48 MiB).  Falls back to a conservative 64 MiB physical."""
    phys = 64 * 1024 * 1024
    try:
        phys = int(pltpu.get_tpu_info().vmem_capacity_bytes)
    except Exception:
        pass
    limit = (phys * 3) // 4
    budget = (limit * 3) // 4
    return limit, budget


def _compiler_params(limit):
    return pltpu.CompilerParams(dimension_semantics=("parallel",),
                                vmem_limit_bytes=int(limit))


def _pick_feature_tile(f, b, din, budget):
    """Feature tile for Linear+BN+ReLU: biggest 128-multiple divisor of f that
    fits the VMEM budget, capped at f//2 so the parallel grid has >= 2 steps."""
    per_col = 2 * (din * 2) + 2 * (b * 2) + b * 4 + 16   # w + out (2 bufs) + f32 tmp
    cap = max(128, budget // max(per_col, 1))
    if f >= 256:
        cap = min(cap, f // 2)
    best = f
    d = 128
    while d <= min(f, cap):
        if f % d == 0:
            best = d
        d += 128
    return best


def _pick_group_size(b, cin, m_rows, hp, wp, out_bytes, budget):
    """Images per deconv grid step: double-buffered input slab + output tile +
    resident folded weight must fit the budget; capped at b//2 so the
    'parallel' grid has >= 2 steps (both v7x TensorCores busy).
    Note: bg never drops below one image, so extreme configs may still exceed
    the budget -- acceptable floor for this net's shapes."""
    per_img = (hp * wp) * (2 * cin * 2            # input slab (bf16, 2 buffers)
                           + 2 * m_rows * out_bytes   # y tile   (2 buffers)
                           + m_rows * 4               # f32 accumulator
                           + 2 * cin * 2)             # in-kernel tap slices
    fixed = 2 * (9 * m_rows * cin * 2) + (1 << 20)    # folded weight (2 bufs) + slack
    cap = max(1, (budget - fixed) // max(per_img, 1))
    if b >= 2:
        cap = min(cap, b // 2)
    bg = 1
    for d in range(1, b + 1):
        if b % d == 0 and d <= cap:
            bg = d
    return bg


# --------------------------------- kernels -----------------------------------

def linear_bn_relu_kernel(x_ref, w_ref, g_ref, b_ref, o_ref):
    # Linear(bias=False) -> BatchNorm1d (training batch stats) -> ReLU.
    # The grid tiles the feature axis; the full batch is in-block, so the
    # per-feature batch statistics are exact.  Output stored as bf16.
    y = jnp.dot(x_ref[...], w_ref[...], preferred_element_type=jnp.float32)
    mean = jnp.mean(y, axis=0, keepdims=True)
    var = jnp.mean((y - mean) ** 2, axis=0, keepdims=True)
    yn = (y - mean) * jax.lax.rsqrt(var + EPS) * g_ref[...] + b_ref[...]
    o_ref[...] = jnp.maximum(yn, 0.0).astype(o_ref.dtype)


def _make_deconv_kernel(offsets, ng, with_stats):
    """Deconv tile kernel: 9 accumulated (m_rows, Cin) @ (Cin, ng) MXU matmuls
    over contiguous lane-slices (the shifted conv windows) of the padded input
    slab held in VMEM."""
    if with_stats:
        def kernel(x_ref, w_ref, mask_ref, y_ref, st_ref):
            acc = jnp.dot(w_ref[0], x_ref[0, :, offsets[0]:offsets[0] + ng],
                          preferred_element_type=jnp.float32)
            for s in range(1, 9):
                acc = acc + jnp.dot(w_ref[s],
                                    x_ref[0, :, offsets[s]:offsets[s] + ng],
                                    preferred_element_type=jnp.float32)
            y_ref[0] = acc.astype(y_ref.dtype)              # bf16 write-back
            m = mask_ref[...]                               # zero the pad columns
            s1 = jnp.sum(acc * m, axis=1, keepdims=True)
            s2 = jnp.sum(acc * acc * m, axis=1, keepdims=True)
            st_ref[0] = jnp.concatenate([s1, s2], axis=1)   # packed (m_rows, 2)
        return kernel

    def kernel(x_ref, w_ref, bias_ref, y_ref):
        acc = jnp.dot(w_ref[0], x_ref[0, :, offsets[0]:offsets[0] + ng],
                      preferred_element_type=jnp.float32)
        for s in range(1, 9):
            acc = acc + jnp.dot(w_ref[s],
                                x_ref[0, :, offsets[s]:offsets[s] + ng],
                                preferred_element_type=jnp.float32)
        y_ref[0] = jnp.tanh(acc + bias_ref[...]).astype(y_ref.dtype)
    return kernel


# -------------------- layout glue (plain JAX, per layer) ---------------------

def _fold_weight(w_pt):
    """PyTorch ConvTranspose2d weight (Cin, Cout, 5, 5) -> (9, 4*Cout, Cin) bf16.

    Slot s = sh*3 + sw is the shifted window (sh, sw) of the padded input;
    row m = (ph*2 + pw)*Cout + co is output parity phase (ph, pw), channel co.
    The contributing kernel tap is kh = 4 - 2*sh (ph == 0) / 5 - 2*sh
    (ph == 1, sh >= 1); combinations with no tap stay zero."""
    cin, cout = w_pt.shape[0], w_pt.shape[1]
    w = jnp.zeros((9, 4 * cout, cin), jnp.float32)
    for ph in (0, 1):
        for pw in (0, 1):
            row0 = (ph * 2 + pw) * cout
            for sh in range(3):
                kh = 4 - 2 * sh if ph == 0 else 5 - 2 * sh
                if not 0 <= kh < K:
                    continue
                for sw in range(3):
                    kw = 4 - 2 * sw if pw == 0 else 5 - 2 * sw
                    if not 0 <= kw < K:
                        continue
                    w = w.at[sh * 3 + sw, row0:row0 + cout, :].set(
                        w_pt[:, :, kh, kw].T)
    return w.astype(jnp.bfloat16)


def _to_grouped_slab(x, bg):
    """(B, C, H, W) -> (G, C, Lg) bf16 padded flat slab.  Within a group the
    flat index is b*Hp*Wp + r*Wp + c over the zero-padded (Hp, Wp) image, so
    every shifted conv window is a contiguous lane slice of the slab."""
    b, c, h, w = x.shape
    hp, wp = h + 2, w + 2
    g = b // bg
    ng = bg * hp * wp
    lg = _round_up(ng + 2 * wp + 2, 128)            # halo for the last window
    xp = jnp.pad(x, ((0, 0), (0, 0), (1, 1), (1, 1)))
    slab = xp.reshape(g, bg, c, hp, wp).transpose(0, 2, 1, 3, 4).reshape(g, c, ng)
    slab = jnp.pad(slab, ((0, 0), (0, 0), (0, lg - ng)))
    return slab.astype(jnp.bfloat16), hp, wp, ng, lg


def _valid_mask(bg, h, w, hp, wp):
    """(1, bg*hp*wp) f32 mask of the slab columns that are real output pixels."""
    m = jnp.zeros((hp, wp), jnp.float32).at[:h, :w].set(1.0)
    return jnp.tile(m.reshape(-1), bg).reshape(1, bg * hp * wp)


# ------------------------------ layer wrappers --------------------------------

def linear_bn_relu(x, w, gamma, beta, budget, limit):
    b, din = x.shape
    f = w.shape[1]
    ft = _pick_feature_tile(f, b, din, budget)
    return pl.pallas_call(
        linear_bn_relu_kernel,
        out_shape=jax.ShapeDtypeStruct((b, f), jnp.bfloat16),
        grid=(f // ft,),
        in_specs=[pl.BlockSpec((b, din), lambda j: (0, 0)),
                  pl.BlockSpec((din, ft), lambda j: (0, j)),
                  pl.BlockSpec((1, ft), lambda j: (0, j)),
                  pl.BlockSpec((1, ft), lambda j: (0, j))],
        out_specs=pl.BlockSpec((b, ft), lambda j: (0, j)),
        compiler_params=_compiler_params(limit),
    )(x.astype(jnp.bfloat16), w.astype(jnp.bfloat16),
      gamma.reshape(1, f), beta.reshape(1, f))


def deconv_bn_relu(x, w_pt, gamma, beta, budget, limit):
    b, cin, h, w = x.shape
    cout = w_pt.shape[1]
    m_rows = 4 * cout
    hp, wp = h + 2, w + 2
    bg = _pick_group_size(b, cin, m_rows, hp, wp, 2, budget)
    g = b // bg
    slab, hp, wp, ng, lg = _to_grouped_slab(x, bg)
    w9 = _fold_weight(w_pt)
    mask = _valid_mask(bg, h, w, hp, wp)
    offsets = tuple(sh * wp + sw for sh in range(3) for sw in range(3))

    y, st = pl.pallas_call(
        _make_deconv_kernel(offsets, ng, with_stats=True),
        out_shape=(jax.ShapeDtypeStruct((g, m_rows, ng), jnp.bfloat16),
                   jax.ShapeDtypeStruct((g, m_rows, 2), jnp.float32)),
        grid=(g,),
        in_specs=[pl.BlockSpec((1, cin, lg), lambda i: (i, 0, 0)),
                  pl.BlockSpec((9, m_rows, cin), lambda i: (0, 0, 0)),
                  pl.BlockSpec((1, ng), lambda i: (0, 0))],
        out_specs=(pl.BlockSpec((1, m_rows, ng), lambda i: (i, 0, 0)),
                   pl.BlockSpec((1, m_rows, 2), lambda i: (i, 0, 0))),
        compiler_params=_compiler_params(limit),
    )(slab, w9, mask)

    # Global (batch x spatial x phase) BatchNorm statistics, biased variance.
    # TODO(synk): E[y^2]-E[y]^2 in f32 can cancel for very large activations;
    # switch to a centered / two-pass accumulation if tolerances tighten.
    cnt = 4.0 * b * h * w
    tot = jnp.sum(st, axis=0)                                 # (4*Cout, 2)
    ch_sum = tot[:, 0].reshape(4, cout).sum(axis=0)
    ch_sq = tot[:, 1].reshape(4, cout).sum(axis=0)
    mean = ch_sum / cnt
    var = jnp.maximum(ch_sq / cnt - mean * mean, 0.0)
    scale = gamma * jax.lax.rsqrt(var + EPS)
    shift = beta - mean * scale

    # Fused XLA epilogue: BN affine + ReLU + phase->pixel de-interleave.  This
    # replaces the former standalone bn_relu pallas_call (one fewer full HBM
    # round trip of the activation volume).
    y = y.reshape(g, 2, 2, cout, bg, hp, wp)[..., :h, :w].astype(jnp.float32)
    y = (y * scale.reshape(1, 1, 1, cout, 1, 1, 1)
         + shift.reshape(1, 1, 1, cout, 1, 1, 1))
    y = jnp.maximum(y, 0.0)
    y = jnp.transpose(y, (0, 4, 3, 5, 1, 6, 2)).reshape(b, cout, 2 * h, 2 * w)
    return y.astype(jnp.bfloat16)


def deconv_bias_tanh(x, w_pt, bias, budget, limit):
    b, cin, h, w = x.shape
    cout = w_pt.shape[1]
    m_rows = 4 * cout            # 12 rows: no padding to 16 (full-dim blocks)
    hp, wp = h + 2, w + 2
    bg = _pick_group_size(b, cin, m_rows, hp, wp, 4, budget)
    g = b // bg
    slab, hp, wp, ng, lg = _to_grouped_slab(x, bg)
    w9 = _fold_weight(w_pt)
    bias_rows = jnp.tile(bias, 4).reshape(m_rows, 1)
    offsets = tuple(sh * wp + sw for sh in range(3) for sw in range(3))

    y = pl.pallas_call(
        _make_deconv_kernel(offsets, ng, with_stats=False),
        out_shape=jax.ShapeDtypeStruct((g, m_rows, ng), jnp.float32),
        grid=(g,),
        in_specs=[pl.BlockSpec((1, cin, lg), lambda i: (i, 0, 0)),
                  pl.BlockSpec((9, m_rows, cin), lambda i: (0, 0, 0)),
                  pl.BlockSpec((m_rows, 1), lambda i: (0, 0))],
        out_specs=pl.BlockSpec((1, m_rows, ng), lambda i: (i, 0, 0)),
        compiler_params=_compiler_params(limit),
    )(slab, w9, bias_rows)

    y = y.reshape(g, 2, 2, cout, bg, hp, wp)[..., :h, :w]
    y = jnp.transpose(y, (0, 4, 3, 5, 1, 6, 2)).reshape(b, cout, 2 * h, 2 * w)
    return y


# ------------------------------- NetG forward ---------------------------------

def netg_forward(params, x):
    limit, budget = _vmem_limit_and_budget()
    y = linear_bn_relu(x, params["w1"], params["g1"], params["b1"], budget, limit)
    y = y.reshape(y.shape[0], -1, 4, 4)                                        # (B, dim*8, 4, 4)
    y = deconv_bn_relu(y, params["w_dc1"], params["g2"], params["b2"], budget, limit)  # 8x8
    y = deconv_bn_relu(y, params["w_dc2"], params["g3"], params["b3"], budget, limit)  # 16x16
    y = deconv_bn_relu(y, params["w_dc3"], params["g4"], params["b4"], budget, limit)  # 32x32
    y = deconv_bias_tanh(y, params["w_dc4"], params["bias4"], budget, limit)           # 64x64
    return y  # (B, 3, 64, 64) NCHW, f32


# ----------------------- pure-JAX (XLA) reference -----------------------------

def ref_forward(params, x):
    """Reference forward mirroring the kernel's bf16 matmul / intermediate
    precision, for validation."""
    y = jnp.dot(x.astype(jnp.bfloat16), params["w1"].astype(jnp.bfloat16),
                preferred_element_type=jnp.float32)
    mean = jnp.mean(y, axis=0, keepdims=True)
    var = jnp.mean((y - mean) ** 2, axis=0, keepdims=True)
    y = jnp.maximum((y - mean) * jax.lax.rsqrt(var + EPS) * params["g1"]
                    + params["b1"], 0.0)
    y = y.reshape(y.shape[0], -1, 4, 4)

    def deconv(h, w_pt):
        w_oihw = jnp.transpose(w_pt[:, :, ::-1, ::-1], (1, 0, 2, 3))
        return jax.lax.conv_general_dilated(
            h.astype(jnp.bfloat16), w_oihw.astype(jnp.bfloat16),
            window_strides=(1, 1), padding=((2, 3), (2, 3)),
            lhs_dilation=(2, 2), dimension_numbers=("NCHW", "OIHW", "NCHW"),
            preferred_element_type=jnp.float32)

    def bn_relu(h, gma, bta):
        h = h.astype(jnp.bfloat16).astype(jnp.float32)   # mirror bf16 pre-BN y
        mu = jnp.mean(h, axis=(0, 2, 3), keepdims=True)
        vv = jnp.mean((h - mu) ** 2, axis=(0, 2, 3), keepdims=True)
        hn = ((h - mu) * jax.lax.rsqrt(vv + EPS) * gma.reshape(1, -1, 1, 1)
              + bta.reshape(1, -1, 1, 1))
        return jnp.maximum(hn, 0.0).astype(jnp.bfloat16)

    y = bn_relu(deconv(y, params["w_dc1"]), params["g2"], params["b2"])
    y = bn_relu(deconv(y, params["w_dc2"]), params["g3"], params["b3"])
    y = bn_relu(deconv(y, params["w_dc3"]), params["g4"], params["b4"])
    y = jnp.tanh(deconv(y, params["w_dc4"]) + params["bias4"].reshape(1, -1, 1, 1))
    return y


# --------------------------------- params -------------------------------------

def init_params(key, in_dim, dim):
    ks = jax.random.split(key, 10)

    def normal(k, shape, scale):
        return scale * jax.random.normal(k, shape, jnp.float32)

    f = dim * 8 * 4 * 4
    p = {}
    p["w1"] = normal(ks[0], (in_dim, f), 1.0 / (in_dim ** 0.5))
    p["g1"] = 1.0 + normal(ks[1], (f,), 0.02)
    p["b1"] = jnp.zeros((f,), jnp.float32)
    p["w_dc1"] = normal(ks[2], (dim * 8, dim * 4, K, K), 0.02)
    p["g2"] = 1.0 + normal(ks[3], (dim * 4,), 0.02)
    p["b2"] = jnp.zeros((dim * 4,), jnp.float32)
    p["w_dc2"] = normal(ks[4], (dim * 4, dim * 2, K, K), 0.02)
    p["g3"] = 1.0 + normal(ks[5], (dim * 2,), 0.02)
    p["b3"] = jnp.zeros((dim * 2,), jnp.float32)
    p["w_dc3"] = normal(ks[6], (dim * 2, dim, K, K), 0.02)
    p["g4"] = 1.0 + normal(ks[7], (dim,), 0.02)
    p["b4"] = jnp.zeros((dim,), jnp.float32)
    p["w_dc4"] = normal(ks[8], (dim, 3, K, K), 0.02)
    bound = 1.0 / ((dim * K * K) ** 0.5)
    p["bias4"] = jax.random.uniform(ks[9], (3,), jnp.float32, -bound, bound)
    return p


if __name__ == "__main__":
    in_dim, dim, B = 16, 8, 2   # small synthetic config
    key = jax.random.PRNGKey(0)
    kp, kx = jax.random.split(key)
    params = init_params(kp, in_dim, dim)
    x = jax.random.normal(kx, (B, in_dim), jnp.float32)

    fwd = jax.jit(netg_forward)
    y = jax.block_until_ready(fwd(params, x))

    assert y.shape == (B, 3, 64, 64), y.shape
    assert bool(jnp.all(jnp.isfinite(y)))
    assert bool(jnp.all(jnp.abs(y) <= 1.0 + 1e-6))   # tanh output range

    y_ref = jax.block_until_ready(jax.jit(ref_forward)(params, x))
    err = float(jnp.max(jnp.abs(y - y_ref)))
    assert err < 2e-2, f"mismatch vs XLA reference: max |diff| = {err}"

    print("KERNEL_OK")
</pallas_src>

<mosaic_0001>
module attributes {stable_mosaic.version = 11 : i64} {
  func.func @linear_bn_relu_kernel(%arg0: i32, %arg1: memref<2x16xbf16, #tpu.memory_space<vmem>>, %arg2: memref<16x512xbf16, #tpu.memory_space<vmem>>, %arg3: memref<1x512xf32, #tpu.memory_space<vmem>>, %arg4: memref<1x512xf32, #tpu.memory_space<vmem>>, %arg5: memref<2x512xbf16, #tpu.memory_space<vmem>>) attributes {dimension_semantics = [#tpu.dimension_semantics<parallel>], iteration_bounds = array<i64: 2>, scalar_prefetch = 0 : i64, scratch_operands = 0 : i64, tpu.core_type = #tpu.core_type<tc>, window_params = [{pipeline_mode = #tpu.pipeline_mode<synchronous>, transform_indices = @transform_0, window_bounds = array<i64: 2, 16>}, {transform_indices = @transform_1, window_bounds = array<i64: 16, 512>}, {transform_indices = @transform_2, window_bounds = array<i64: 1, 512>}, {transform_indices = @transform_3, window_bounds = array<i64: 1, 512>}, {transform_indices = @transform_4, window_bounds = array<i64: 2, 512>}]} {
    %c0 = arith.constant 0 : index
    %c0_0 = arith.constant 0 : index
    %0 = vector.load %arg1[%c0, %c0_0] : memref<2x16xbf16, #tpu.memory_space<vmem>>, vector<2x16xbf16>
    %c0_1 = arith.constant 0 : index
    %c0_2 = arith.constant 0 : index
    %1 = vector.load %arg2[%c0_1, %c0_2] : memref<16x512xbf16, #tpu.memory_space<vmem>>, vector<16x512xbf16>
    %cst = arith.constant dense<0.000000e+00> : vector<2x512xf32>
    %2 = tpu.matmul %0, %1, %cst {dimension_numbers = #tpu.dot_dimension_numbers<[1], [0], [0], [1], [0, 0, 1, 1], [], []>} : vector<2x16xbf16>, vector<16x512xbf16>, vector<2x512xf32> -> vector<2x512xf32>
    %cst_3 = arith.constant dense<0.000000e+00> : vector<512xf32>
    %3 = vector.multi_reduction <add>, %2, %cst_3 [0] : vector<2x512xf32> to vector<512xf32>
    %4 = vector.shape_cast %3 : vector<512xf32> to vector<1x512xf32>
    %cst_4 = arith.constant 2.000000e+00 : f32
    %5 = vector.broadcast %cst_4 : f32 to vector<1x512xf32>
    %6 = arith.divf %4, %5 : vector<1x512xf32>
    %7 = vector.broadcast %6 : vector<1x512xf32> to vector<2x512xf32>
    %8 = arith.subf %2, %7 : vector<2x512xf32>
    %9 = arith.mulf %8, %8 : vector<2x512xf32>
    %cst_5 = arith.constant dense<0.000000e+00> : vector<512xf32>
    %10 = vector.multi_reduction <add>, %9, %cst_5 [0] : vector<2x512xf32> to vector<512xf32>
    %11 = vector.shape_cast %10 : vector<512xf32> to vector<1x512xf32>
    %cst_6 = arith.constant 2.000000e+00 : f32
    %12 = vector.broadcast %cst_6 : f32 to vector<1x512xf32>
    %13 = arith.divf %11, %12 : vector<1x512xf32>
    %14 = vector.broadcast %6 : vector<1x512xf32> to vector<2x512xf32>
    %15 = arith.subf %2, %14 : vector<2x512xf32>
    %cst_7 = arith.constant 9.99999974E-6 : f32
    %16 = vector.broadcast %cst_7 : f32 to vector<1x512xf32>
    %17 = arith.addf %13, %16 : vector<1x512xf32>
    %18 = math.rsqrt %17 : vector<1x512xf32>
    %19 = vector.broadcast %18 : vector<1x512xf32> to vector<2x512xf32>
    %20 = arith.mulf %15, %19 : vector<2x512xf32>
    %c0_8 = arith.constant 0 : index
    %c0_9 = arith.constant 0 : index
    %21 = vector.load %arg3[%c0_8, %c0_9] : memref<1x512xf32, #tpu.memory_space<vmem>>, vector<1x512xf32>
    %22 = vector.broadcast %21 : vector<1x512xf32> to vector<2x512xf32>
    %23 = arith.mulf %20, %22 : vector<2x512xf32>
    %c0_10 = arith.constant 0 : index
    %c0_11 = arith.constant 0 : index
    %24 = vector.load %arg4[%c0_10, %c0_11] : memref<1x512xf32, #tpu.memory_space<vmem>>, vector<1x512xf32>
    %25 = vector.broadcast %24 : vector<1x512xf32> to vector<2x512xf32>
    %26 = arith.addf %23, %25 : vector<2x512xf32>
    %cst_12 = arith.constant 0.000000e+00 : f32
    %27 = vector.broadcast %cst_12 : f32 to vector<2x512xf32>
    %28 = arith.maximumf %26, %27 : vector<2x512xf32>
    %29 = arith.truncf %28 : vector<2x512xf32> to vector<2x512xbf16>
    %c0_13 = arith.constant 0 : index
    %c0_14 = arith.constant 0 : index
    %30 = vector.load %arg5[%c0_13, %c0_14] : memref<2x512xbf16, #tpu.memory_space<vmem>>, vector<2x512xbf16>
    tpu.vector_store %arg5[%c0_13, %c0_14], %29 {strides = array<i32>} : memref<2x512xbf16, #tpu.memory_space<vmem>>, vector<2x512xbf16>,
    return
  }
  func.func @transform_0(%arg0: i32) -> (i32, i32) {
    %c0_i32 = arith.constant 0 : i32
    %c0_i32_0 = arith.constant 0 : i32
    %c0_i32_1 = arith.constant 0 : i32
    return %c0_i32, %c0_i32_0 : i32, i32
  }
  func.func @transform_1(%arg0: i32) -> (i32, i32) {
    %c0_i32 = arith.constant 0 : i32
    %c0_i32_0 = arith.constant 0 : i32
    return %c0_i32, %arg0 : i32, i32
  }
  func.func @transform_2(%arg0: i32) -> (i32, i32) {
    %c0_i32 = arith.constant 0 : i32
    %c0_i32_0 = arith.constant 0 : i32
    return %c0_i32, %arg0 : i32, i32
  }
  func.func @transform_3(%arg0: i32) -> (i32, i32) {
    %c0_i32 = arith.constant 0 : i32
    %c0_i32_0 = arith.constant 0 : i32
    return %c0_i32, %arg0 : i32, i32
  }
  func.func @transform_4(%arg0: i32) -> (i32, i32) {
    %c0_i32 = arith.constant 0 : i32
    %c0_i32_0 = arith.constant 0 : i32
    return %c0_i32, %arg0 : i32, i32
  }
}

module attributes {stable_mosaic.version = 11 : i64} {
  func.func @kernel(%arg0: i32, %arg1: memref<1x64x128xbf16, #tpu.memory_space<vmem>>, %arg2: memref<9x128x64xbf16, #tpu.memory_space<vmem>>, %arg3: memref<1x36xf32, #tpu.memory_space<vmem>>, %arg4: memref<1x128x36xbf16, #tpu.memory_space<vmem>>, %arg5: memref<1x128x2xf32, #tpu.memory_space<vmem>>) attributes {dimension_semantics = [#tpu.dimension_semantics<parallel>], iteration_bounds = array<i64: 2>, scalar_prefetch = 0 : i64, scratch_operands = 0 : i64, tpu.core_type = #tpu.core_type<tc>, window_params = [{transform_indices = @transform_0, window_bounds = array<i64: 1, 64, 128>}, {pipeline_mode = #tpu.pipeline_mode<synchronous>, transform_indices = @transform_1, window_bounds = array<i64: 9, 128, 64>}, {pipeline_mode = #tpu.pipeline_mode<synchronous>, transform_indices = @transform_2, window_bounds = array<i64: 1, 36>}, {transform_indices = @transform_3, window_bounds = array<i64: 1, 128, 36>}, {transform_indices = @transform_4, window_bounds = array<i64: 1, 128, 2>}]} {
    %c0 = arith.constant 0 : index
    %c0_0 = arith.constant 0 : index
    %c0_1 = arith.constant 0 : index
    %0 = vector.load %arg2[%c0, %c0_0, %c0_1] : memref<9x128x64xbf16, #tpu.memory_space<vmem>>, vector<1x128x64xbf16>
    %1 = vector.shape_cast %0 : vector<1x128x64xbf16> to vector<128x64xbf16>
    %c0_2 = arith.constant 0 : index
    %c0_3 = arith.constant 0 : index
    %c0_4 = arith.constant 0 : index
    %2 = vector.load %arg1[%c0_2, %c0_3, %c0_4] : memref<1x64x128xbf16, #tpu.memory_space<vmem>>, vector<1x64x36xbf16>
    %3 = vector.shape_cast %2 : vector<1x64x36xbf16> to vector<64x36xbf16>
    %cst = arith.constant dense<0.000000e+00> : vector<128x36xf32>
    %4 = tpu.matmul %1, %3, %cst {dimension_numbers = #tpu.dot_dimension_numbers<[1], [0], [0], [1], [0, 0, 1, 1], [], []>} : vector<128x64xbf16>, vector<64x36xbf16>, vector<128x36xf32> -> vector<128x36xf32>
    %c1 = arith.constant 1 : index
    %c0_5 = arith.constant 0 : index
    %c0_6 = arith.constant 0 : index
    %5 = vector.load %arg2[%c1, %c0_5, %c0_6] : memref<9x128x64xbf16, #tpu.memory_space<vmem>>, vector<1x128x64xbf16>
    %6 = vector.shape_cast %5 : vector<1x128x64xbf16> to vector<128x64xbf16>
    %c0_7 = arith.constant 0 : index
    %c0_8 = arith.constant 0 : index
    %c1_9 = arith.constant 1 : index
    %7 = vector.load %arg1[%c0_7, %c0_8, %c1_9] : memref<1x64x128xbf16, #tpu.memory_space<vmem>>, vector<1x64x36xbf16>
    %8 = vector.shape_cast %7 : vector<1x64x36xbf16> to vector<64x36xbf16>
    %cst_10 = arith.constant dense<0.000000e+00> : vector<128x36xf32>
    %9 = tpu.matmul %6, %8, %cst_10 {dimension_numbers = #tpu.dot_dimension_numbers<[1], [0], [0], [1], [0, 0, 1, 1], [], []>} : vector<128x64xbf16>, vector<64x36xbf16>, vector<128x36xf32> -> vector<128x36xf32>
    %10 = arith.addf %4, %9 : vector<128x36xf32>
    %c2 = arith.constant 2 : index
    %c0_11 = arith.constant 0 : index
    %c0_12 = arith.constant 0 : index
    %11 = vector.load %arg2[%c2, %c0_11, %c0_12] : memref<9x128x64xbf16, #tpu.memory_space<vmem>>, vector<1x128x64xbf16>
    %12 = vector.shape_cast %11 : vector<1x128x64xbf16> to vector<128x64xbf16>
    %c0_13 = arith.constant 0 : index
    %c0_14 = arith.constant 0 : index
    %c2_15 = arith.constant 2 : index
    %13 = vector.load %arg1[%c0_13, %c0_14, %c2_15] : memref<1x64x128xbf16, #tpu.memory_space<vmem>>, vector<1x64x36xbf16>
    %14 = vector.shape_cast %13 : vector<1x64x36xbf16> to vector<64x36xbf16>
    %cst_16 = arith.constant dense<0.000000e+00> : vector<128x36xf32>
    %15 = tpu.matmul %12, %14, %cst_16 {dimension_numbers = #tpu.dot_dimension_numbers<[1], [0], [0], [1], [0, 0, 1, 1], [], []>} : vector<128x64xbf16>, vector<64x36xbf16>, vector<128x36xf32> -> vector<128x36xf32>
    %16 = arith.addf %10, %15 : vector<128x36xf32>
    %c3 = arith.constant 3 : index
    %c0_17 = arith.constant 0 : index
    %c0_18 = arith.constant 0 : index
    %17 = vector.load %arg2[%c3, %c0_17, %c0_18] : memref<9x128x64xbf16, #tpu.memory_space<vmem>>, vector<1x128x64xbf16>
    %18 = vector.shape_cast %17 : vector<1x128x64xbf16> to vector<128x64xbf16>
    %c0_19 = arith.constant 0 : index
    %c0_20 = arith.constant 0 : index
    %c6 = arith.constant 6 : index
    %19 = vector.load %arg1[%c0_19, %c0_20, %c6] : memref<1x64x128xbf16, #tpu.memory_space<vmem>>, vector<1x64x36xbf16>
    %20 = vector.shape_cast %19 : vector<1x64x36xbf16> to vector<64x36xbf16>
    %cst_21 = arith.constant dense<0.000000e+00> : vector<128x36xf32>
    %21 = tpu.matmul %18, %20, %cst_21 {dimension_numbers = #tpu.dot_dimension_numbers<[1], [0], [0], [1], [0, 0, 1, 1], [], []>} : vector<128x64xbf16>, vector<64x36xbf16>, vector<128x36xf32> -> vector<128x36xf32>
    %22 = arith.addf %16, %21 : vector<128x36xf32>
    %c4 = arith.constant 4 : index
    %c0_22 = arith.constant 0 : index
    %c0_23 = arith.constant 0 : index
    %23 = vector.load %arg2[%c4, %c0_22, %c0_23] : memref<9x128x64xbf16, #tpu.memory_space<vmem>>, vector<1x128x64xbf16>
    %24 = vector.shape_cast %23 : vector<1x128x64xbf16> to vector<128x64xbf16>
    %c0_24 = arith.constant 0 : index
    %c0_25 = arith.constant 0 : index
    %c7 = arith.constant 7 : index
    %25 = vector.load %arg1[%c0_24, %c0_25, %c7] : memref<1x64x128xbf16, #tpu.memory_space<vmem>>, vector<1x64x36xbf16>
    %26 = vector.shape_cast %25 : vector<1x64x36xbf16> to vector<64x36xbf16>
    %cst_26 = arith.constant dense<0.000000e+00> : vector<128x36xf32>
    %27 = tpu.matmul %24, %26, %cst_26 {dimension_numbers = #tpu.dot_dimension_numbers<[1], [0], [0], [1], [0, 0, 1, 1], [], []>} : vector<128x64xbf16>, vector<64x36xbf16>, vector<128x36xf32> -> vector<128x36xf32>
    %28 = arith.addf %22, %27 : vector<128x36xf32>
    %c5 = arith.constant 5 : index
    %c0_27 = arith.constant 0 : index
    %c0_28 = arith.constant 0 : index
    %29 = vector.load %arg2[%c5, %c0_27, %c0_28] : memref<9x128x64xbf16, #tpu.memory_space<vmem>>, vector<1x128x64xbf16>
    %30 = vector.shape_cast %29 : vector<1x128x64xbf16> to vector<128x64xbf16>
    %c0_29 = arith.constant 0 : index
    %c0_30 = arith.constant 0 : index
    %c8 = arith.constant 8 : index
    %31 = vector.load %arg1[%c0_29, %c0_30, %c8] : memref<1x64x128xbf16, #tpu.memory_space<vmem>>, vector<1x64x36xbf16>
    %32 = vector.shape_cast %31 : vector<1x64x36xbf16> to vector<64x36xbf16>
    %cst_31 = arith.constant dense<0.000000e+00> : vector<128x36xf32>
    %33 = tpu.matmul %30, %32, %cst_31 {dimension_numbers = #tpu.dot_dimension_numbers<[1], [0], [0], [1], [0, 0, 1, 1], [], []>} : vector<128x64xbf16>, vector<64x36xbf16>, vector<128x36xf32> -> vector<128x36xf32>
    %34 = arith.addf %28, %33 : vector<128x36xf32>
    %c6_32 = arith.constant 6 : index
    %c0_33 = arith.constant 0 : index
    %c0_34 = arith.constant 0 : index
    %35 = vector.load %arg2[%c6_32, %c0_33, %c0_34] : memref<9x128x64xbf16, #tpu.memory_space<vmem>>, vector<1x128x64xbf16>
    %36 = vector.shape_cast %35 : vector<1x128x64xbf16> to vector<128x64xbf16>
    %c0_35 = arith.constant 0 : index
    %c0_36 = arith.constant 0 : index
    %c12 = arith.constant 12 : index
    %37 = vector.load %arg1[%c0_35, %c0_36, %c12] : memref<1x64x128xbf16, #tpu.memory_space<vmem>>, vector<1x64x36xbf16>
    %38 = vector.shape_cast %37 : vector<1x64x36xbf16> to vector<64x36xbf16>
    %cst_37 = arith.constant dense<0.000000e+00> : vector<128x36xf32>
    %39 = tpu.matmul %36, %38, %cst_37 {dimension_numbers = #tpu.dot_dimension_numbers<[1], [0], [0], [1], [0, 0, 1, 1], [], []>} : vector<128x64xbf16>, vector<64x36xbf16>, vector<128x36xf32> -> vector<128x36xf32>
    %40 = arith.addf %34, %39 : vector<128x36xf32>
    %c7_38 = arith.constant 7 : index
    %c0_39 = arith.constant 0 : index
    %c0_40 = arith.constant 0 : index
    %41 = vector.load %arg2[%c7_38, %c0_39, %c0_40] : memref<9x128x64xbf16, #tpu.memory_space<vmem>>, vector<1x128x64xbf16>
    %42 = vector.shape_cast %41 : vector<1x128x64xbf16> to vector<128x64xbf16>
    %c0_41 = arith.constant 0 : index
    %c0_42 = arith.constant 0 : index
    %c13 = arith.constant 13 : index
    %43 = vector.load %arg1[%c0_41, %c0_42, %c13] : memref<1x64x128xbf16, #tpu.memory_space<vmem>>, vector<1x64x36xbf16>
    %44 = vector.shape_cast %43 : vector<1x64x36xbf16> to vector<64x36xbf16>
    %cst_43 = arith.constant dense<0.000000e+00> : vector<128x36xf32>
    %45 = tpu.matmul %42, %44, %cst_43 {dimension_numbers = #tpu.dot_dimension_numbers<[1], [0], [0], [1], [0, 0, 1, 1], [], []>} : vector<128x64xbf16>, vector<64x36xbf16>, vector<128x36xf32> -> vector<128x36xf32>
    %46 = arith.addf %40, %45 : vector<128x36xf32>
    %c8_44 = arith.constant 8 : index
    %c0_45 = arith.constant 0 : index
    %c0_46 = arith.constant 0 : index
    %47 = vector.load %arg2[%c8_44, %c0_45, %c0_46] : memref<9x128x64xbf16, #tpu.memory_space<vmem>>, vector<1x128x64xbf16>
    %48 = vector.shape_cast %47 : vector<1x128x64xbf16> to vector<128x64xbf16>
    %c0_47 = arith.constant 0 : index
    %c0_48 = arith.constant 0 : index
    %c14 = arith.constant 14 : index
    %49 = vector.load %arg1[%c0_47, %c0_48, %c14] : memref<1x64x128xbf16, #tpu.memory_space<vmem>>, vector<1x64x36xbf16>
    %50 = vector.shape_cast %49 : vector<1x64x36xbf16> to vector<64x36xbf16>
    %cst_49 = arith.constant dense<0.000000e+00> : vector<128x36xf32>
    %51 = tpu.matmul %48, %50, %cst_49 {dimension_numbers = #tpu.dot_dimension_numbers<[1], [0], [0], [1], [0, 0, 1, 1], [], []>} : vector<128x64xbf16>, vector<64x36xbf16>, vector<128x36xf32> -> vector<128x36xf32>
    %52 = arith.addf %46, %51 : vector<128x36xf32>
    %53 = arith.truncf %52 : vector<128x36xf32> to vector<128x36xbf16>
    %c0_50 = arith.constant 0 : index
    %c0_51 = arith.constant 0 : index
    %c0_52 = arith.constant 0 : index
    %54 = vector.load %arg4[%c0_50, %c0_51, %c0_52] : memref<1x128x36xbf16, #tpu.memory_space<vmem>>, vector<1x128x36xbf16>
    %55 = vector.shape_cast %54 : vector<1x128x36xbf16> to vector<128x36xbf16>
    %56 = vector.shape_cast %53 : vector<128x36xbf16> to vector<1x128x36xbf16>
    tpu.vector_store %arg4[%c0_50, %c0_51, %c0_52], %56 {strides = array<i32>} : memref<1x128x36xbf16, #tpu.memory_space<vmem>>, vector<1x128x36xbf16>,
    %c0_53 = arith.constant 0 : index
    %c0_54 = arith.constant 0 : index
    %57 = vector.load %arg3[%c0_53, %c0_54] : memref<1x36xf32, #tpu.memory_space<vmem>>, vector<1x36xf32>
    %58 = vector.broadcast %57 : vector<1x36xf32> to vector<128x36xf32>
    %59 = arith.mulf %52, %58 : vector<128x36xf32>
    %cst_55 = arith.constant dense<0.000000e+00> : vector<128xf32>
    %60 = vector.multi_reduction <add>, %59, %cst_55 [1] : vector<128x36xf32> to vector<128xf32>
    %61 = vector.shape_cast %60 : vector<128xf32> to vector<128x1xf32>
    %62 = arith.mulf %52, %52 : vector<128x36xf32>
    %63 = vector.broadcast %57 : vector<1x36xf32> to vector<128x36xf32>
    %64 = arith.mulf %62, %63 : vector<128x36xf32>
    %cst_56 = arith.constant dense<0.000000e+00> : vector<128xf32>
    %65 = vector.multi_reduction <add>, %64, %cst_56 [1] : vector<128x36xf32> to vector<128xf32>
    %66 = vector.shape_cast %65 : vector<128xf32> to vector<128x1xf32>
    %67 = tpu.concatenate %61, %66 in 1 : vector<128x1xf32>, vector<128x1xf32> -> vector<128x2xf32>
    %c0_57 = arith.constant 0 : index
    %c0_58 = arith.constant 0 : index
    %c0_59 = arith.constant 0 : index
    %68 = vector.load %arg5[%c0_57, %c0_58, %c0_59] : memref<1x128x2xf32, #tpu.memory_space<vmem>>, vector<1x128x2xf32>
    %69 = vector.shape_cast %68 : vector<1x128x2xf32> to vector<128x2xf32>
    %70 = vector.shape_cast %67 : vector<128x2xf32> to vector<1x128x2xf32>
    tpu.vector_store %arg5[%c0_57, %c0_58, %c0_59], %70 {strides = array<i32>} : memref<1x128x2xf32, #tpu.memory_space<vmem>>, vector<1x128x2xf32>,
    return
  }
  func.func @transform_0(%arg0: i32) -> (i32, i32, i32) {
    %c0_i32 = arith.constant 0 : i32
    %c0_i32_0 = arith.constant 0 : i32
    %c0_i32_1 = arith.constant 0 : i32
    return %arg0, %c0_i32, %c0_i32_0 : i32, i32, i32
  }
  func.func @transform_1(%arg0: i32) -> (i32, i32, i32) {
    %c0_i32 = arith.constant 0 : i32
    %c0_i32_0 = arith.constant 0 : i32
    %c0_i32_1 = arith.constant 0 : i32
    %c0_i32_2 = arith.constant 0 : i32
    return %c0_i32, %c0_i32_0, %c0_i32_1 : i32, i32, i32
  }
  func.func @transform_2(%arg0: i32) -> (i32, i32) {
    %c0_i32 = arith.constant 0 : i32
    %c0_i32_0 = arith.constant 0 : i32
    %c0_i32_1 = arith.constant 0 : i32
    return %c0_i32, %c0_i32_0 : i32, i32
  }
  func.func @transform_3(%arg0: i32) -> (i32, i32, i32) {
    %c0_i32 = arith.constant 0 : i32
    %c0_i32_0 = arith.constant 0 : i32
    %c0_i32_1 = arith.constant 0 : i32
    return %arg0, %c0_i32, %c0_i32_0 : i32, i32, i32
  }
  func.func @transform_4(%arg0: i32) -> (i32, i32, i32) {
    %c0_i32 = arith.constant 0 : i32
    %c0_i32_0 = arith.constant 0 : i32
    %c0_i32_1 = arith.constant 0 : i32
    return %arg0, %c0_i32, %c0_i32_0 : i32, i32, i32
  }
}

module attributes {stable_mosaic.version = 11 : i64} {
  func.func @kernel(%arg0: i32, %arg1: memref<1x32x128xbf16, #tpu.memory_space<vmem>>, %arg2: memref<9x64x32xbf16, #tpu.memory_space<vmem>>, %arg3: memref<1x100xf32, #tpu.memory_space<vmem>>, %arg4: memref<1x64x100xbf16, #tpu.memory_space<vmem>>, %arg5: memref<1x64x2xf32, #tpu.memory_space<vmem>>) attributes {dimension_semantics = [#tpu.dimension_semantics<parallel>], iteration_bounds = array<i64: 2>, scalar_prefetch = 0 : i64, scratch_operands = 0 : i64, tpu.core_type = #tpu.core_type<tc>, window_params = [{transform_indices = @transform_0, window_bounds = array<i64: 1, 32, 128>}, {pipeline_mode = #tpu.pipeline_mode<synchronous>, transform_indices = @transform_1, window_bounds = array<i64: 9, 64, 32>}, {pipeline_mode = #tpu.pipeline_mode<synchronous>, transform_indices = @transform_2, window_bounds = array<i64: 1, 100>}, {transform_indices = @transform_3, window_bounds = array<i64: 1, 64, 100>}, {transform_indices = @transform_4, window_bounds = array<i64: 1, 64, 2>}]} {
    %c0 = arith.constant 0 : index
    %c0_0 = arith.constant 0 : index
    %c0_1 = arith.constant 0 : index
    %0 = vector.load %arg2[%c0, %c0_0, %c0_1] : memref<9x64x32xbf16, #tpu.memory_space<vmem>>, vector<1x64x32xbf16>
    %1 = vector.shape_cast %0 : vector<1x64x32xbf16> to vector<64x32xbf16>
    %c0_2 = arith.constant 0 : index
    %c0_3 = arith.constant 0 : index
    %c0_4 = arith.constant 0 : index
    %2 = vector.load %arg1[%c0_2, %c0_3, %c0_4] : memref<1x32x128xbf16, #tpu.memory_space<vmem>>, vector<1x32x100xbf16>
    %3 = vector.shape_cast %2 : vector<1x32x100xbf16> to vector<32x100xbf16>
    %cst = arith.constant dense<0.000000e+00> : vector<64x100xf32>
    %4 = tpu.matmul %1, %3, %cst {dimension_numbers = #tpu.dot_dimension_numbers<[1], [0], [0], [1], [0, 0, 1, 1], [], []>} : vector<64x32xbf16>, vector<32x100xbf16>, vector<64x100xf32> -> vector<64x100xf32>
    %c1 = arith.constant 1 : index
    %c0_5 = arith.constant 0 : index
    %c0_6 = arith.constant 0 : index
    %5 = vector.load %arg2[%c1, %c0_5, %c0_6] : memref<9x64x32xbf16, #tpu.memory_space<vmem>>, vector<1x64x32xbf16>
    %6 = vector.shape_cast %5 : vector<1x64x32xbf16> to vector<64x32xbf16>
    %c0_7 = arith.constant 0 : index
    %c0_8 = arith.constant 0 : index
    %c1_9 = arith.constant 1 : index
    %7 = vector.load %arg1[%c0_7, %c0_8, %c1_9] : memref<1x32x128xbf16, #tpu.memory_space<vmem>>, vector<1x32x100xbf16>
    %8 = vector.shape_cast %7 : vector<1x32x100xbf16> to vector<32x100xbf16>
    %cst_10 = arith.constant dense<0.000000e+00> : vector<64x100xf32>
    %9 = tpu.matmul %6, %8, %cst_10 {dimension_numbers = #tpu.dot_dimension_numbers<[1], [0], [0], [1], [0, 0, 1, 1], [], []>} : vector<64x32xbf16>, vector<32x100xbf16>, vector<64x100xf32> -> vector<64x100xf32>
    %10 = arith.addf %4, %9 : vector<64x100xf32>
    %c2 = arith.constant 2 : index
    %c0_11 = arith.constant 0 : index
    %c0_12 = arith.constant 0 : index
    %11 = vector.load %arg2[%c2, %c0_11, %c0_12] : memref<9x64x32xbf16, #tpu.memory_space<vmem>>, vector<1x64x32xbf16>
    %12 = vector.shape_cast %11 : vector<1x64x32xbf16> to vector<64x32xbf16>
    %c0_13 = arith.constant 0 : index
    %c0_14 = arith.constant 0 : index
    %c2_15 = arith.constant 2 : index
    %13 = vector.load %arg1[%c0_13, %c0_14, %c2_15] : memref<1x32x128xbf16, #tpu.memory_space<vmem>>, vector<1x32x100xbf16>
    %14 = vector.shape_cast %13 : vector<1x32x100xbf16> to vector<32x100xbf16>
    %cst_16 = arith.constant dense<0.000000e+00> : vector<64x100xf32>
    %15 = tpu.matmul %12, %14, %cst_16 {dimension_numbers = #tpu.dot_dimension_numbers<[1], [0], [0], [1], [0, 0, 1, 1], [], []>} : vector<64x32xbf16>, vector<32x100xbf16>, vector<64x100xf32> -> vector<64x100xf32>
    %16 = arith.addf %10, %15 : vector<64x100xf32>
    %c3 = arith.constant 3 : index
    %c0_17 = arith.constant 0 : index
    %c0_18 = arith.constant 0 : index
    %17 = vector.load %arg2[%c3, %c0_17, %c0_18] : memref<9x64x32xbf16, #tpu.memory_space<vmem>>, vector<1x64x32xbf16>
    %18 = vector.shape_cast %17 : vector<1x64x32xbf16> to vector<64x32xbf16>
    %c0_19 = arith.constant 0 : index
    %c0_20 = arith.constant 0 : index
    %c10 = arith.constant 10 : index
    %19 = vector.load %arg1[%c0_19, %c0_20, %c10] : memref<1x32x128xbf16, #tpu.memory_space<vmem>>, vector<1x32x100xbf16>
    %20 = vector.shape_cast %19 : vector<1x32x100xbf16> to vector<32x100xbf16>
    %cst_21 = arith.constant dense<0.000000e+00> : vector<64x100xf32>
    %21 = tpu.matmul %18, %20, %cst_21 {dimension_numbers = #tpu.dot_dimension_numbers<[1], [0], [0], [1], [0, 0, 1, 1], [], []>} : vector<64x32xbf16>, vector<32x100xbf16>, vector<64x100xf32> -> vector<64x100xf32>
    %22 = arith.addf %16, %21 : vector<64x100xf32>
    %c4 = arith.constant 4 : index
    %c0_22 = arith.constant 0 : index
    %c0_23 = arith.constant 0 : index
    %23 = vector.load %arg2[%c4, %c0_22, %c0_23] : memref<9x64x32xbf16, #tpu.memory_space<vmem>>, vector<1x64x32xbf16>
    %24 = vector.shape_cast %23 : vector<1x64x32xbf16> to vector<64x32xbf16>
    %c0_24 = arith.constant 0 : index
    %c0_25 = arith.constant 0 : index
    %c11 = arith.constant 11 : index
    %25 = vector.load %arg1[%c0_24, %c0_25, %c11] : memref<1x32x128xbf16, #tpu.memory_space<vmem>>, vector<1x32x100xbf16>
    %26 = vector.shape_cast %25 : vector<1x32x100xbf16> to vector<32x100xbf16>
    %cst_26 = arith.constant dense<0.000000e+00> : vector<64x100xf32>
    %27 = tpu.matmul %24, %26, %cst_26 {dimension_numbers = #tpu.dot_dimension_numbers<[1], [0], [0], [1], [0, 0, 1, 1], [], []>} : vector<64x32xbf16>, vector<32x100xbf16>, vector<64x100xf32> -> vector<64x100xf32>
    %28 = arith.addf %22, %27 : vector<64x100xf32>
    %c5 = arith.constant 5 : index
    %c0_27 = arith.constant 0 : index
    %c0_28 = arith.constant 0 : index
    %29 = vector.load %arg2[%c5, %c0_27, %c0_28] : memref<9x64x32xbf16, #tpu.memory_space<vmem>>, vector<1x64x32xbf16>
    %30 = vector.shape_cast %29 : vector<1x64x32xbf16> to vector<64x32xbf16>
    %c0_29 = arith.constant 0 : index
    %c0_30 = arith.constant 0 : index
    %c12 = arith.constant 12 : index
    %31 = vector.load %arg1[%c0_29, %c0_30, %c12] : memref<1x32x128xbf16, #tpu.memory_space<vmem>>, vector<1x32x100xbf16>
    %32 = vector.shape_cast %31 : vector<1x32x100xbf16> to vector<32x100xbf16>
    %cst_31 = arith.constant dense<0.000000e+00> : vector<64x100xf32>
    %33 = tpu.matmul %30, %32, %cst_31 {dimension_numbers = #tpu.dot_dimension_numbers<[1], [0], [0], [1], [0, 0, 1, 1], [], []>} : vector<64x32xbf16>, vector<32x100xbf16>, vector<64x100xf32> -> vector<64x100xf32>
    %34 = arith.addf %28, %33 : vector<64x100xf32>
    %c6 = arith.constant 6 : index
    %c0_32 = arith.constant 0 : index
    %c0_33 = arith.constant 0 : index
    %35 = vector.load %arg2[%c6, %c0_32, %c0_33] : memref<9x64x32xbf16, #tpu.memory_space<vmem>>, vector<1x64x32xbf16>
    %36 = vector.shape_cast %35 : vector<1x64x32xbf16> to vector<64x32xbf16>
    %c0_34 = arith.constant 0 : index
    %c0_35 = arith.constant 0 : index
    %c20 = arith.constant 20 : index
    %37 = vector.load %arg1[%c0_34, %c0_35, %c20] : memref<1x32x128xbf16, #tpu.memory_space<vmem>>, vector<1x32x100xbf16>
    %38 = vector.shape_cast %37 : vector<1x32x100xbf16> to vector<32x100xbf16>
    %cst_36 = arith.constant dense<0.000000e+00> : vector<64x100xf32>
    %39 = tpu.matmul %36, %38, %cst_36 {dimension_numbers = #tpu.dot_dimension_numbers<[1], [0], [0], [1], [0, 0, 1, 1], [], []>} : vector<64x32xbf16>, vector<32x100xbf16>, vector<64x100xf32> -> vector<64x100xf32>
    %40 = arith.addf %34, %39 : vector<64x100xf32>
    %c7 = arith.constant 7 : index
    %c0_37 = arith.constant 0 : index
    %c0_38 = arith.constant 0 : index
    %41 = vector.load %arg2[%c7, %c0_37, %c0_38] : memref<9x64x32xbf16, #tpu.memory_space<vmem>>, vector<1x64x32xbf16>
    %42 = vector.shape_cast %41 : vector<1x64x32xbf16> to vector<64x32xbf16>
    %c0_39 = arith.constant 0 : index
    %c0_40 = arith.constant 0 : index
    %c21 = arith.constant 21 : index
    %43 = vector.load %arg1[%c0_39, %c0_40, %c21] : memref<1x32x128xbf16, #tpu.memory_space<vmem>>, vector<1x32x100xbf16>
    %44 = vector.shape_cast %43 : vector<1x32x100xbf16> to vector<32x100xbf16>
    %cst_41 = arith.constant dense<0.000000e+00> : vector<64x100xf32>
    %45 = tpu.matmul %42, %44, %cst_41 {dimension_numbers = #tpu.dot_dimension_numbers<[1], [0], [0], [1], [0, 0, 1, 1], [], []>} : vector<64x32xbf16>, vector<32x100xbf16>, vector<64x100xf32> -> vector<64x100xf32>
    %46 = arith.addf %40, %45 : vector<64x100xf32>
    %c8 = arith.constant 8 : index
    %c0_42 = arith.constant 0 : index
    %c0_43 = arith.constant 0 : index
    %47 = vector.load %arg2[%c8, %c0_42, %c0_43] : memref<9x64x32xbf16, #tpu.memory_space<vmem>>, vector<1x64x32xbf16>
    %48 = vector.shape_cast %47 : vector<1x64x32xbf16> to vector<64x32xbf16>
    %c0_44 = arith.constant 0 : index
    %c0_45 = arith.constant 0 : index
    %c22 = arith.constant 22 : index
    %49 = vector.load %arg1[%c0_44, %c0_45, %c22] : memref<1x32x128xbf16, #tpu.memory_space<vmem>>, vector<1x32x100xbf16>
    %50 = vector.shape_cast %49 : vector<1x32x100xbf16> to vector<32x100xbf16>
    %cst_46 = arith.constant dense<0.000000e+00> : vector<64x100xf32>
    %51 = tpu.matmul %48, %50, %cst_46 {dimension_numbers = #tpu.dot_dimension_numbers<[1], [0], [0], [1], [0, 0, 1, 1], [], []>} : vector<64x32xbf16>, vector<32x100xbf16>, vector<64x100xf32> -> vector<64x100xf32>
    %52 = arith.addf %46, %51 : vector<64x100xf32>
    %53 = arith.truncf %52 : vector<64x100xf32> to vector<64x100xbf16>
    %c0_47 = arith.constant 0 : index
    %c0_48 = arith.constant 0 : index
    %c0_49 = arith.constant 0 : index
    %54 = vector.load %arg4[%c0_47, %c0_48, %c0_49] : memref<1x64x100xbf16, #tpu.memory_space<vmem>>, vector<1x64x100xbf16>
    %55 = vector.shape_cast %54 : vector<1x64x100xbf16> to vector<64x100xbf16>
    %56 = vector.shape_cast %53 : vector<64x100xbf16> to vector<1x64x100xbf16>
    tpu.vector_store %arg4[%c0_47, %c0_48, %c0_49], %56 {strides = array<i32>} : memref<1x64x100xbf16, #tpu.memory_space<vmem>>, vector<1x64x100xbf16>,
    %c0_50 = arith.constant 0 : index
    %c0_51 = arith.constant 0 : index
    %57 = vector.load %arg3[%c0_50, %c0_51] : memref<1x100xf32, #tpu.memory_space<vmem>>, vector<1x100xf32>
    %58 = vector.broadcast %57 : vector<1x100xf32> to vector<64x100xf32>
    %59 = arith.mulf %52, %58 : vector<64x100xf32>
    %cst_52 = arith.constant dense<0.000000e+00> : vector<64xf32>
    %60 = vector.multi_reduction <add>, %59, %cst_52 [1] : vector<64x100xf32> to vector<64xf32>
    %61 = vector.shape_cast %60 : vector<64xf32> to vector<64x1xf32>
    %62 = arith.mulf %52, %52 : vector<64x100xf32>
    %63 = vector.broadcast %57 : vector<1x100xf32> to vector<64x100xf32>
    %64 = arith.mulf %62, %63 : vector<64x100xf32>
    %cst_53 = arith.constant dense<0.000000e+00> : vector<64xf32>
    %65 = vector.multi_reduction <add>, %64, %cst_53 [1] : vector<64x100xf32> to vector<64xf32>
    %66 = vector.shape_cast %65 : vector<64xf32> to vector<64x1xf32>
    %67 = tpu.concatenate %61, %66 in 1 : vector<64x1xf32>, vector<64x1xf32> -> vector<64x2xf32>
    %c0_54 = arith.constant 0 : index
    %c0_55 = arith.constant 0 : index
    %c0_56 = arith.constant 0 : index
    %68 = vector.load %arg5[%c0_54, %c0_55, %c0_56] : memref<1x64x2xf32, #tpu.memory_space<vmem>>, vector<1x64x2xf32>
    %69 = vector.shape_cast %68 : vector<1x64x2xf32> to vector<64x2xf32>
    %70 = vector.shape_cast %67 : vector<64x2xf32> to vector<1x64x2xf32>
    tpu.vector_store %arg5[%c0_54, %c0_55, %c0_56], %70 {strides = array<i32>} : memref<1x64x2xf32, #tpu.memory_space<vmem>>, vector<1x64x2xf32>,
    return
  }
  func.func @transform_0(%arg0: i32) -> (i32, i32, i32) {
    %c0_i32 = arith.constant 0 : i32
    %c0_i32_0 = arith.constant 0 : i32
    %c0_i32_1 = arith.constant 0 : i32
    return %arg0, %c0_i32, %c0_i32_0 : i32, i32, i32
  }
  func.func @transform_1(%arg0: i32) -> (i32, i32, i32) {
    %c0_i32 = arith.constant 0 : i32
    %c0_i32_0 = arith.constant 0 : i32
    %c0_i32_1 = arith.constant 0 : i32
    %c0_i32_2 = arith.constant 0 : i32
    return %c0_i32, %c0_i32_0, %c0_i32_1 : i32, i32, i32
  }
  func.func @transform_2(%arg0: i32) -> (i32, i32) {
    %c0_i32 = arith.constant 0 : i32
    %c0_i32_0 = arith.constant 0 : i32
    %c0_i32_1 = arith.constant 0 : i32
    return %c0_i32, %c0_i32_0 : i32, i32
  }
  func.func @transform_3(%arg0: i32) -> (i32, i32, i32) {
    %c0_i32 = arith.constant 0 : i32
    %c0_i32_0 = arith.constant 0 : i32
    %c0_i32_1 = arith.constant 0 : i32
    return %arg0, %c0_i32, %c0_i32_0 : i32, i32, i32
  }
  func.func @transform_4(%arg0: i32) -> (i32, i32, i32) {
    %c0_i32 = arith.constant 0 : i32
    %c0_i32_0 = arith.constant 0 : i32
    %c0_i32_1 = arith.constant 0 : i32
    return %arg0, %c0_i32, %c0_i32_0 : i32, i32, i32
  }
}

module attributes {stable_mosaic.version = 11 : i64} {
  func.func @kernel(%arg0: i32, %arg1: memref<1x16x384xbf16, #tpu.memory_space<vmem>>, %arg2: memref<9x32x16xbf16, #tpu.memory_space<vmem>>, %arg3: memref<1x324xf32, #tpu.memory_space<vmem>>, %arg4: memref<1x32x324xbf16, #tpu.memory_space<vmem>>, %arg5: memref<1x32x2xf32, #tpu.memory_space<vmem>>) attributes {dimension_semantics = [#tpu.dimension_semantics<parallel>], iteration_bounds = array<i64: 2>, scalar_prefetch = 0 : i64, scratch_operands = 0 : i64, tpu.core_type = #tpu.core_type<tc>, window_params = [{transform_indices = @transform_0, window_bounds = array<i64: 1, 16, 384>}, {pipeline_mode = #tpu.pipeline_mode<synchronous>, transform_indices = @transform_1, window_bounds = array<i64: 9, 32, 16>}, {pipeline_mode = #tpu.pipeline_mode<synchronous>, transform_indices = @transform_2, window_bounds = array<i64: 1, 324>}, {transform_indices = @transform_3, window_bounds = array<i64: 1, 32, 324>}, {transform_indices = @transform_4, window_bounds = array<i64: 1, 32, 2>}]} {
    %c0 = arith.constant 0 : index
    %c0_0 = arith.constant 0 : index
    %c0_1 = arith.constant 0 : index
    %0 = vector.load %arg2[%c0, %c0_0, %c0_1] : memref<9x32x16xbf16, #tpu.memory_space<vmem>>, vector<1x32x16xbf16>
    %1 = vector.shape_cast %0 : vector<1x32x16xbf16> to vector<32x16xbf16>
    %c0_2 = arith.constant 0 : index
    %c0_3 = arith.constant 0 : index
    %c0_4 = arith.constant 0 : index
    %2 = vector.load %arg1[%c0_2, %c0_3, %c0_4] : memref<1x16x384xbf16, #tpu.memory_space<vmem>>, vector<1x16x324xbf16>
    %3 = vector.shape_cast %2 : vector<1x16x324xbf16> to vector<16x324xbf16>
    %cst = arith.constant dense<0.000000e+00> : vector<32x324xf32>
    %4 = tpu.matmul %1, %3, %cst {dimension_numbers = #tpu.dot_dimension_numbers<[1], [0], [0], [1], [0, 0, 1, 1], [], []>} : vector<32x16xbf16>, vector<16x324xbf16>, vector<32x324xf32> -> vector<32x324xf32>
    %c1 = arith.constant 1 : index
    %c0_5 = arith.constant 0 : index
    %c0_6 = arith.constant 0 : index
    %5 = vector.load %arg2[%c1, %c0_5, %c0_6] : memref<9x32x16xbf16, #tpu.memory_space<vmem>>, vector<1x32x16xbf16>
    %6 = vector.shape_cast %5 : vector<1x32x16xbf16> to vector<32x16xbf16>
    %c0_7 = arith.constant 0 : index
    %c0_8 = arith.constant 0 : index
    %c1_9 = arith.constant 1 : index
    %7 = vector.load %arg1[%c0_7, %c0_8, %c1_9] : memref<1x16x384xbf16, #tpu.memory_space<vmem>>, vector<1x16x324xbf16>
    %8 = vector.shape_cast %7 : vector<1x16x324xbf16> to vector<16x324xbf16>
    %cst_10 = arith.constant dense<0.000000e+00> : vector<32x324xf32>
    %9 = tpu.matmul %6, %8, %cst_10 {dimension_numbers = #tpu.dot_dimension_numbers<[1], [0], [0], [1], [0, 0, 1, 1], [], []>} : vector<32x16xbf16>, vector<16x324xbf16>, vector<32x324xf32> -> vector<32x324xf32>
    %10 = arith.addf %4, %9 : vector<32x324xf32>
    %c2 = arith.constant 2 : index
    %c0_11 = arith.constant 0 : index
    %c0_12 = arith.constant 0 : index
    %11 = vector.load %arg2[%c2, %c0_11, %c0_12] : memref<9x32x16xbf16, #tpu.memory_space<vmem>>, vector<1x32x16xbf16>
    %12 = vector.shape_cast %11 : vector<1x32x16xbf16> to vector<32x16xbf16>
    %c0_13 = arith.constant 0 : index
    %c0_14 = arith.constant 0 : index
    %c2_15 = arith.constant 2 : index
    %13 = vector.load %arg1[%c0_13, %c0_14, %c2_15] : memref<1x16x384xbf16, #tpu.memory_space<vmem>>, vector<1x16x324xbf16>
    %14 = vector.shape_cast %13 : vector<1x16x324xbf16> to vector<16x324xbf16>
    %cst_16 = arith.constant dense<0.000000e+00> : vector<32x324xf32>
    %15 = tpu.matmul %12, %14, %cst_16 {dimension_numbers = #tpu.dot_dimension_numbers<[1], [0], [0], [1], [0, 0, 1, 1], [], []>} : vector<32x16xbf16>, vector<16x324xbf16>, vector<32x324xf32> -> vector<32x324xf32>
    %16 = arith.addf %10, %15 : vector<32x324xf32>
    %c3 = arith.constant 3 : index
    %c0_17 = arith.constant 0 : index
    %c0_18 = arith.constant 0 : index
    %17 = vector.load %arg2[%c3, %c0_17, %c0_18] : memref<9x32x16xbf16, #tpu.memory_space<vmem>>, vector<1x32x16xbf16>
    %18 = vector.shape_cast %17 : vector<1x32x16xbf16> to vector<32x16xbf16>
    %c0_19 = arith.constant 0 : index
    %c0_20 = arith.constant 0 : index
    %c18 = arith.constant 18 : index
    %19 = vector.load %arg1[%c0_19, %c0_20, %c18] : memref<1x16x384xbf16, #tpu.memory_space<vmem>>, vector<1x16x324xbf16>
    %20 = vector.shape_cast %19 : vector<1x16x324xbf16> to vector<16x324xbf16>
    %cst_21 = arith.constant dense<0.000000e+00> : vector<32x324xf32>
    %21 = tpu.matmul %18, %20, %cst_21 {dimension_numbers = #tpu.dot_dimension_numbers<[1], [0], [0], [1], [0, 0, 1, 1], [], []>} : vector<32x16xbf16>, vector<16x324xbf16>, vector<32x324xf32> -> vector<32x324xf32>
    %22 = arith.addf %16, %21 : vector<32x324xf32>
    %c4 = arith.constant 4 : index
    %c0_22 = arith.constant 0 : index
    %c0_23 = arith.constant 0 : index
    %23 = vector.load %arg2[%c4, %c0_22, %c0_23] : memref<9x32x16xbf16, #tpu.memory_space<vmem>>, vector<1x32x16xbf16>
    %24 = vector.shape_cast %23 : vector<1x32x16xbf16> to vector<32x16xbf16>
    %c0_24 = arith.constant 0 : index
    %c0_25 = arith.constant 0 : index
    %c19 = arith.constant 19 : index
    %25 = vector.load %arg1[%c0_24, %c0_25, %c19] : memref<1x16x384xbf16, #tpu.memory_space<vmem>>, vector<1x16x324xbf16>
    %26 = vector.shape_cast %25 : vector<1x16x324xbf16> to vector<16x324xbf16>
    %cst_26 = arith.constant dense<0.000000e+00> : vector<32x324xf32>
    %27 = tpu.matmul %24, %26, %cst_26 {dimension_numbers = #tpu.dot_dimension_numbers<[1], [0], [0], [1], [0, 0, 1, 1], [], []>} : vector<32x16xbf16>, vector<16x324xbf16>, vector<32x324xf32> -> vector<32x324xf32>
    %28 = arith.addf %22, %27 : vector<32x324xf32>
    %c5 = arith.constant 5 : index
    %c0_27 = arith.constant 0 : index
    %c0_28 = arith.constant 0 : index
    %29 = vector.load %arg2[%c5, %c0_27, %c0_28] : memref<9x32x16xbf16, #tpu.memory_space<vmem>>, vector<1x32x16xbf16>
    %30 = vector.shape_cast %29 : vector<1x32x16xbf16> to vector<32x16xbf16>
    %c0_29 = arith.constant 0 : index
    %c0_30 = arith.constant 0 : index
    %c20 = arith.constant 20 : index
    %31 = vector.load %arg1[%c0_29, %c0_30, %c20] : memref<1x16x384xbf16, #tpu.memory_space<vmem>>, vector<1x16x324xbf16>
    %32 = vector.shape_cast %31 : vector<1x16x324xbf16> to vector<16x324xbf16>
    %cst_31 = arith.constant dense<0.000000e+00> : vector<32x324xf32>
    %33 = tpu.matmul %30, %32, %cst_31 {dimension_numbers = #tpu.dot_dimension_numbers<[1], [0], [0], [1], [0, 0, 1, 1], [], []>} : vector<32x16xbf16>, vector<16x324xbf16>, vector<32x324xf32> -> vector<32x324xf32>
    %34 = arith.addf %28, %33 : vector<32x324xf32>
    %c6 = arith.constant 6 : index
    %c0_32 = arith.constant 0 : index
    %c0_33 = arith.constant 0 : index
    %35 = vector.load %arg2[%c6, %c0_32, %c0_33] : memref<9x32x16xbf16, #tpu.memory_space<vmem>>, vector<1x32x16xbf16>
    %36 = vector.shape_cast %35 : vector<1x32x16xbf16> to vector<32x16xbf16>
    %c0_34 = arith.constant 0 : index
    %c0_35 = arith.constant 0 : index
    %c36 = arith.constant 36 : index
    %37 = vector.load %arg1[%c0_34, %c0_35, %c36] : memref<1x16x384xbf16, #tpu.memory_space<vmem>>, vector<1x16x324xbf16>
    %38 = vector.shape_cast %37 : vector<1x16x324xbf16> to vector<16x324xbf16>
    %cst_36 = arith.constant dense<0.000000e+00> : vector<32x324xf32>
    %39 = tpu.matmul %36, %38, %cst_36 {dimension_numbers = #tpu.dot_dimension_numbers<[1], [0], [0], [1], [0, 0, 1, 1], [], []>} : vector<32x16xbf16>, vector<16x324xbf16>, vector<32x324xf32> -> vector<32x324xf32>
    %40 = arith.addf %34, %39 : vector<32x324xf32>
    %c7 = arith.constant 7 : index
    %c0_37 = arith.constant 0 : index
    %c0_38 = arith.constant 0 : index
    %41 = vector.load %arg2[%c7, %c0_37, %c0_38] : memref<9x32x16xbf16, #tpu.memory_space<vmem>>, vector<1x32x16xbf16>
    %42 = vector.shape_cast %41 : vector<1x32x16xbf16> to vector<32x16xbf16>
    %c0_39 = arith.constant 0 : index
    %c0_40 = arith.constant 0 : index
    %c37 = arith.constant 37 : index
    %43 = vector.load %arg1[%c0_39, %c0_40, %c37] : memref<1x16x384xbf16, #tpu.memory_space<vmem>>, vector<1x16x324xbf16>
    %44 = vector.shape_cast %43 : vector<1x16x324xbf16> to vector<16x324xbf16>
    %cst_41 = arith.constant dense<0.000000e+00> : vector<32x324xf32>
    %45 = tpu.matmul %42, %44, %cst_41 {dimension_numbers = #tpu.dot_dimension_numbers<[1], [0], [0], [1], [0, 0, 1, 1], [], []>} : vector<32x16xbf16>, vector<16x324xbf16>, vector<32x324xf32> -> vector<32x324xf32>
    %46 = arith.addf %40, %45 : vector<32x324xf32>
    %c8 = arith.constant 8 : index
    %c0_42 = arith.constant 0 : index
    %c0_43 = arith.constant 0 : index
    %47 = vector.load %arg2[%c8, %c0_42, %c0_43] : memref<9x32x16xbf16, #tpu.memory_space<vmem>>, vector<1x32x16xbf16>
    %48 = vector.shape_cast %47 : vector<1x32x16xbf16> to vector<32x16xbf16>
    %c0_44 = arith.constant 0 : index
    %c0_45 = arith.constant 0 : index
    %c38 = arith.constant 38 : index
    %49 = vector.load %arg1[%c0_44, %c0_45, %c38] : memref<1x16x384xbf16, #tpu.memory_space<vmem>>, vector<1x16x324xbf16>
    %50 = vector.shape_cast %49 : vector<1x16x324xbf16> to vector<16x324xbf16>
    %cst_46 = arith.constant dense<0.000000e+00> : vector<32x324xf32>
    %51 = tpu.matmul %48, %50, %cst_46 {dimension_numbers = #tpu.dot_dimension_numbers<[1], [0], [0], [1], [0, 0, 1, 1], [], []>} : vector<32x16xbf16>, vector<16x324xbf16>, vector<32x324xf32> -> vector<32x324xf32>
    %52 = arith.addf %46, %51 : vector<32x324xf32>
    %53 = arith.truncf %52 : vector<32x324xf32> to vector<32x324xbf16>
    %c0_47 = arith.constant 0 : index
    %c0_48 = arith.constant 0 : index
    %c0_49 = arith.constant 0 : index
    %54 = vector.load %arg4[%c0_47, %c0_48, %c0_49] : memref<1x32x324xbf16, #tpu.memory_space<vmem>>, vector<1x32x324xbf16>
    %55 = vector.shape_cast %54 : vector<1x32x324xbf16> to vector<32x324xbf16>
    %56 = vector.shape_cast %53 : vector<32x324xbf16> to vector<1x32x324xbf16>
    tpu.vector_store %arg4[%c0_47, %c0_48, %c0_49], %56 {strides = array<i32>} : memref<1x32x324xbf16, #tpu.memory_space<vmem>>, vector<1x32x324xbf16>,
    %c0_50 = arith.constant 0 : index
    %c0_51 = arith.constant 0 : index
    %57 = vector.load %arg3[%c0_50, %c0_51] : memref<1x324xf32, #tpu.memory_space<vmem>>, vector<1x324xf32>
    %58 = vector.broadcast %57 : vector<1x324xf32> to vector<32x324xf32>
    %59 = arith.mulf %52, %58 : vector<32x324xf32>
    %cst_52 = arith.constant dense<0.000000e+00> : vector<32xf32>
    %60 = vector.multi_reduction <add>, %59, %cst_52 [1] : vector<32x324xf32> to vector<32xf32>
    %61 = vector.shape_cast %60 : vector<32xf32> to vector<32x1xf32>
    %62 = arith.mulf %52, %52 : vector<32x324xf32>
    %63 = vector.broadcast %57 : vector<1x324xf32> to vector<32x324xf32>
    %64 = arith.mulf %62, %63 : vector<32x324xf32>
    %cst_53 = arith.constant dense<0.000000e+00> : vector<32xf32>
    %65 = vector.multi_reduction <add>, %64, %cst_53 [1] : vector<32x324xf32> to vector<32xf32>
    %66 = vector.shape_cast %65 : vector<32xf32> to vector<32x1xf32>
    %67 = tpu.concatenate %61, %66 in 1 : vector<32x1xf32>, vector<32x1xf32> -> vector<32x2xf32>
    %c0_54 = arith.constant 0 : index
    %c0_55 = arith.constant 0 : index
    %c0_56 = arith.constant 0 : index
    %68 = vector.load %arg5[%c0_54, %c0_55, %c0_56] : memref<1x32x2xf32, #tpu.memory_space<vmem>>, vector<1x32x2xf32>
    %69 = vector.shape_cast %68 : vector<1x32x2xf32> to vector<32x2xf32>
    %70 = vector.shape_cast %67 : vector<32x2xf32> to vector<1x32x2xf32>
    tpu.vector_store %arg5[%c0_54, %c0_55, %c0_56], %70 {strides = array<i32>} : memref<1x32x2xf32, #tpu.memory_space<vmem>>, vector<1x32x2xf32>,
    return
  }
  func.func @transform_0(%arg0: i32) -> (i32, i32, i32) {
    %c0_i32 = arith.constant 0 : i32
    %c0_i32_0 = arith.constant 0 : i32
    %c0_i32_1 = arith.constant 0 : i32
    return %arg0, %c0_i32, %c0_i32_0 : i32, i32, i32
  }
  func.func @transform_1(%arg0: i32) -> (i32, i32, i32) {
    %c0_i32 = arith.constant 0 : i32
    %c0_i32_0 = arith.constant 0 : i32
    %c0_i32_1 = arith.constant 0 : i32
    %c0_i32_2 = arith.constant 0 : i32
    return %c0_i32, %c0_i32_0, %c0_i32_1 : i32, i32, i32
  }
  func.func @transform_2(%arg0: i32) -> (i32, i32) {
    %c0_i32 = arith.constant 0 : i32
    %c0_i32_0 = arith.constant 0 : i32
    %c0_i32_1 = arith.constant 0 : i32
    return %c0_i32, %c0_i32_0 : i32, i32
  }
  func.func @transform_3(%arg0: i32) -> (i32, i32, i32) {
    %c0_i32 = arith.constant 0 : i32
    %c0_i32_0 = arith.constant 0 : i32
    %c0_i32_1 = arith.constant 0 : i32
    return %arg0, %c0_i32, %c0_i32_0 : i32, i32, i32
  }
  func.func @transform_4(%arg0: i32) -> (i32, i32, i32) {
    %c0_i32 = arith.constant 0 : i32
    %c0_i32_0 = arith.constant 0 : i32
    %c0_i32_1 = arith.constant 0 : i32
    return %arg0, %c0_i32, %c0_i32_0 : i32, i32, i32
  }
}

module attributes {stable_mosaic.version = 11 : i64} {
  func.func @kernel(%arg0: i32, %arg1: memref<1x8x1280xbf16, #tpu.memory_space<vmem>>, %arg2: memref<9x12x8xbf16, #tpu.memory_space<vmem>>, %arg3: memref<12x1xf32, #tpu.memory_space<vmem>>, %arg4: memref<1x12x1156xf32, #tpu.memory_space<vmem>>) attributes {dimension_semantics = [#tpu.dimension_semantics<parallel>], iteration_bounds = array<i64: 2>, scalar_prefetch = 0 : i64, scratch_operands = 0 : i64, tpu.core_type = #tpu.core_type<tc>, window_params = [{transform_indices = @transform_0, window_bounds = array<i64: 1, 8, 1280>}, {pipeline_mode = #tpu.pipeline_mode<synchronous>, transform_indices = @transform_1, window_bounds = array<i64: 9, 12, 8>}, {pipeline_mode = #tpu.pipeline_mode<synchronous>, transform_indices = @transform_2, window_bounds = array<i64: 12, 1>}, {transform_indices = @transform_3, window_bounds = array<i64: 1, 12, 1156>}]} {
    %c0 = arith.constant 0 : index
    %c0_0 = arith.constant 0 : index
    %c0_1 = arith.constant 0 : index
    %0 = vector.load %arg2[%c0, %c0_0, %c0_1] : memref<9x12x8xbf16, #tpu.memory_space<vmem>>, vector<1x12x8xbf16>
    %1 = vector.shape_cast %0 : vector<1x12x8xbf16> to vector<12x8xbf16>
    %c0_2 = arith.constant 0 : index
    %c0_3 = arith.constant 0 : index
    %c0_4 = arith.constant 0 : index
    %2 = vector.load %arg1[%c0_2, %c0_3, %c0_4] : memref<1x8x1280xbf16, #tpu.memory_space<vmem>>, vector<1x8x1156xbf16>
    %3 = vector.shape_cast %2 : vector<1x8x1156xbf16> to vector<8x1156xbf16>
    %cst = arith.constant dense<0.000000e+00> : vector<12x1156xf32>
    %4 = tpu.matmul %1, %3, %cst {dimension_numbers = #tpu.dot_dimension_numbers<[1], [0], [0], [1], [0, 0, 1, 1], [], []>} : vector<12x8xbf16>, vector<8x1156xbf16>, vector<12x1156xf32> -> vector<12x1156xf32>
    %c1 = arith.constant 1 : index
    %c0_5 = arith.constant 0 : index
    %c0_6 = arith.constant 0 : index
    %5 = vector.load %arg2[%c1, %c0_5, %c0_6] : memref<9x12x8xbf16, #tpu.memory_space<vmem>>, vector<1x12x8xbf16>
    %6 = vector.shape_cast %5 : vector<1x12x8xbf16> to vector<12x8xbf16>
    %c0_7 = arith.constant 0 : index
    %c0_8 = arith.constant 0 : index
    %c1_9 = arith.constant 1 : index
    %7 = vector.load %arg1[%c0_7, %c0_8, %c1_9] : memref<1x8x1280xbf16, #tpu.memory_space<vmem>>, vector<1x8x1156xbf16>
    %8 = vector.shape_cast %7 : vector<1x8x1156xbf16> to vector<8x1156xbf16>
    %cst_10 = arith.constant dense<0.000000e+00> : vector<12x1156xf32>
    %9 = tpu.matmul %6, %8, %cst_10 {dimension_numbers = #tpu.dot_dimension_numbers<[1], [0], [0], [1], [0, 0, 1, 1], [], []>} : vector<12x8xbf16>, vector<8x1156xbf16>, vector<12x1156xf32> -> vector<12x1156xf32>
    %10 = arith.addf %4, %9 : vector<12x1156xf32>
    %c2 = arith.constant 2 : index
    %c0_11 = arith.constant 0 : index
    %c0_12 = arith.constant 0 : index
    %11 = vector.load %arg2[%c2, %c0_11, %c0_12] : memref<9x12x8xbf16, #tpu.memory_space<vmem>>, vector<1x12x8xbf16>
    %12 = vector.shape_cast %11 : vector<1x12x8xbf16> to vector<12x8xbf16>
    %c0_13 = arith.constant 0 : index
    %c0_14 = arith.constant 0 : index
    %c2_15 = arith.constant 2 : index
    %13 = vector.load %arg1[%c0_13, %c0_14, %c2_15] : memref<1x8x1280xbf16, #tpu.memory_space<vmem>>, vector<1x8x1156xbf16>
    %14 = vector.shape_cast %13 : vector<1x8x1156xbf16> to vector<8x1156xbf16>
    %cst_16 = arith.constant dense<0.000000e+00> : vector<12x1156xf32>
    %15 = tpu.matmul %12, %14, %cst_16 {dimension_numbers = #tpu.dot_dimension_numbers<[1], [0], [0], [1], [0, 0, 1, 1], [], []>} : vector<12x8xbf16>, vector<8x1156xbf16>, vector<12x1156xf32> -> vector<12x1156xf32>
    %16 = arith.addf %10, %15 : vector<12x1156xf32>
    %c3 = arith.constant 3 : index
    %c0_17 = arith.constant 0 : index
    %c0_18 = arith.constant 0 : index
    %17 = vector.load %arg2[%c3, %c0_17, %c0_18] : memref<9x12x8xbf16, #tpu.memory_space<vmem>>, vector<1x12x8xbf16>
    %18 = vector.shape_cast %17 : vector<1x12x8xbf16> to vector<12x8xbf16>
    %c0_19 = arith.constant 0 : index
    %c0_20 = arith.constant 0 : index
    %c34 = arith.constant 34 : index
    %19 = vector.load %arg1[%c0_19, %c0_20, %c34] : memref<1x8x1280xbf16, #tpu.memory_space<vmem>>, vector<1x8x1156xbf16>
    %20 = vector.shape_cast %19 : vector<1x8x1156xbf16> to vector<8x1156xbf16>
    %cst_21 = arith.constant dense<0.000000e+00> : vector<12x1156xf32>
    %21 = tpu.matmul %18, %20, %cst_21 {dimension_numbers = #tpu.dot_dimension_numbers<[1], [0], [0], [1], [0, 0, 1, 1], [], []>} : vector<12x8xbf16>, vector<8x1156xbf16>, vector<12x1156xf32> -> vector<12x1156xf32>
    %22 = arith.addf %16, %21 : vector<12x1156xf32>
    %c4 = arith.constant 4 : index
    %c0_22 = arith.constant 0 : index
    %c0_23 = arith.constant 0 : index
    %23 = vector.load %arg2[%c4, %c0_22, %c0_23] : memref<9x12x8xbf16, #tpu.memory_space<vmem>>, vector<1x12x8xbf16>
    %24 = vector.shape_cast %23 : vector<1x12x8xbf16> to vector<12x8xbf16>
    %c0_24 = arith.constant 0 : index
    %c0_25 = arith.constant 0 : index
    %c35 = arith.constant 35 : index
    %25 = vector.load %arg1[%c0_24, %c0_25, %c35] : memref<1x8x1280xbf16, #tpu.memory_space<vmem>>, vector<1x8x1156xbf16>
    %26 = vector.shape_cast %25 : vector<1x8x1156xbf16> to vector<8x1156xbf16>
    %cst_26 = arith.constant dense<0.000000e+00> : vector<12x1156xf32>
    %27 = tpu.matmul %24, %26, %cst_26 {dimension_numbers = #tpu.dot_dimension_numbers<[1], [0], [0], [1], [0, 0, 1, 1], [], []>} : vector<12x8xbf16>, vector<8x1156xbf16>, vector<12x1156xf32> -> vector<12x1156xf32>
    %28 = arith.addf %22, %27 : vector<12x1156xf32>
    %c5 = arith.constant 5 : index
    %c0_27 = arith.constant 0 : index
    %c0_28 = arith.constant 0 : index
    %29 = vector.load %arg2[%c5, %c0_27, %c0_28] : memref<9x12x8xbf16, #tpu.memory_space<vmem>>, vector<1x12x8xbf16>
    %30 = vector.shape_cast %29 : vector<1x12x8xbf16> to vector<12x8xbf16>
    %c0_29 = arith.constant 0 : index
    %c0_30 = arith.constant 0 : index
    %c36 = arith.constant 36 : index
    %31 = vector.load %arg1[%c0_29, %c0_30, %c36] : memref<1x8x1280xbf16, #tpu.memory_space<vmem>>, vector<1x8x1156xbf16>
    %32 = vector.shape_cast %31 : vector<1x8x1156xbf16> to vector<8x1156xbf16>
    %cst_31 = arith.constant dense<0.000000e+00> : vector<12x1156xf32>
    %33 = tpu.matmul %30, %32, %cst_31 {dimension_numbers = #tpu.dot_dimension_numbers<[1], [0], [0], [1], [0, 0, 1, 1], [], []>} : vector<12x8xbf16>, vector<8x1156xbf16>, vector<12x1156xf32> -> vector<12x1156xf32>
    %34 = arith.addf %28, %33 : vector<12x1156xf32>
    %c6 = arith.constant 6 : index
    %c0_32 = arith.constant 0 : index
    %c0_33 = arith.constant 0 : index
    %35 = vector.load %arg2[%c6, %c0_32, %c0_33] : memref<9x12x8xbf16, #tpu.memory_space<vmem>>, vector<1x12x8xbf16>
    %36 = vector.shape_cast %35 : vector<1x12x8xbf16> to vector<12x8xbf16>
    %c0_34 = arith.constant 0 : index
    %c0_35 = arith.constant 0 : index
    %c68 = arith.constant 68 : index
    %37 = vector.load %arg1[%c0_34, %c0_35, %c68] : memref<1x8x1280xbf16, #tpu.memory_space<vmem>>, vector<1x8x1156xbf16>
    %38 = vector.shape_cast %37 : vector<1x8x1156xbf16> to vector<8x1156xbf16>
    %cst_36 = arith.constant dense<0.000000e+00> : vector<12x1156xf32>
    %39 = tpu.matmul %36, %38, %cst_36 {dimension_numbers = #tpu.dot_dimension_numbers<[1], [0], [0], [1], [0, 0, 1, 1], [], []>} : vector<12x8xbf16>, vector<8x1156xbf16>, vector<12x1156xf32> -> vector<12x1156xf32>
    %40 = arith.addf %34, %39 : vector<12x1156xf32>
    %c7 = arith.constant 7 : index
    %c0_37 = arith.constant 0 : index
    %c0_38 = arith.constant 0 : index
    %41 = vector.load %arg2[%c7, %c0_37, %c0_38] : memref<9x12x8xbf16, #tpu.memory_space<vmem>>, vector<1x12x8xbf16>
    %42 = vector.shape_cast %41 : vector<1x12x8xbf16> to vector<12x8xbf16>
    %c0_39 = arith.constant 0 : index
    %c0_40 = arith.constant 0 : index
    %c69 = arith.constant 69 : index
    %43 = vector.load %arg1[%c0_39, %c0_40, %c69] : memref<1x8x1280xbf16, #tpu.memory_space<vmem>>, vector<1x8x1156xbf16>
    %44 = vector.shape_cast %43 : vector<1x8x1156xbf16> to vector<8x1156xbf16>
    %cst_41 = arith.constant dense<0.000000e+00> : vector<12x1156xf32>
    %45 = tpu.matmul %42, %44, %cst_41 {dimension_numbers = #tpu.dot_dimension_numbers<[1], [0], [0], [1], [0, 0, 1, 1], [], []>} : vector<12x8xbf16>, vector<8x1156xbf16>, vector<12x1156xf32> -> vector<12x1156xf32>
    %46 = arith.addf %40, %45 : vector<12x1156xf32>
    %c8 = arith.constant 8 : index
    %c0_42 = arith.constant 0 : index
    %c0_43 = arith.constant 0 : index
    %47 = vector.load %arg2[%c8, %c0_42, %c0_43] : memref<9x12x8xbf16, #tpu.memory_space<vmem>>, vector<1x12x8xbf16>
    %48 = vector.shape_cast %47 : vector<1x12x8xbf16> to vector<12x8xbf16>
    %c0_44 = arith.constant 0 : index
    %c0_45 = arith.constant 0 : index
    %c70 = arith.constant 70 : index
    %49 = vector.load %arg1[%c0_44, %c0_45, %c70] : memref<1x8x1280xbf16, #tpu.memory_space<vmem>>, vector<1x8x1156xbf16>
    %50 = vector.shape_cast %49 : vector<1x8x1156xbf16> to vector<8x1156xbf16>
    %cst_46 = arith.constant dense<0.000000e+00> : vector<12x1156xf32>
    %51 = tpu.matmul %48, %50, %cst_46 {dimension_numbers = #tpu.dot_dimension_numbers<[1], [0], [0], [1], [0, 0, 1, 1], [], []>} : vector<12x8xbf16>, vector<8x1156xbf16>, vector<12x1156xf32> -> vector<12x1156xf32>
    %52 = arith.addf %46, %51 : vector<12x1156xf32>
    %c0_47 = arith.constant 0 : index
    %c0_48 = arith.constant 0 : index
    %53 = vector.load %arg3[%c0_47, %c0_48] : memref<12x1xf32, #tpu.memory_space<vmem>>, vector<12x1xf32>
    %54 = vector.broadcast %53 : vector<12x1xf32> to vector<12x1156xf32>
    %55 = arith.addf %52, %54 : vector<12x1156xf32>
    %56 = math.tanh %55 : vector<12x1156xf32>
    %c0_49 = arith.constant 0 : index
    %c0_50 = arith.constant 0 : index
    %c0_51 = arith.constant 0 : index
    %57 = vector.load %arg4[%c0_49, %c0_50, %c0_51] : memref<1x12x1156xf32, #tpu.memory_space<vmem>>, vector<1x12x1156xf32>
    %58 = vector.shape_cast %57 : vector<1x12x1156xf32> to vector<12x1156xf32>
    %59 = vector.shape_cast %56 : vector<12x1156xf32> to vector<1x12x1156xf32>
    tpu.vector_store %arg4[%c0_49, %c0_50, %c0_51], %59 {strides = array<i32>} : memref<1x12x1156xf32, #tpu.memory_space<vmem>>, vector<1x12x1156xf32>,
    return
  }
  func.func @transform_0(%arg0: i32) -> (i32, i32, i32) {
    %c0_i32 = arith.constant 0 : i32
    %c0_i32_0 = arith.constant 0 : i32
    %c0_i32_1 = arith.constant 0 : i32
    return %arg0, %c0_i32, %c0_i32_0 : i32, i32, i32
  }
  func.func @transform_1(%arg0: i32) -> (i32, i32, i32) {
    %c0_i32 = arith.constant 0 : i32
    %c0_i32_0 = arith.constant 0 : i32
    %c0_i32_1 = arith.constant 0 : i32
    %c0_i32_2 = arith.constant 0 : i32
    return %c0_i32, %c0_i32_0, %c0_i32_1 : i32, i32, i32
  }
  func.func @transform_2(%arg0: i32) -> (i32, i32) {
    %c0_i32 = arith.constant 0 : i32
    %c0_i32_0 = arith.constant 0 : i32
    %c0_i32_1 = arith.constant 0 : i32
    return %c0_i32, %c0_i32_0 : i32, i32
  }
  func.func @transform_3(%arg0: i32) -> (i32, i32, i32) {
    %c0_i32 = arith.constant 0 : i32
    %c0_i32_0 = arith.constant 0 : i32
    %c0_i32_1 = arith.constant 0 : i32
    return %arg0, %c0_i32, %c0_i32_0 : i32, i32, i32
  }
}

</mosaic_0001>

<bundles_post_ra>
// kernel: tile.8
= control target key start
LH: loop header
LB: loop body
LE: loop exit
PB: predicated region body
PF: predicated region fallthrough
CT: control target
= control target key end

     0   :  { %2 = vsyncpa [#allocation1], 0  ;;  %s44_s6 = smov [#allocation0]   ;;  %s70_s0 = inlined_call_operand.hbm [shape: f32[3], index: 0, kind: input, shape index: {}]   ;;  %s71_s1 = inlined_call_operand.vmem [shape: f32[4,3], index: 1, kind: output, shape index: {}]  }
   0x1   :  { %s9_s7 = sshll.u32 %s44_s6, 4  ;;  %s20_s10 = scalar_lea.hbm %s70_s0, 16  ;;  %s10_s7 = int_to_ptr.vmem [resolvable:$true] %s9_s7 }
   0x2   :  { %p21_p0 = scmp.ne.s32.totalorder %s70_s0, %s20_s10  ;;  %p24_p1 = scmp.lt.u32.totalorder %s20_s10, %s70_s0 }
   0x4   :  { %p26_p2 = pnand %p24_p1, %p21_p0 }
   0x6   :  { %29 = shalt.err (!%p26_p2)
}
   0x7   :  { %s30_s15 = scalar_lea.vmem %s10_s7, 16  ;;  %s34_s16 = scalar_lea.vmem %s10_s7, 32 }
   0x8   :  { %p31_p3 = scmp.ne.s32.totalorder %s10_s7, %s30_s15  ;;  %p35_p4 = scmp.lt.s32.totalorder %s10_s7, %s10_s7 }
   0x9   :  { %p36_p5 = scmp.lt.s32.totalorder %s34_s16, %s30_s15 }
   0xb   :  { %p37_p6 = por %p36_p5, %p35_p4 }
   0xd   :  { %p38_p7 = pnand %p37_p6, %p31_p3 }
   0xf   :  { %41 = shalt.err (!%p38_p7)
}
  0x10   :  { %12 = dma.hbm_to_vmem [thread:$0]  %s70_s0, 16, %s10_s7, [#allocation1]  }
  0x11   :  { %42 = dma.done.wait [#allocation1], 16  }
  0x12   :  { %43 = vsyncadd [#allocation1], 4294967280  ;;  %v16_v0 = vld [vmem:[#allocation0] ss:$0 sm:$0xff] }
  0x13   :  { %17 = vst [vmem:[%s71_s1] sm:$0xf] %v16_v0 }
  0x14   :  { %18 = vsyncpa [#allocation1], 1 }

// kernel: tile.0
= control target key start
LH: loop header
LB: loop body
LE: loop exit
PB: predicated region body
PF: predicated region fallthrough
CT: control target
= control target key end

     0   :  { %vm7_vm0 = vcmask 7168   ;;  %s26_s10 = smov 126   ;;  %s49_s0 = inlined_call_operand.vmem [shape: f32[4,3], index: 0, kind: input, shape index: {}]   ;;  %s50_s1 = inlined_call_operand.vmem [shape: f32[12,1], index: 1, kind: output, shape index: {}]  }
   0x1   :  { %v4_v0 = vld [vmem:[%s49_s0] sm:$0xf]  ;;  %s25_s0 = smov 127  }
   0x2   :  { %5 = vst [vmem:[#allocation0] sm:$0xf] %v4_v0 }
   0x9   :  { %v9_v1 = vld [vmem:[#allocation0] sm:$0xf]  }
   0xa   :  { %v6_v2 = vld [vmem:[#allocation0] sm:$0xf]   ;;  %10 = vrot.lane.b32.xlu0 %v9_v1, %s25_s0 }
   0xb   :  { %8 = vst.msk [vmem:[%s50_s1] ss:$3 sm:$0xf] %vm7_vm0, %v6_v2   ;;  %v15_v3 = vld [vmem:[#allocation0] sm:$0xf]  }
   0xe   :  { %16 = vrot.lane.b32.xlu0 %v15_v3, %s26_s10 }
  0x7c   :  { %v11_v4 = vpop.permute.xlu0 %10  }
  0x7d   :  { %21 = vst.msk [vmem:[%s50_s1 + $0x1] ss:$3 sm:$0xf] %vm7_vm0, %v11_v4  }
  0x80   :  { %v17_v5 = vpop.permute.xlu0 %16  }
  0x81   :  { %22 = vst.msk [vmem:[%s50_s1 + $0x2] ss:$3 sm:$0xf] %vm7_vm0, %v17_v5  }

// kernel: netg_forward.5
= control target key start
LH: loop header
LB: loop body
LE: loop exit
PB: predicated region body
PF: predicated region fallthrough
CT: control target
= control target key end

     0   :  { %9 = vsyncpa [#allocation4], 0  ;;  %s1071_s0 = inlined_call_operand.vmem [shape: bf16[2,16], index: 0, kind: input, shape index: {}]   ;;  %s1072_s1 = inlined_call_operand.vmem [shape: bf16[16,1024], index: 1, kind: input, shape index: {}]   ;;  %s1073_s2 = inlined_call_operand.hbm [shape: f32[1,1024], index: 2, kind: input, shape index: {}]   ;;  %s1074_s3 = inlined_call_operand.hbm [shape: f32[1,1024], index: 3, kind: input, shape index: {}]   ;;  %s1075_s4 = inlined_call_operand.vmem [shape: bf16[2,1024], index: 4, kind: output, shape index: {}]  }
   0x1   :  { %11 = vsyncpa [#allocation4 + $0x1], 0 }
   0x2   :  { %12 = vsyncpa [#allocation6], 0 }
   0x3   :  { %14 = vsyncpa [#allocation6 + $0x1], 0  ;;  %s901_s15 = smov 0   ;;  %s903_s16 = smov 0  }
   0x4   :  { %s905_s17 = smov 0   ;;  %s907_s18 = smov 0  }
   0x5 LB: > { %s692_s19 = sadd.s32 4294967295, %s870_s18   ;;  %s921_s20 = sadd.s32 1, %s870_s18   ;;  %s870_s18 = sphi %s907_s18, %s1083_s18   ;;  %s866_s17 = sphi %s905_s17, %s1082_s17   ;;  %s862_s16 = sphi %s903_s16, %s1081_s16   ;;  %s858_s15 = sphi %s901_s15, %s1080_s15  }
   0x6   : > { %s45_s21 = ssub.s32 %s870_s18, %s921_s20  ;;  %s48_s22 = sadd.s32 1, %s866_s17 }
   0x7   : > { %p46_p0 = scmp.eq.s32.totalorder %s45_s21, 0  ;;  %p55_p1 = scmp.ne.s32.totalorder %s866_s17, %s862_s16 }
   0x8   : > { %p56_p2 = scmp.eq.s32.totalorder %s870_s18, 0  ;;  %p87_p3 = scmp.ne.s32.totalorder %s862_s16, %s858_s15 }
   0x9   : > { %s931_s23 = scalar_select %p46_p0, %s866_s17, %s48_s22  }
   0xa   : > { %p933_p4 = por %p56_p2, %p55_p1  ;;  %p88_p5 = scmp.eq.s32.totalorder %s692_s19, 0 }
   0xb   : > { %p695_p7 = scmp.ge.s32.totalorder %s870_s18, 2 }
   0xc   : > { %p939_p6 = por %p88_p5, %p87_p3 }
   0xd   : > { %162 = sbr.rel (%p695_p7) target bundleno = 76 (0x4c), region = 20 }
   0xe   : > { %s1078_s25 = scalar_select %p939_p6, 1, 0 }
  0x14   : > { %165 = sbr.rel (!%p933_p4) target bundleno = 27 (0x1b), region = 24  ;;  %s167_s26 = sand.u32 (%p933_p4), 1, %s866_s17  }
  0x15   : > { %s721_s27 = sshll.u32 (%p933_p4), %s870_s18, 4  ;;  %s696_s28 = sshll.u32 (%p933_p4), %s167_s26, 5 }
  0x16   : > { %s172_s5 = scalar_lea.vmem (%p933_p4), %s1072_s1, %s721_s27  ;;  %s169_s6 = scalar_lea.vmem (%p933_p4), [#allocation2], %s696_s28 }
  0x17   : > { %v185_v0 = vld [vmem:[%s172_s5] sm:$0xff] (%p933_p4)  ;;  %v187_v1 = vld [vmem:[%s172_s5 + $0x8] sm:$0xff] (%p933_p4) }
  0x18   : > { %v189_v2 = vld [vmem:[%s172_s5 + $0x20] sm:$0xff] (%p933_p4)  ;;  %186 = vst [vmem:[%s169_s6] sm:$0xff] (%p933_p4), %v185_v0  ;;  %188 = vst [vmem:[%s169_s6 + $0x8] sm:$0xff] (%p933_p4), %v187_v1  ;;  %v191_v3 = vld [vmem:[%s172_s5 + $0x28] sm:$0xff] (%p933_p4) }
  0x19   : > { %190 = vst [vmem:[%s169_s6 + $0x10] sm:$0xff] (%p933_p4), %v189_v2  ;;  %192 = vst [vmem:[%s169_s6 + $0x18] sm:$0xff] (%p933_p4), %v191_v3 }
  0x1b PF: > { %s952_s7 = sand.u32 1, %s866_s17   ;;  %s722_s8 = sshll.u32 %s870_s18, 6 }
  0x1c   : > { %s699_s9 = sshll.u32 %s952_s7, 2  ;;  %s961_s12 = scalar_lea.hbm %s1073_s2, %s722_s8 }
  0x1d   : > { %s203_s13 = scalar_lea.vmem [#allocation3], %s699_s9  ;;  %s200_s15 = scalar_lea.sflag [#allocation4], %s952_s7 }
  0x1e   : > { %s211_s14 = sshll.u32 %s203_s13, 4  ;;  %s776_s21 = scalar_lea.hbm %s961_s12, 64  ;;  %s212_s14 = int_to_ptr.vmem [resolvable:$true] %s211_s14 }
  0x1f   : > { %p777_p8 = scmp.ne.s32.totalorder %s961_s12, %s776_s21  ;;  %s780_s27 = scalar_lea.hbm %s1073_s2, 128 }
  0x20   : > { %p781_p11 = scmp.lt.u32.totalorder %s961_s12, %s1073_s2  ;;  %p782_p12 = scmp.lt.u32.totalorder %s780_s27, %s776_s21 }
  0x21   : > { %p778_p9 = pnand %p777_p8, %p933_p4  ;;  %p784_p0 = scmp.lt.u32.totalorder %s776_s21, %s961_s12 }
  0x22   : > { %p783_p13 = por %p782_p12, %p781_p11 }
  0x23   : > { %p779_p10 = pneg %p778_p9 }
  0x24   : > { %p785_p1 = por %p784_p0, %p783_p13 }
  0x26   : > { %p786_p2 = pnand %p785_p1, %p779_p10 }
  0x28   : > { %789 = shalt.err (!%p786_p2)
}
  0x29   : > { %s790_s30 = scalar_lea.vmem %s212_s14, 64  ;;  %s872_s5 = smov [#allocation3]  }
  0x2a   : > { %p791_p3 = scmp.ne.s32.totalorder %s212_s14, %s790_s30  ;;  %s794_s6 = sshll.u32 %s872_s5, 4  ;;  %s795_s6 = int_to_ptr.vmem [resolvable:$false] %s794_s6 }
  0x2b   : > { %s796_s10 = scalar_lea.vmem %s795_s6, 128  ;;  %p797_p8 = scmp.lt.s32.totalorder %s212_s14, %s795_s6 }
  0x2c   : > { %p792_p5 = pnand %p791_p3, %p933_p4  ;;  %p798_p9 = scmp.lt.s32.totalorder %s796_s10, %s790_s30 }
  0x2e   : > { %p793_p7 = pneg %p792_p5  ;;  %p799_p6 = por %p798_p9, %p797_p8 }
  0x30   : > { %p800_p11 = pnand %p799_p6, %p793_p7 }
  0x32   : > { %803 = shalt.err (!%p800_p11)
}
  0x33   : > { %724 = dma.hbm_to_vmem [thread:$0]  (%p933_p4), %s961_s12, 64, %s212_s14, %s200_s15  }
  0x34   : > { %s988_s21 = scalar_lea.hbm %s1074_s3, %s722_s8  ;;  %s222_s22 = scalar_lea.vmem [#allocation5], %s699_s9 }
  0x35   : > { %s230_s26 = sshll.u32 %s222_s22, 4  ;;  %s219_s27 = scalar_lea.sflag [#allocation6], %s952_s7  ;;  %s231_s26 = int_to_ptr.vmem [resolvable:$true] %s230_s26 }
  0x36   : > { %s804_s28 = scalar_lea.hbm %s988_s21, 64  ;;  %s808_s15 = scalar_lea.hbm %s1074_s3, 128 }
  0x37   : > { %p805_p6 = scmp.ne.s32.totalorder %s988_s21, %s804_s28  ;;  %p809_p13 = scmp.lt.u32.totalorder %s988_s21, %s1074_s3 }
  0x38   : > { %p810_p0 = scmp.lt.u32.totalorder %s808_s15, %s804_s28  ;;  %p812_p2 = scmp.lt.u32.totalorder %s804_s28, %s988_s21 }
  0x39   : > { %p806_p10 = pnand %p805_p6, %p933_p4 }
  0x3a   : > { %p811_p1 = por %p810_p0, %p809_p13 }
  0x3b   : > { %p807_p12 = pneg %p806_p10 }
  0x3c   : > { %p813_p3 = por %p812_p2, %p811_p1 }
  0x3e   : > { %p814_p5 = pnand %p813_p3, %p807_p12 }
  0x40   : > { %817 = shalt.err (!%p814_p5)
}
  0x41   : > { %s818_s7 = scalar_lea.vmem %s231_s26, 64  ;;  %s873_s9 = smov [#allocation5]  }
  0x42   : > { %p819_p7 = scmp.ne.s32.totalorder %s231_s26, %s818_s7  ;;  %s822_s30 = sshll.u32 %s873_s9, 4  ;;  %s823_s30 = int_to_ptr.vmem [resolvable:$false] %s822_s30 }
  0x43   : > { %s824_s5 = scalar_lea.vmem %s823_s30, 128  ;;  %p825_p11 = scmp.lt.s32.totalorder %s231_s26, %s823_s30 }
  0x44   : > { %p820_p8 = pnand %p819_p7, %p933_p4  ;;  %p826_p6 = scmp.lt.s32.totalorder %s824_s5, %s818_s7 }
  0x46   : > { %p821_p9 = pneg %p820_p8  ;;  %p827_p10 = por %p826_p6, %p825_p11 }
  0x48   : > { %p828_p0 = pnand %p827_p10, %p821_p9 }
  0x4a   : > { %831 = shalt.err (!%p828_p0)
}
  0x4b   : > { %725 = dma.hbm_to_vmem [thread:$0]  (%p933_p4), %s988_s21, 64, %s231_s26, %s219_s27  }
  0x4c PF: > { %p705_p12 = scmp.ge.s32.totalorder %s870_s18, 1  ;;  %p235_p13 = scmp.lt.s32.totalorder %s870_s18, 3 }
  0x4e   : > { %p236_p1 = pnand %p705_p12, %p235_p13 }
  0x4f   : > { %s242_s6 = sand.u32 (!%p236_p1), 1, %s862_s16   ;;  %p1079_p2 = scmp.ne.s32.totalorder (!%p236_p1), %s1078_s25, 0 }
  0x50   : > { %239 = sbr.rel (%p236_p1) target bundleno = 373 (0x175), region = 55  ;;  %s706_s10 = sshll.u32 (!%p236_p1), %s242_s6, 5 }
  0x51   : > { %s707_s11 = sshll.u32 (!%p236_p1), %s242_s6, 2  ;;  %s244_s13 = scalar_lea.vmem (!%p236_p1), [#allocation2], %s706_s10 }
  0x52   : > { %s249_s22 = scalar_lea.sflag (!%p236_p1), [#allocation4], %s242_s6  ;;  %s1013_s28 = scalar_lea.vmem (!%p236_p1), [#allocation3], %s707_s11 }
  0x57   : > { %849 = dma.done.wait (%p1079_p2), %s249_s22, 64  }
  0x58   : > { %851 = vsyncadd (%p1079_p2), %s249_s22, 4294967232  ;;  %s258_s24 = scalar_lea.sflag [#allocation6], %s242_s6  ;;  %s1019_s21 = scalar_lea.vmem [#allocation5], %s707_s11 }
  0x59   : > { %853 = dma.done.wait (%p1079_p2), %s258_s24, 64  }
  0x5a   : > { %855 = vsyncadd (%p1079_p2), %s258_s24, 4294967232  ;;  %v874_v4 = vmov 0   ;;  %v762_v5 = vld [vmem:[%s244_s13 + $0x4] ss:$16 sps:$4 sm:$0xff]   ;;  %v764_v6 = vld [vmem:[%s244_s13 + $0xc] ss:$16 sps:$4 sm:$0xff]  }
  0x5b   : > { %364 = vmatprep.mubr.bf16.mxu0 %v874_v4  ;;  %405 = vmatprep.mubr.bf16.mxu1 %v874_v4  ;;  %v766_v7 = vld [vmem:[%s244_s13] ss:$16 sps:$4 sm:$0xff]   ;;  %v767_v8 = vld [vmem:[%s244_s13 + $0x8] ss:$16 sps:$4 sm:$0xff]   ;;  %vm328_vm0 = vcmask 130048   ;;  %vm414_vm1 = vcmask 1041408  }
  0x5c   : > { %332 = vmatprep.subr.bf16.mxu0 %v762_v5  ;;  %373 = vmatprep.subr.bf16.mxu1 %v764_v6  ;;  %v303_v9 = vld [vmem:[%s1071_s0] sm:$0x1]  ;;  %s709_s25 = sshll.u32 %s692_s19, 2 }
  0x5d   : > { %333 = vmatpush1.bf16.msra.mxu0 %v766_v7  ;;  %374 = vmatpush1.bf16.msra.mxu1 %v767_v8  ;;  %p298_p4 = scmp.lt.s32.totalorder %s709_s25, 7 }
  0x5f   : > { %s1085_s25 = smov (!%p298_p4, %s709_s25), 7 }
  0x60   : > { %714 = vmatmul.mubr.msk.bf16.vlgmr.msra.gmra.mrb[0].mxu0 %vm328_vm0, %v303_v9  ;;  %715 = vmatmul.mubr.msk.bf16.vlgmr.msra.gmra.mrb[0].mxu1 %vm328_vm0, %v303_v9  ;;  %s300_s12 = scalar_lea.vmem %s1075_s4, %s1085_s25 }
 0x133   : > { %v366_v10 = vpop.f32.mrb[0].mxu0  ;;  %v407_v11 = vpop.f32.mrb[0].mxu1 }
 0x134   : > { %v415_v12 = vsel %vm414_vm1, %v366_v10, 0.0  ;;  %v429_v13 = vsel %vm414_vm1, %v407_v11, 0.0  ;;  %v368_v14 = vpop.f32.mrb[1].mxu0  ;;  %v409_v15 = vpop.f32.mrb[1].mxu1 }
 0x135   : > { %v416_v16 = vrot.slane %v415_v12, 4  ;;  %v430_v17 = vrot.slane %v429_v13, 4  ;;  %v422_v18 = vsel %vm414_vm1, %v368_v14, 0.0  ;;  %v436_v19 = vsel %vm414_vm1, %v409_v15, 0.0  ;;  %v370_v20 = vpop.f32.mrb[2].mxu0  ;;  %v411_v21 = vpop.f32.mrb[2].mxu1 }
 0x136   : > { %v423_v22 = vrot.slane %v422_v18, 4  ;;  %v437_v23 = vrot.slane %v436_v19, 4  ;;  %v371_v24 = vpop.f32.mrb[3].mxu0  ;;  %v412_v25 = vpop.f32.mrb[3].mxu1 }
 0x137   : > { %v417_v26 = vadd.f32 %v416_v16, %v415_v12  ;;  %v431_v27 = vadd.f32 %v430_v17, %v429_v13  ;;  %v502_v24 = vlaneseq }
 0x138   : > { %v424_v28 = vadd.f32 %v423_v22, %v422_v18  ;;  %v438_v29 = vadd.f32 %v437_v23, %v436_v19 }
 0x139   : > { %v418_v30 = vrot.slane %v417_v26, 2  ;;  %v432_v31 = vrot.slane %v431_v27, 2 }
 0x13a   : > { %v425_v32 = vrot.slane %v424_v28, 2  ;;  %v439_v33 = vrot.slane %v438_v29, 2 }
 0x13b   : > { %v419_v34 = vadd.f32 %v418_v30, %v417_v26  ;;  %v433_v35 = vadd.f32 %v432_v31, %v431_v27  ;;  %v503_v31 = vshrl.u32 %v502_v24, 7 }
 0x13c   : > { %v426_v36 = vadd.f32 %v425_v32, %v424_v28  ;;  %v440_v37 = vadd.f32 %v439_v33, %v438_v29  ;;  %v500_v33 = vld [vmem:[%s1013_s28] sm:$0xf] }
 0x13d   : > { %v420_v38 = vrot.slane %v419_v34, 1  ;;  %v434_v39 = vrot.slane %v433_v35, 1  ;;  %v504_v32 = vsub.s32 0, %v503_v31 }
 0x13e   : > { %v427_v40 = vrot.slane %v426_v36, 1  ;;  %v441_v41 = vrot.slane %v440_v37, 1 }
 0x13f   : > { %v421_v42 = vadd.f32 %v420_v38, %v419_v34  ;;  %v435_v43 = vadd.f32 %v434_v39, %v433_v35  ;;  %v512_v34 = vsub.s32 2, %v503_v31  ;;  %v508_v35 = vsub.s32 1, %v503_v31 }
 0x140   : > { %v428_v44 = vadd.f32 %v427_v40, %v426_v36  ;;  %v442_v45 = vadd.f32 %v441_v41, %v440_v37  ;;  %v526_v36 = vld [vmem:[%s1019_s21] sm:$0xf]  ;;  %v516_v37 = vsub.s32 3, %v503_v31  ;;  %v505_v38 = vrot.slane %v500_v33, %v504_v32 }
 0x141   : > { %v444_v46 = vmul.f32 0.5, %v421_v42  ;;  %v446_v47 = vmul.f32 0.5, %v435_v43  ;;  %v513_v40 = vrot.slane %v500_v33, %v512_v34  ;;  %v531_v43 = vrot.slane %v526_v36, %v504_v32 }
 0x142   : > { %v445_v48 = vmul.f32 0.5, %v428_v44  ;;  %v447_v49 = vmul.f32 0.5, %v442_v45  ;;  %v509_v44 = vrot.slane %v500_v33, %v508_v35  ;;  %v875_v45 = vmov 1966171168  }
 0x143   : > { %v448_v50 = vsub.f32 %v366_v10, %v444_v46  ;;  %v1032_v51 = vsub.f32 %v407_v11, %v446_v47  ;;  %v567_v46 = vunpack.c.l.s4 %v875_v45 }
 0x144   : > { %v1034_v52 = vsub.f32 %v368_v14, %v445_v48  ;;  %v1036_v53 = vsub.f32 %v409_v15, %v447_v49  ;;  %v539_v49 = vrot.slane %v526_v36, %v512_v34 }
 0x145   : > { %v452_v54 = vmul.f32 %v448_v50, %v448_v50  ;;  %v454_v55 = vmul.f32 %v1032_v51, %v1032_v51 }
 0x146   : > { %v453_v56 = vmul.f32 %v1034_v52, %v1034_v52  ;;  %v455_v57 = vmul.f32 %v1036_v53, %v1036_v53 }
 0x147   : > { %v456_v58 = vsel %vm414_vm1, %v452_v54, 0.0  ;;  %v470_v59 = vsel %vm414_vm1, %v454_v55, 0.0  ;;  %v517_v54 = vrot.slane %v500_v33, %v516_v37 }
 0x148   : > { %v457_v60 = vrot.slane %v456_v58, 4  ;;  %v471_v61 = vrot.slane %v470_v59, 4  ;;  %v463_v62 = vsel %vm414_vm1, %v453_v56, 0.0  ;;  %v477_v63 = vsel %vm414_vm1, %v455_v57, 0.0 }
 0x149   : > { %v464_v0 = vrot.slane %v463_v62, 4  ;;  %v478_v1 = vrot.slane %v477_v63, 4 }
 0x14a   : > { %v458_v2 = vadd.f32 %v457_v60, %v456_v58  ;;  %v472_v3 = vadd.f32 %v471_v61, %v470_v59  ;;  %v535_v58 = vrot.slane %v526_v36, %v508_v35 }
 0x14b   : > { %v465_v4 = vadd.f32 %v464_v0, %v463_v62  ;;  %v479_v5 = vadd.f32 %v478_v1, %v477_v63  ;;  %v568_v63 = vunpack.c.0.s8 %v567_v46 }
 0x14c   : > { %v459_v6 = vrot.slane %v458_v2, 2  ;;  %v473_v7 = vrot.slane %v472_v3, 2 }
 0x14d   : > { %v466_v8 = vrot.slane %v465_v4, 2  ;;  %v480_v9 = vrot.slane %v479_v5, 2 }
 0x14e   : > { %v460_v10 = vadd.f32 %v459_v6, %v458_v2  ;;  %v474_v11 = vadd.f32 %v473_v7, %v472_v3  ;;  %v571_v6 = vsub.s32 %v568_v63, %v503_v31 }
 0x14f   : > { %v467_v12 = vadd.f32 %v466_v8, %v465_v4  ;;  %v481_v13 = vadd.f32 %v480_v9, %v479_v5 }
 0x150   : > { %v461_v14 = vrot.slane %v460_v10, 1  ;;  %v475_v15 = vrot.slane %v474_v11, 1 }
 0x151   : > { %v468_v16 = vrot.slane %v467_v12, 1  ;;  %v482_v17 = vrot.slane %v481_v13, 1 }
 0x152   : > { %v462_v18 = vadd.f32 %v461_v14, %v460_v10  ;;  %v476_v19 = vadd.f32 %v475_v15, %v474_v11 }
 0x153   : > { %v469_v20 = vadd.f32 %v468_v16, %v467_v12  ;;  %v483_v21 = vadd.f32 %v482_v17, %v481_v13 }
 0x154   : > { %v484_v22 = vmul.f32 0.5, %v462_v18  ;;  %v486_v23 = vmul.f32 0.5, %v476_v19 }
 0x155   : > { %v485_v25 = vmul.f32 0.5, %v469_v20  ;;  %v487_v26 = vmul.f32 0.5, %v483_v21 }
 0x156   : > { %v488_v27 = vadd.f32 1e-05, %v484_v22  ;;  %v490_v28 = vadd.f32 1e-05, %v486_v23 }
 0x157   : > { %v489_v29 = vadd.f32 1e-05, %v485_v25  ;;  %v491_v30 = vadd.f32 1e-05, %v487_v26 }
 0x158   : > { %768 = vrsqrt.f32 %v488_v27 }
 0x159   : > { %770 = vrsqrt.f32 %v490_v28 }
 0x15a   : > { %772 = vrsqrt.f32 %v489_v29 }
 0x15b   : > { %774 = vrsqrt.f32 %v491_v30 }
 0x162   : > { %v769_v39 = vpop.eup %768 }
 0x163   : > { %v771_v41 = vpop.eup %770  ;;  %v496_v42 = vmul.f32 %v769_v39, %v448_v50  ;;  %v543_v50 = vrot.slane %v526_v36, %v516_v37 }
 0x164   : > { %v773_v47 = vpop.eup %772  ;;  %v498_v48 = vmul.f32 %v771_v41, %v1032_v51 }
 0x165   : > { %v775_v55 = vpop.eup %774  ;;  %v522_v56 = vmul.f32 %v505_v38, %v496_v42  ;;  %v497_v57 = vmul.f32 %v773_v47, %v1034_v52 }
 0x166   : > { %v524_v59 = vmul.f32 %v513_v40, %v498_v48  ;;  %v499_v60 = vmul.f32 %v775_v55, %v1036_v53 }
 0x167   : > { %v548_v61 = vadd.f32 %v531_v43, %v522_v56  ;;  %v523_v62 = vmul.f32 %v509_v44, %v497_v57 }
 0x168   : > { %v550_v0 = vadd.f32 %v539_v49, %v524_v59  ;;  %v525_v1 = vmul.f32 %v517_v54, %v499_v60 }
 0x169   : > { %v552_v2 = vmax.f32 %v548_v61, 0.0  ;;  %v549_v51 = vadd.f32 %v535_v58, %v523_v62 }
 0x16a   : > { %v554_v3 = vmax.f32 %v550_v0, 0.0  ;;  %v551_v4 = vadd.f32 %v543_v50, %v525_v1 }
 0x16b   : > { %v553_v5 = vmax.f32 %v549_v51, 0.0 }
 0x16c   : > { %v555_v52 = vmax.f32 %v551_v4, 0.0 }
 0x16d   : > { %v716_v7 = vpack.c.bf16 %v553_v5, %v552_v2 }
 0x16e   : > { %v717_v8 = vpack.c.bf16 %v555_v52, %v554_v3 }
 0x16f   : > { %v572_v9 = vrot.slane %v716_v7, %v571_v6 }
 0x170   : > { %v579_v10 = vrot.slane %v717_v8, %v571_v6 }
 0x172   : > { %v580_v53 = vcombine.low %v572_v9, %v579_v10 }
 0x174   : > { %718 = vst.sshfl [vmem:[%s300_s12] sm:$0x55 pattern:$0x73625140] %v580_v53 }
 0x175 PF: > { %p17_p3 = scmp.ge.s32.totalorder %s921_s20, 4   ;;  %s1080_s15 = smov %s862_s16 }
 0x176   : > { %s1081_s16 = smov %s866_s17  ;;  %s1082_s17 = smov %s931_s23 }
 0x177   : > { %s1083_s18 = smov %s921_s20  ;;  %19 = sbr.rel (!%p17_p3) target bundleno = 5 (0x5), region = 120 }
 0x17e   :  { %610 = vsyncpa [#allocation4], 1 }
 0x17f   :  { %612 = vsyncpa [#allocation4 + $0x1], 1 }
 0x180   :  { %613 = vsyncpa [#allocation6], 1 }
 0x181   :  { %615 = vsyncpa [#allocation6 + $0x1], 1 }

// kernel: squeeze.131
= control target key start
LH: loop header
LB: loop body
LE: loop exit
PB: predicated region body
PF: predicated region fallthrough
CT: control target
= control target key end

     0   :  { %s37_s8 = smov 32   ;;  %vm7_vm0 = vcmask 261120   ;;  %s38_s9 = smov 64   ;;  %s55_s0 = inlined_call_operand.vmem [shape: f32[128], index: 0, kind: input, shape index: {}]   ;;  %s56_s1 = inlined_call_operand.vmem [shape: f32[4,32], index: 1, kind: output, shape index: {}]  }
   0x1   :  { %v4_v0 = vld [vmem:[%s55_s0] sm:$0x1]  ;;  %s36_s0 = smov 96  }
   0x2   :  { %5 = vst [vmem:[#allocation1] sm:$0x1] %v4_v0 }
   0x9   :  { %v9_v1 = vld [vmem:[#allocation1] sm:$0x1]  }
   0xa   :  { %v21_v2 = vld [vmem:[#allocation1] sm:$0x1]   ;;  %10 = vrot.lane.b32.xlu0 %v9_v1, %s36_s0 }
   0xb   :  { %22 = vrot.lane.b32.xlu1 %v21_v2, %s37_s8  ;;  %v6_v3 = vld [vmem:[#allocation1] sm:$0x1]  }
   0xc   :  { %v15_v4 = vld [vmem:[#allocation1] sm:$0x1]   ;;  %8 = vst.msk [vmem:[#allocation0] sm:$0x1] %vm7_vm0, %v6_v3  }
   0xe   :  { %16 = vrot.lane.b32.xlu0 %v15_v4, %s38_s9 }
  0x7c   :  { %v11_v5 = vpop.permute.xlu0 %10  }
  0x7d   :  { %v23_v6 = vpop.permute.xlu1 %22   ;;  %14 = vst.msk [vmem:[#allocation0 + $0x1] sm:$0x1] %vm7_vm0, %v11_v5  }
  0x7e   :  { %26 = vst.msk [vmem:[#allocation0 + $0x3] sm:$0x1] %vm7_vm0, %v23_v6  }
  0x80   :  { %v17_v7 = vpop.permute.xlu0 %16  }
  0x81   :  { %20 = vst.msk [vmem:[#allocation0 + $0x2] sm:$0x1] %vm7_vm0, %v17_v7  }
  0x88   :  { %v30_v8 = vld [vmem:[#allocation0] sm:$0xf] }
  0x89   :  { %32 = vst [vmem:[%s56_s1] sm:$0xf] %v30_v8 }

// kernel: squeeze.158
= control target key start
LH: loop header
LB: loop body
LE: loop exit
PB: predicated region body
PF: predicated region fallthrough
CT: control target
= control target key end

     0   :  { %s37_s8 = smov 80   ;;  %vm7_vm0 = vcmask 130048   ;;  %s38_s9 = smov 96   ;;  %s55_s0 = inlined_call_operand.vmem [shape: f32[64], index: 0, kind: input, shape index: {}]   ;;  %s56_s1 = inlined_call_operand.vmem [shape: f32[4,16], index: 1, kind: output, shape index: {}]  }
   0x1   :  { %v4_v0 = vld [vmem:[%s55_s0] sm:$0x1]  ;;  %s36_s0 = smov 112  }
   0x2   :  { %5 = vst [vmem:[#allocation1] sm:$0x1] %v4_v0 }
   0x9   :  { %v9_v1 = vld [vmem:[#allocation1] sm:$0x1]  }
   0xa   :  { %v21_v2 = vld [vmem:[#allocation1] sm:$0x1]   ;;  %10 = vrot.lane.b32.xlu0 %v9_v1, %s36_s0 }
   0xb   :  { %22 = vrot.lane.b32.xlu1 %v21_v2, %s37_s8  ;;  %v6_v3 = vld [vmem:[#allocation1] sm:$0x1]  }
   0xc   :  { %v15_v4 = vld [vmem:[#allocation1] sm:$0x1]   ;;  %8 = vst.msk [vmem:[#allocation0] sm:$0x1] %vm7_vm0, %v6_v3  }
   0xe   :  { %16 = vrot.lane.b32.xlu0 %v15_v4, %s38_s9 }
  0x7c   :  { %v11_v5 = vpop.permute.xlu0 %10  }
  0x7d   :  { %v23_v6 = vpop.permute.xlu1 %22   ;;  %14 = vst.msk [vmem:[#allocation0 + $0x1] sm:$0x1] %vm7_vm0, %v11_v5  }
  0x7e   :  { %26 = vst.msk [vmem:[#allocation0 + $0x3] sm:$0x1] %vm7_vm0, %v23_v6  }
  0x80   :  { %v17_v7 = vpop.permute.xlu0 %16  }
  0x81   :  { %20 = vst.msk [vmem:[#allocation0 + $0x2] sm:$0x1] %vm7_vm0, %v17_v7  }
  0x88   :  { %v30_v8 = vld [vmem:[#allocation0] sm:$0xf] }
  0x89   :  { %32 = vst [vmem:[%s56_s1] sm:$0xf] %v30_v8 }

// kernel: netg_forward.6
= control target key start
LH: loop header
LB: loop body
LE: loop exit
PB: predicated region body
PF: predicated region fallthrough
CT: control target
= control target key end

     0   :  { %s3327_s15 = smov 0   ;;  %s3914_s0 = inlined_call_operand.vmem [shape: bf16[2,64,128], index: 0, kind: input, shape index: {}]   ;;  %s3915_s1 = inlined_call_operand.vmem [shape: bf16[9,128,64], index: 1, kind: input, shape index: {}]   ;;  %s3916_s2 = inlined_call_operand.vmem [shape: f32[1,36], index: 2, kind: input, shape index: {}]   ;;  %s3917_s3 = inlined_call_operand.vmem [shape: bf16[2,128,36], index: 3, kind: output, shape index: {0}]   ;;  %s3918_s4 = inlined_call_operand.vmem [shape: f32[2,128,2], index: 4, kind: output, shape index: {1}]  }
   0x1 LB: > { %s2409_s16 = sadd.s32 4294967295, %s3292_s15   ;;  %p2413_p0 = scmp.ge.s32.totalorder %s3292_s15, 1  ;;  %s3292_s15 = sphi %s3327_s15, %s15_s15  }
   0x2   : > { %p165_p1 = scmp.lt.s32.totalorder %s3292_s15, 3 }
   0x4   : > { %p166_p2 = pnand %p2413_p0, %p165_p1 }
   0x5   : > { %p196_p3 = scmp.lt.s32.totalorder (!%p166_p2), %s2409_s16, 1  ;;  %s3294_s21 = smov (!%p166_p2), 127   ;;  %vm325_vm0 = vcmask (!%p166_p2), 523264   ;;  %v3214_v2 = vld [vmem:[%s3915_s1 + $0x40] sm:$0xff] (!%p166_p2)   ;;  %v3215_v14 = vld [vmem:[%s3915_s1 + $0x48] sm:$0xff] (!%p166_p2)   ;;  %v3218_v15 = vld [vmem:[%s3915_s1 + $0x50] sm:$0xff] (!%p166_p2)  }
   0x6   : > { %169 = sbr.rel (%p166_p2) target bundleno = 689 (0x2b1), region = 32  ;;  %s3295_s24 = smov (!%p166_p2), 121   ;;  %2850 = vmatprep.mubr.msk.bf16.mxu1 (!%p166_p2), %vm325_vm0, %v3214_v2  ;;  %v3216_v4 = vld [vmem:[%s3915_s1 + $0x100] sm:$0xff] (!%p166_p2)   ;;  %v3217_v17 = vld [vmem:[%s3915_s1 + $0x108] sm:$0xff] (!%p166_p2)   ;;  %v3220_v18 = vld [vmem:[%s3915_s1 + $0x110] sm:$0xff] (!%p166_p2)   ;;  %vm2118_vm1 = vcmask (!%p166_p2), 289792  }
   0x7   : > { %2946 = vmatprep.mubr.msk.bf16.mxu0 (!%p166_p2), %vm325_vm0, %v3216_v4  ;;  %s3296_s27 = smov (!%p166_p2), 120   ;;  %s3297_s28 = smov (!%p166_p2), 116   ;;  %v3219_v21 = vld [vmem:[%s3915_s1 + $0x58] sm:$0xff] (!%p166_p2)   ;;  %v3222_v22 = vld [vmem:[%s3915_s1 + $0x60] sm:$0xff] (!%p166_p2)   ;;  %v3223_v28 = vld [vmem:[%s3915_s1 + $0x68] sm:$0xff] (!%p166_p2)   ;;  %vm2158_vm2 = vcmask (!%p166_p2), 293888  }
   0x8   : > { %s3298_s29 = smov (!%p166_p2), 126   ;;  %s3299_s30 = smov (!%p166_p2), 115   ;;  %v3221_v24 = vld [vmem:[%s3915_s1 + $0x118] sm:$0xff] (!%p166_p2)   ;;  %v3224_v25 = vld [vmem:[%s3915_s1 + $0x140] sm:$0xff] (!%p166_p2)   ;;  %v3226_v29 = vld [vmem:[%s3915_s1 + $0x70] sm:$0xff] (!%p166_p2)   ;;  %vm2287_vm3 = vcmask (!%p166_p2), 7168  }
   0x9   : > { %s3300_s5 = smov (!%p166_p2), 122   ;;  %s3301_s6 = smov (!%p166_p2), 114   ;;  %v3225_v31 = vld [vmem:[%s3915_s1 + $0x148] sm:$0xff] (!%p166_p2)   ;;  %v3228_v32 = vld [vmem:[%s3915_s1 + $0x150] sm:$0xff] (!%p166_p2)   ;;  %v3227_v34 = vld [vmem:[%s3915_s1 + $0x78] sm:$0xff] (!%p166_p2)   ;;  %vm2304_vm4 = vcmask (!%p166_p2), 15360  }
   0xa   : > { %v3230_v35 = vld [vmem:[%s3915_s1] sm:$0xff] (!%p166_p2)   ;;  %v3229_v36 = vld [vmem:[%s3915_s1 + $0x158] sm:$0xff] (!%p166_p2)   ;;  %v3231_v40 = vld [vmem:[%s3915_s1 + $0x8] sm:$0xff] (!%p166_p2)  }
   0xb   : > { %v3232_v37 = vld [vmem:[%s3915_s1 + $0x160] sm:$0xff] (!%p166_p2)   ;;  %v3234_v41 = vld [vmem:[%s3915_s1 + $0x10] sm:$0xff] (!%p166_p2)   ;;  %v3233_v44 = vld [vmem:[%s3915_s1 + $0x168] sm:$0xff] (!%p166_p2)  }
   0xc   : > { %v3236_v45 = vld [vmem:[%s3915_s1 + $0x170] sm:$0xff] (!%p166_p2)   ;;  %v3235_v46 = vld [vmem:[%s3915_s1 + $0x18] sm:$0xff] (!%p166_p2)   ;;  %v3238_v47 = vld [vmem:[%s3915_s1 + $0x20] sm:$0xff] (!%p166_p2)  }
   0xd   : > { %s3920_s16 = smov (!%p196_p3, %s2409_s16), 1  ;;  %v3237_v49 = vld [vmem:[%s3915_s1 + $0x178] sm:$0xff]   ;;  %v3240_v50 = vld [vmem:[%s3915_s1 + $0x180] sm:$0xff]   ;;  %v3239_v53 = vld [vmem:[%s3915_s1 + $0x28] sm:$0xff]  }
   0xe   : > { %s2715_s17 = sshll.u32 %s3920_s16, 5  ;;  %v3242_v54 = vld [vmem:[%s3915_s1 + $0x30] sm:$0xff]   ;;  %v3241_v55 = vld [vmem:[%s3915_s1 + $0x188] sm:$0xff]   ;;  %v3243_v58 = vld [vmem:[%s3915_s1 + $0x38] sm:$0xff]   ;;  %s2717_s9 = sshll.u32 %s3920_s16, 7 }
   0xf   : > { %s200_s20 = scalar_lea.vmem %s3914_s0, %s2715_s17  ;;  %v3244_v56 = vld [vmem:[%s3915_s1 + $0x190] sm:$0xff]   ;;  %v3246_v59 = vld [vmem:[%s3915_s1 + $0x80] sm:$0xff]   ;;  %v3245_v60 = vld [vmem:[%s3915_s1 + $0x198] sm:$0xff]   ;;  %s3861_s12 = scalar_lea.vmem %s3918_s4, %s2717_s9 }
  0x10   : > { %v3341_v0 = vld [vmem:[%s200_s20] sm:$0xff]   ;;  %v3343_v1 = vld [vmem:[%s200_s20 + $0x8] sm:$0xff]   ;;  %v3351_v3 = vld [vmem:[%s200_s20 + $0x10] sm:$0xff]  }
  0x11   : > { %313 = vrot.lane.b32.xlu0 %v3341_v0, %s3294_s21  ;;  %315 = vrot.lane.b32.xlu1 %v3343_v1, %s3294_s21  ;;  %v3360_v5 = vld [vmem:[%s200_s20 + $0x18] sm:$0xff]   ;;  %v3248_v62 = vld [vmem:[%s3915_s1 + $0x1a0] sm:$0xff]  }
  0x12   : > { %v3247_v63 = vld [vmem:[%s3915_s1 + $0x88] sm:$0xff]  }
  0x15   : > { %1081 = vrot.lane.b32.xlu0 %v3341_v0, %s3295_s24  ;;  %1083 = vrot.lane.b32.xlu1 %v3343_v1, %s3295_s24 }
  0x19   : > { %317 = vrot.lane.b32.xlu0 %v3351_v3, %s3294_s21  ;;  %1085 = vrot.lane.b32.xlu1 %v3351_v3, %s3295_s24 }
  0x1d   : > { %319 = vrot.lane.b32.xlu0 %v3360_v5, %s3294_s21  ;;  %1087 = vrot.lane.b32.xlu1 %v3360_v5, %s3295_s24 }
  0x21   : > { %1287 = vrot.lane.b32.xlu0 %v3341_v0, %s3296_s27  ;;  %1289 = vrot.lane.b32.xlu1 %v3343_v1, %s3296_s27 }
  0x25   : > { %1291 = vrot.lane.b32.xlu0 %v3351_v3, %s3296_s27  ;;  %1293 = vrot.lane.b32.xlu1 %v3360_v5, %s3296_s27 }
  0x29   : > { %1493 = vrot.lane.b32.xlu0 %v3341_v0, %s3297_s28  ;;  %1495 = vrot.lane.b32.xlu1 %v3343_v1, %s3297_s28 }
  0x2d   : > { %1497 = vrot.lane.b32.xlu0 %v3351_v3, %s3297_s28  ;;  %1499 = vrot.lane.b32.xlu1 %v3360_v5, %s3297_s28 }
  0x31   : > { %669 = vrot.lane.b32.xlu0 %v3341_v0, %s3298_s29  ;;  %671 = vrot.lane.b32.xlu1 %v3343_v1, %s3298_s29 }
  0x35   : > { %673 = vrot.lane.b32.xlu0 %v3351_v3, %s3298_s29  ;;  %675 = vrot.lane.b32.xlu1 %v3360_v5, %s3298_s29  ;;  %s2716_s29 = sshll.u32 %s3920_s16, 6 }
  0x36   : > { %s3710_s8 = scalar_lea.vmem %s3917_s3, %s2716_s29 }
  0x39   : > { %1699 = vrot.lane.b32.xlu0 %v3341_v0, %s3299_s30  ;;  %1701 = vrot.lane.b32.xlu1 %v3343_v1, %s3299_s30 }
  0x3d   : > { %1703 = vrot.lane.b32.xlu0 %v3351_v3, %s3299_s30  ;;  %1705 = vrot.lane.b32.xlu1 %v3360_v5, %s3299_s30 }
  0x41   : > { %875 = vrot.lane.b32.xlu0 %v3341_v0, %s3300_s5  ;;  %877 = vrot.lane.b32.xlu1 %v3343_v1, %s3300_s5 }
  0x45   : > { %879 = vrot.lane.b32.xlu0 %v3351_v3, %s3300_s5  ;;  %881 = vrot.lane.b32.xlu1 %v3360_v5, %s3300_s5 }
  0x49   : > { %1905 = vrot.lane.b32.xlu0 %v3341_v0, %s3301_s6  ;;  %1907 = vrot.lane.b32.xlu1 %v3343_v1, %s3301_s6 }
  0x4d   : > { %1909 = vrot.lane.b32.xlu0 %v3351_v3, %s3301_s6  ;;  %1911 = vrot.lane.b32.xlu1 %v3360_v5, %s3301_s6 }
  0x83   : > { %v314_v6 = vpop.permute.xlu0 %313  ;;  %v316_v7 = vpop.permute.xlu1 %315 }
  0x84   : > { %2842 = vmatprep.subr.bf16.mxu1 %v314_v6 }
  0x85   : > { %2843 = vmatpush3.bf16.msra.mxu1 %v314_v6  ;;  %v3251_v6 = vld [vmem:[%s3915_s1 + $0x98] sm:$0xff]  }
  0x86   : > { %2844 = vmatprep.subr.bf16.mxu1 %v316_v7 }
  0x87   : > { %v3389_v8 = vpop.permute.xlu0 %1081  ;;  %v3392_v9 = vpop.permute.xlu1 %1083 }
  0x88   : > { %2938 = vmatprep.subr.bf16.mxu0 %v3389_v8 }
  0x89   : > { %2845 = vmatpush3.bf16.msra.mxu1 %v316_v7  ;;  %2939 = vmatpush3.bf16.msra.mxu0 %v3389_v8  ;;  %v3254_v7 = vld [vmem:[%s3915_s1 + $0xa0] sm:$0xff]  }
  0x8a   : > { %2940 = vmatprep.subr.bf16.mxu0 %v3392_v9 }
  0x8b   : > { %v318_v10 = vpop.permute.xlu0 %317  ;;  %v3396_v11 = vpop.permute.xlu1 %1085 }
  0x8c   : > { %2846 = vmatprep.subr.bf16.mxu1 %v318_v10 }
  0x8d   : > { %2847 = vmatpush3.bf16.msra.mxu1 %v318_v10  ;;  %2941 = vmatpush3.bf16.msra.mxu0 %v3392_v9 }
  0x8e   : > { %2942 = vmatprep.subr.bf16.mxu0 %v3396_v11 }
  0x8f   : > { %v320_v12 = vpop.permute.xlu0 %319  ;;  %v3400_v13 = vpop.permute.xlu1 %1087 }
  0x90   : > { %2848 = vmatprep.subr.bf16.mxu1 %v320_v12 }
  0x91   : > { %2849 = vmatpush3.bf16.msra.mxu1 %v320_v12  ;;  %2943 = vmatpush3.bf16.msra.mxu0 %v3396_v11  ;;  %v3253_v12 = vld [vmem:[%s3915_s1 + $0x1b8] sm:$0xff]  }
  0x92   : > { %2944 = vmatprep.subr.bf16.mxu0 %v3400_v13  ;;  %2866 = vmatprep.subr.bf16.mxu1 %v3341_v0 }
  0x93   : > { %v1288_v16 = vpop.permute.xlu0 %1287  ;;  %v1290_v19 = vpop.permute.xlu1 %1289 }
  0x94   : > { %2851 = vmatmul.mubr.msk.bf16.vlgmr.msra.gmra.mrb[0].mxu1 %vm325_vm0, %v3215_v14  ;;  %v3256_v14 = vld [vmem:[%s3915_s1 + $0x1c0] sm:$0xff]  }
  0x95   : > { %2945 = vmatpush3.bf16.msra.mxu0 %v3400_v13  ;;  %2854 = vmatprep.mubr.msk.bf16.mxu1 %vm325_vm0, %v3218_v15  ;;  %v3255_v15 = vld [vmem:[%s3915_s1 + $0xa8] sm:$0xff]  }
  0x96   : > { %2962 = vmatprep.subr.bf16.mxu0 %v1288_v16  ;;  %2867 = vmatpush3.bf16.msra.mxu1 %v3341_v0 }
  0x97   : > { %v1292_v20 = vpop.permute.xlu0 %1291  ;;  %2868 = vmatprep.subr.bf16.mxu1 %v3343_v1  ;;  %v1294_v26 = vpop.permute.xlu1 %1293 }
  0x98   : > { %2947 = vmatmul.mubr.msk.bf16.vlgmr.msra.gmra.mrb[0].mxu0 %vm325_vm0, %v3217_v17  ;;  %v3257_v17 = vld [vmem:[%s3915_s1 + $0x1c8] sm:$0xff]  }
  0x99   : > { %2963 = vmatpush3.bf16.msra.mxu0 %v1288_v16  ;;  %2950 = vmatprep.mubr.msk.bf16.mxu0 %vm325_vm0, %v3220_v18  ;;  %v3258_v16 = vld [vmem:[%s3915_s1 + $0xb0] sm:$0xff]  }
  0x9a   : > { %2964 = vmatprep.subr.bf16.mxu0 %v1290_v19  ;;  %2869 = vmatpush3.bf16.msra.mxu1 %v3343_v1  ;;  %v3250_v1 = vld [vmem:[%s3915_s1 + $0x90] sm:$0xff]  }
  0x9b   : > { %v1494_v23 = vpop.permute.xlu0 %1493  ;;  %2870 = vmatprep.subr.bf16.mxu1 %v3351_v3  ;;  %v1496_v33 = vpop.permute.xlu1 %1495  ;;  %v3260_v18 = vld [vmem:[%s3915_s1 + $0x1d0] sm:$0xff]  }
  0x9c   : > { %2855 = vmatmul.mubr.msk.bf16.gmra.mrb[4].mxu1 %vm325_vm0, %v3219_v21  ;;  %v3262_v21 = vld [vmem:[%s3915_s1 + $0xc0] sm:$0xff]  }
  0x9d   : > { %2965 = vmatpush3.bf16.msra.mxu0 %v1290_v19  ;;  %2858 = vmatprep.mubr.msk.bf16.mxu1 %vm325_vm0, %v3222_v22 }
  0x9e   : > { %2966 = vmatprep.subr.bf16.mxu0 %v1292_v20  ;;  %2871 = vmatpush3.bf16.msra.mxu1 %v3351_v3  ;;  %v3249_v3 = vld [vmem:[%s3915_s1 + $0x1a8] sm:$0xff]  }
  0x9f   : > { %2872 = vmatprep.subr.bf16.mxu1 %v3360_v5  ;;  %v1498_v27 = vpop.permute.xlu0 %1497  ;;  %v1500_v38 = vpop.permute.xlu1 %1499 }
  0xa0   : > { %2951 = vmatmul.mubr.msk.bf16.gmra.mrb[4].mxu0 %vm325_vm0, %v3221_v24  ;;  %v3264_v24 = vld [vmem:[%s3915_s1 + $0x1e0] sm:$0xff]  }
  0xa1   : > { %2967 = vmatpush3.bf16.msra.mxu0 %v1292_v20  ;;  %2970 = vmatprep.mubr.msk.bf16.mxu0 %vm325_vm0, %v3224_v25  ;;  %v3259_v20 = vld [vmem:[%s3915_s1 + $0xb8] sm:$0xff]  }
  0xa2   : > { %2968 = vmatprep.subr.bf16.mxu0 %v1294_v26  ;;  %2873 = vmatpush3.bf16.msra.mxu1 %v3360_v5  ;;  %v3252_v5 = vld [vmem:[%s3915_s1 + $0x1b0] sm:$0xff]  }
  0xa3   : > { %v670_v30 = vpop.permute.xlu0 %669  ;;  %v672_v42 = vpop.permute.xlu1 %671 }
  0xa4   : > { %2859 = vmatmul.mubr.msk.bf16.gmra.mrb[8].mxu1 %vm325_vm0, %v3223_v28  ;;  %2890 = vmatprep.subr.bf16.mxu1 %v670_v30  ;;  %v3265_v28 = vld [vmem:[%s3915_s1 + $0x1e8] sm:$0xff]  }
  0xa5   : > { %2969 = vmatpush3.bf16.msra.mxu0 %v1294_v26  ;;  %2862 = vmatprep.mubr.msk.bf16.mxu1 %vm325_vm0, %v3226_v29  ;;  %v3263_v26 = vld [vmem:[%s3915_s1 + $0xc8] sm:$0xff]   ;;  %v3268_v29 = vld [vmem:[%s3915_s1 + $0x1f0] sm:$0xff]  }
  0xa6   : > { %2986 = vmatprep.subr.bf16.mxu0 %v1494_v23 }
  0xa7   : > { %v674_v39 = vpop.permute.xlu0 %673  ;;  %v676_v51 = vpop.permute.xlu1 %675 }
  0xa8   : > { %2971 = vmatmul.mubr.msk.bf16.vlgmr.msra.gmra.mrb[0].mxu0 %vm325_vm0, %v3225_v31  ;;  %v3269_v31 = vld [vmem:[%s3915_s1 + $0x1f8] sm:$0xff]  }
  0xa9   : > { %2987 = vmatpush3.bf16.msra.mxu0 %v1494_v23  ;;  %2974 = vmatprep.mubr.msk.bf16.mxu0 %vm325_vm0, %v3228_v32  ;;  %v3261_v23 = vld [vmem:[%s3915_s1 + $0x1d8] sm:$0xff]   ;;  %v3271_v32 = vld [vmem:[%s3915_s1 + $0xe8] sm:$0xff]  }
  0xaa   : > { %2988 = vmatprep.subr.bf16.mxu0 %v1496_v33 }
  0xab   : > { %v1700_v43 = vpop.permute.xlu0 %1699  ;;  %v1702_v57 = vpop.permute.xlu1 %1701 }
  0xac   : > { %2863 = vmatmul.mubr.msk.bf16.gmra.mrb[12].mxu1 %vm325_vm0, %v3227_v34  ;;  %v3276_v34 = vld [vmem:[%s3915_s1 + $0x210] sm:$0xff]  }
  0xad   : > { %2989 = vmatpush3.bf16.msra.mxu0 %v1496_v33  ;;  %2874 = vmatprep.mubr.msk.bf16.mxu1 %vm325_vm0, %v3230_v35  ;;  %v3273_v33 = vld [vmem:[%s3915_s1 + $0x208] sm:$0xff]   ;;  %v3278_v35 = vld [vmem:[%s3915_s1 + $0x120] sm:$0xff]  }
  0xae   : > { %2990 = vmatprep.subr.bf16.mxu0 %v1498_v27 }
  0xaf   : > { %v1704_v48 = vpop.permute.xlu0 %1703  ;;  %v1706_v61 = vpop.permute.xlu1 %1705 }
  0xb0   : > { %2975 = vmatmul.mubr.msk.bf16.gmra.mrb[4].mxu0 %vm325_vm0, %v3229_v36  ;;  %v3277_v36 = vld [vmem:[%s3915_s1 + $0x218] sm:$0xff]  }
  0xb1   : > { %2978 = vmatprep.mubr.msk.bf16.mxu0 %vm325_vm0, %v3232_v37  ;;  %2991 = vmatpush3.bf16.msra.mxu0 %v1498_v27  ;;  %v3266_v27 = vld [vmem:[%s3915_s1 + $0xd0] sm:$0xff]   ;;  %v3280_v37 = vld [vmem:[%s3915_s1 + $0x220] sm:$0xff]  }
  0xb2   : > { %2992 = vmatprep.subr.bf16.mxu0 %v1500_v38 }
  0xb3   : > { %v876_v52 = vpop.permute.xlu0 %875  ;;  %v878_v2 = vpop.permute.xlu1 %877 }
  0xb4   : > { %2875 = vmatmul.mubr.msk.bf16.vlgmr.msra.gmra.mrb[0].mxu1 %vm325_vm0, %v3231_v40  ;;  %v3281_v40 = vld [vmem:[%s3915_s1 + $0x228] sm:$0xff]  }
  0xb5   : > { %2878 = vmatprep.mubr.msk.bf16.mxu1 %vm325_vm0, %v3234_v41  ;;  %2891 = vmatpush3.bf16.msra.mxu1 %v670_v30  ;;  %v3267_v30 = vld [vmem:[%s3915_s1 + $0xd8] sm:$0xff]   ;;  %v3284_v41 = vld [vmem:[%s3915_s1 + $0x230] sm:$0xff]  }
  0xb6   : > { %2892 = vmatprep.subr.bf16.mxu1 %v672_v42  ;;  %2993 = vmatpush3.bf16.msra.mxu0 %v1500_v38  ;;  %v3279_v38 = vld [vmem:[%s3915_s1 + $0x128] sm:$0xff]  }
  0xb7   : > { %3010 = vmatprep.subr.bf16.mxu0 %v1700_v43  ;;  %v880_v0 = vpop.permute.xlu0 %879  ;;  %v882_v10 = vpop.permute.xlu1 %881 }
  0xb8   : > { %2979 = vmatmul.mubr.msk.bf16.gmra.mrb[8].mxu0 %vm325_vm0, %v3233_v44 }
  0xb9   : > { %2982 = vmatprep.mubr.msk.bf16.mxu0 %vm325_vm0, %v3236_v45  ;;  %2893 = vmatpush3.bf16.msra.mxu1 %v672_v42  ;;  %v3283_v42 = vld [vmem:[%s3915_s1 + $0x138] sm:$0xff]  }
  0xba   : > { %2894 = vmatprep.subr.bf16.mxu1 %v674_v39 }
  0xbb   : > { %v1906_v4 = vpop.permute.xlu0 %1905  ;;  %v1908_v19 = vpop.permute.xlu1 %1907 }
  0xbc   : > { %2879 = vmatmul.mubr.msk.bf16.gmra.mrb[4].mxu1 %vm325_vm0, %v3235_v46 }
  0xbd   : > { %2882 = vmatprep.mubr.msk.bf16.mxu1 %vm325_vm0, %v3238_v47  ;;  %2895 = vmatpush3.bf16.msra.mxu1 %v674_v39  ;;  %v3282_v39 = vld [vmem:[%s3915_s1 + $0x130] sm:$0xff]  }
  0xbe   : > { %2896 = vmatprep.subr.bf16.mxu1 %v676_v51 }
  0xbf   : > { %v1910_v22 = vpop.permute.xlu0 %1909  ;;  %v1912_v25 = vpop.permute.xlu1 %1911 }
  0xc0   : > { %2983 = vmatmul.mubr.msk.bf16.gmra.mrb[12].mxu0 %vm325_vm0, %v3237_v49 }
  0xc1   : > { %2994 = vmatprep.mubr.msk.bf16.mxu0 %vm325_vm0, %v3240_v50  ;;  %2897 = vmatpush3.bf16.msra.mxu1 %v676_v51 }
  0xc2   : > { %2914 = vmatprep.subr.bf16.mxu1 %v876_v52 }
  0xc4   : > { %2883 = vmatmul.mubr.msk.bf16.gmra.mrb[8].mxu1 %vm325_vm0, %v3239_v53  ;;  %v3705_v53 = vld [vmem:[%s3916_s2] ss:$0 sm:$0xff] }
  0xc5   : > { %2886 = vmatprep.mubr.msk.bf16.mxu1 %vm325_vm0, %v3242_v54 }
  0xc8   : > { %2995 = vmatmul.mubr.msk.bf16.vlgmr.msra.gmra.mrb[0].mxu0 %vm325_vm0, %v3241_v55 }
  0xc9   : > { %3011 = vmatpush3.bf16.msra.mxu0 %v1700_v43  ;;  %2998 = vmatprep.mubr.msk.bf16.mxu0 %vm325_vm0, %v3244_v56  ;;  %v3285_v43 = vld [vmem:[%s3915_s1 + $0x238] sm:$0xff]  }
  0xca   : > { %3012 = vmatprep.subr.bf16.mxu0 %v1702_v57 }
  0xcc   : > { %2887 = vmatmul.mubr.msk.bf16.gmra.mrb[12].mxu1 %vm325_vm0, %v3243_v58 }
  0xcd   : > { %3013 = vmatpush3.bf16.msra.mxu0 %v1702_v57  ;;  %2898 = vmatprep.mubr.msk.bf16.mxu1 %vm325_vm0, %v3246_v59 }
  0xce   : > { %3014 = vmatprep.subr.bf16.mxu0 %v1704_v48 }
  0xd0   : > { %2999 = vmatmul.mubr.msk.bf16.gmra.mrb[4].mxu0 %vm325_vm0, %v3245_v60 }
  0xd1   : > { %3002 = vmatprep.mubr.msk.bf16.mxu0 %vm325_vm0, %v3248_v62  ;;  %3015 = vmatpush3.bf16.msra.mxu0 %v1704_v48 }
  0xd2   : > { %3016 = vmatprep.subr.bf16.mxu0 %v1706_v61 }
  0xd4   : > { %2899 = vmatmul.mubr.msk.bf16.vlgmr.msra.gmra.mrb[0].mxu1 %vm325_vm0, %v3247_v63 }
  0xd5   : > { %2915 = vmatpush3.bf16.msra.mxu1 %v876_v52  ;;  %2902 = vmatprep.mubr.msk.bf16.mxu1 %vm325_vm0, %v3250_v1 }
  0xd6   : > { %2916 = vmatprep.subr.bf16.mxu1 %v878_v2  ;;  %3017 = vmatpush3.bf16.msra.mxu0 %v1706_v61 }
  0xd7   : > { %3034 = vmatprep.subr.bf16.mxu0 %v1906_v4 }
  0xd8   : > { %3003 = vmatmul.mubr.msk.bf16.gmra.mrb[8].mxu0 %vm325_vm0, %v3249_v3 }
  0xd9   : > { %2917 = vmatpush3.bf16.msra.mxu1 %v878_v2  ;;  %3006 = vmatprep.mubr.msk.bf16.mxu0 %vm325_vm0, %v3252_v5 }
  0xda   : > { %2918 = vmatprep.subr.bf16.mxu1 %v880_v0 }
  0xdc   : > { %2903 = vmatmul.mubr.msk.bf16.gmra.mrb[4].mxu1 %vm325_vm0, %v3251_v6 }
  0xdd   : > { %2919 = vmatpush3.bf16.msra.mxu1 %v880_v0  ;;  %2906 = vmatprep.mubr.msk.bf16.mxu1 %vm325_vm0, %v3254_v7 }
  0xde   : > { %2920 = vmatprep.subr.bf16.mxu1 %v882_v10 }
  0xe0   : > { %3007 = vmatmul.mubr.msk.bf16.gmra.mrb[12].mxu0 %vm325_vm0, %v3253_v12 }
  0xe1   : > { %2921 = vmatpush3.bf16.msra.mxu1 %v882_v10  ;;  %3018 = vmatprep.mubr.msk.bf16.mxu0 %vm325_vm0, %v3256_v14 }
  0xe2   : > { %3058 = vmatprep.subr.bf16.mxu1 %v3389_v8 }
  0xe4   : > { %2907 = vmatmul.mubr.msk.bf16.gmra.mrb[8].mxu1 %vm325_vm0, %v3255_v15 }
  0xe5   : > { %2910 = vmatprep.mubr.msk.bf16.mxu1 %vm325_vm0, %v3258_v16 }
  0xe8   : > { %3019 = vmatmul.mubr.msk.bf16.vlgmr.msra.gmra.mrb[0].mxu0 %vm325_vm0, %v3257_v17 }
  0xe9   : > { %3035 = vmatpush3.bf16.msra.mxu0 %v1906_v4  ;;  %3022 = vmatprep.mubr.msk.bf16.mxu0 %vm325_vm0, %v3260_v18 }
  0xea   : > { %3036 = vmatprep.subr.bf16.mxu0 %v1908_v19 }
  0xec   : > { %2911 = vmatmul.mubr.msk.bf16.gmra.mrb[12].mxu1 %vm325_vm0, %v3259_v20 }
  0xed   : > { %3037 = vmatpush3.bf16.msra.mxu0 %v1908_v19  ;;  %2922 = vmatprep.mubr.msk.bf16.mxu1 %vm325_vm0, %v3262_v21 }
  0xee   : > { %3038 = vmatprep.subr.bf16.mxu0 %v1910_v22 }
  0xf0   : > { %3023 = vmatmul.mubr.msk.bf16.gmra.mrb[4].mxu0 %vm325_vm0, %v3261_v23 }
  0xf1   : > { %3026 = vmatprep.mubr.msk.bf16.mxu0 %vm325_vm0, %v3264_v24  ;;  %3039 = vmatpush3.bf16.msra.mxu0 %v1910_v22 }
  0xf2   : > { %3040 = vmatprep.subr.bf16.mxu0 %v1912_v25 }
  0xf4   : > { %2923 = vmatmul.mubr.msk.bf16.vlgmr.msra.gmra.mrb[0].mxu1 %vm325_vm0, %v3263_v26 }
  0xf5   : > { %3062 = vmatpush3.bf16.msra.mxu1 %v3389_v8  ;;  %2926 = vmatprep.mubr.msk.bf16.mxu1 %vm325_vm0, %v3266_v27  ;;  %v3270_v8 = vld [vmem:[%s3915_s1 + $0xe0] sm:$0xff]  }
  0xf6   : > { %3059 = vmatprep.subr.bf16.mxu1 %v3392_v9  ;;  %3041 = vmatpush3.bf16.msra.mxu0 %v1912_v25 }
  0xf8   : > { %3027 = vmatmul.mubr.msk.bf16.gmra.mrb[8].mxu0 %vm325_vm0, %v3265_v28 }
  0xf9   : > { %3063 = vmatpush3.bf16.msra.mxu1 %v3392_v9  ;;  %3030 = vmatprep.mubr.msk.bf16.mxu0 %vm325_vm0, %v3268_v29  ;;  %v3272_v9 = vld [vmem:[%s3915_s1 + $0x200] sm:$0xff]  }
  0xfa   : > { %3060 = vmatprep.subr.bf16.mxu1 %v3396_v11 }
  0xfc   : > { %2927 = vmatmul.mubr.msk.bf16.gmra.mrb[4].mxu1 %vm325_vm0, %v3267_v30 }
  0xfd   : > { %3064 = vmatpush3.bf16.msra.mxu1 %v3396_v11  ;;  %2930 = vmatprep.mubr.msk.bf16.mxu1 %vm325_vm0, %v3270_v8  ;;  %v3274_v11 = vld [vmem:[%s3915_s1 + $0xf0] sm:$0xff]  }
  0xfe   : > { %3061 = vmatprep.subr.bf16.mxu1 %v3400_v13 }
 0x100   : > { %3031 = vmatmul.mubr.msk.bf16.gmra.mrb[12].mxu0 %vm325_vm0, %v3269_v31 }
 0x101   : > { %3065 = vmatpush3.bf16.msra.mxu1 %v3400_v13  ;;  %3042 = vmatprep.mubr.msk.bf16.mxu0 %vm325_vm0, %v3272_v9  ;;  %v3275_v13 = vld [vmem:[%s3915_s1 + $0xf8] sm:$0xff]  }
 0x104   : > { %2931 = vmatmul.mubr.msk.bf16.gmra.mrb[8].mxu1 %vm325_vm0, %v3271_v32 }
 0x105   : > { %2934 = vmatprep.mubr.msk.bf16.mxu1 %vm325_vm0, %v3274_v11 }
 0x108   : > { %3043 = vmatmul.mubr.msk.bf16.vlgmr.msra.gmra.mrb[0].mxu0 %vm325_vm0, %v3273_v33 }
 0x109   : > { %3046 = vmatprep.mubr.msk.bf16.mxu0 %vm325_vm0, %v3276_v34 }
 0x10c   : > { %2935 = vmatmul.mubr.msk.bf16.gmra.mrb[12].mxu1 %vm325_vm0, %v3275_v13 }
 0x10d   : > { %2954 = vmatprep.mubr.msk.bf16.mxu1 %vm325_vm0, %v3278_v35 }
 0x110   : > { %3047 = vmatmul.mubr.msk.bf16.gmra.mrb[4].mxu0 %vm325_vm0, %v3277_v36 }
 0x111   : > { %3050 = vmatprep.mubr.msk.bf16.mxu0 %vm325_vm0, %v3280_v37 }
 0x114   : > { %2955 = vmatmul.mubr.msk.bf16.vlgmr.msra.gmra.mrb[8].mxu1 %vm325_vm0, %v3279_v38 }
 0x115   : > { %2958 = vmatprep.mubr.msk.bf16.mxu1 %vm325_vm0, %v3282_v39 }
 0x118   : > { %3051 = vmatmul.mubr.msk.bf16.gmra.mrb[8].mxu0 %vm325_vm0, %v3281_v40 }
 0x119   : > { %3054 = vmatprep.mubr.msk.bf16.mxu0 %vm325_vm0, %v3284_v41 }
 0x11c   : > { %2959 = vmatmul.mubr.msk.bf16.gmra.mrb[12].mxu1 %vm325_vm0, %v3283_v42 }
 0x120   : > { %3055 = vmatmul.mubr.msk.bf16.gmra.mrb[12].mxu0 %vm325_vm0, %v3285_v43 }
 0x1c7   : > { %v2924_v44 = vpop.f32.mrb[0].mxu1 }
 0x1c8   : > { %v945_v45 = vpop.f32.mrb[1].mxu1 }
 0x1c9   : > { %v2925_v46 = vpop.f32.mrb[2].mxu1 }
 0x1ca   : > { %v948_v47 = vpop.f32.mrb[3].mxu1 }
 0x1cf   : > { %v2928_v48 = vpop.f32.mrb[4].mxu1 }
 0x1d0   : > { %v961_v49 = vpop.f32.mrb[5].mxu1 }
 0x1d1   : > { %v2929_v50 = vpop.f32.mrb[6].mxu1 }
 0x1d2   : > { %v964_v51 = vpop.f32.mrb[7].mxu1 }
 0x1db   : > { %v3044_v52 = vpop.f32.mrb[0].mxu0 }
 0x1dc   : > { %v3066_v54 = vadd.f32 %v3044_v52, %v2924_v44  ;;  %v1975_v55 = vpop.f32.mrb[1].mxu0 }
 0x1dd   : > { %v3067_v56 = vadd.f32 %v1975_v55, %v945_v45  ;;  %v3045_v57 = vpop.f32.mrb[2].mxu0 }
 0x1de   : > { %v2720_v58 = vpack.c.bf16 %v3066_v54, %v3066_v54  ;;  %v3068_v59 = vadd.f32 %v3045_v57, %v2925_v46  ;;  %v1978_v60 = vpop.f32.mrb[3].mxu0  ;;  %v2144_v61 = vmul.f32 %v3066_v54, %v3705_v53  ;;  %v2209_v62 = vmul.f32 %v3066_v54, %v3066_v54 }
 0x1df   : > { %v2718_v63 = vpack.c.bf16 %v3067_v56, %v3067_v56  ;;  %v3069_v0 = vadd.f32 %v1978_v60, %v948_v47  ;;  %v2142_v4 = vmul.f32 %v3067_v56, %v3705_v53  ;;  %v2207_v10 = vmul.f32 %v3067_v56, %v3067_v56 }
 0x1e0   : > { %2121 = vst.msk [vmem:[%s3710_s8 + $0x8] sm:$0xf] %vm2118_vm1, %v2720_v58  ;;  %v2721_v1 = vpack.c.bf16 %v3068_v59, %v3068_v59  ;;  %v2165_v2 = vsel %vm2158_vm2, %v2144_v61, 0.0  ;;  %v2225_v3 = vmul.f32 %v3705_v53, %v2209_v62  ;;  %v2145_v17 = vmul.f32 %v3068_v59, %v3705_v53 }
 0x1e1   : > { %2119 = vst.msk [vmem:[%s3710_s8] sm:$0xf] %vm2118_vm1, %v2718_v63  ;;  %v2719_v5 = vpack.c.bf16 %v3069_v0, %v3069_v0  ;;  %2166 = vadd.xlane.f32.xlu0 %v2165_v2  ;;  %v2143_v7 = vmul.f32 %v3069_v0, %v3705_v53  ;;  %v2159_v16 = vsel %vm2158_vm2, %v2142_v4, 0.0  ;;  %v2210_v18 = vmul.f32 %v3068_v59, %v3068_v59 }
 0x1e2   : > { %2122 = vst.msk [vmem:[%s3710_s8 + $0xc] sm:$0xf] %vm2118_vm1, %v2721_v1  ;;  %v2245_v6 = vsel %vm2158_vm2, %v2225_v3, 0.0  ;;  %v2223_v25 = vmul.f32 %v3705_v53, %v2207_v10  ;;  %v2168_v8 = vsel %vm2158_vm2, %v2145_v17, 0.0  ;;  %v2208_v9 = vmul.f32 %v3069_v0, %v3069_v0 }
 0x1e3   : > { %2120 = vst.msk [vmem:[%s3710_s8 + $0x4] sm:$0xf] %vm2118_vm1, %v2719_v5  ;;  %2246 = vadd.xlane.f32.xlu1 %v2245_v6  ;;  %v3048_v12 = vpop.f32.mrb[4].mxu0  ;;  %v2162_v24 = vsel %vm2158_vm2, %v2143_v7, 0.0  ;;  %v2226_v31 = vmul.f32 %v3705_v53, %v2210_v18 }
 0x1e4   : > { %v3070_v14 = vadd.f32 %v3048_v12, %v2928_v48  ;;  %v1991_v15 = vpop.f32.mrb[5].mxu0  ;;  %v2239_v34 = vsel %vm2158_vm2, %v2223_v25, 0.0  ;;  %v2224_v39 = vmul.f32 %v3705_v53, %v2208_v9 }
 0x1e5   : > { %v3071_v19 = vadd.f32 %v1991_v15, %v961_v49  ;;  %2160 = vadd.xlane.f32.xlu0 %v2159_v16  ;;  %v3049_v20 = vpop.f32.mrb[6].mxu0  ;;  %v2248_v38 = vsel %vm2158_vm2, %v2226_v31, 0.0 }
 0x1e6   : > { %v2724_v21 = vpack.c.bf16 %v3070_v14, %v3070_v14  ;;  %v3728_v22 = vadd.f32 %v3049_v20, %v2929_v50  ;;  %v1994_v23 = vpop.f32.mrb[7].mxu0  ;;  %v2148_v13 = vmul.f32 %v3070_v14, %v3705_v53  ;;  %v2213_v47 = vmul.f32 %v3070_v14, %v3070_v14 }
 0x1e7   : > { %v2722_v26 = vpack.c.bf16 %v3071_v19, %v3071_v19  ;;  %v3732_v27 = vadd.f32 %v1994_v23, %v964_v51  ;;  %v2956_v28 = vpop.f32.mrb[8].mxu1  ;;  %2163 = vadd.xlane.f32.xlu1 %v2162_v24  ;;  %v2146_v42 = vmul.f32 %v3071_v19, %v3705_v53  ;;  %v2242_v54 = vsel %vm2158_vm2, %v2224_v39, 0.0 }
 0x1e8   : > { %2125 = vst.msk [vmem:[%s3710_s8 + $0x18] sm:$0xf] %vm2118_vm1, %v2724_v21  ;;  %v2725_v29 = vpack.c.bf16 %v3728_v22, %v3728_v22  ;;  %v1183_v30 = vpop.f32.mrb[9].mxu1  ;;  %v2177_v46 = vsel %vm2158_vm2, %v2148_v13, 0.0  ;;  %v2149_v55 = vmul.f32 %v3728_v22, %v3705_v53  ;;  %v2229_v60 = vmul.f32 %v3705_v53, %v2213_v47 }
 0x1e9   : > { %2123 = vst.msk [vmem:[%s3710_s8 + $0x10] sm:$0xf] %vm2118_vm1, %v2722_v26  ;;  %v2723_v32 = vpack.c.bf16 %v3732_v27, %v3732_v27  ;;  %v2957_v11 = vpop.f32.mrb[10].mxu1  ;;  %2169 = vadd.xlane.f32.xlu0 %v2168_v8  ;;  %v2171_v59 = vsel %vm2158_vm2, %v2146_v42, 0.0  ;;  %v2211_v61 = vmul.f32 %v3071_v19, %v3071_v19  ;;  %v2147_v2 = vmul.f32 %v3732_v27, %v3705_v53 }
 0x1ea   : > { %2126 = vst.msk [vmem:[%s3710_s8 + $0x1c] sm:$0xf] %vm2118_vm1, %v2725_v29  ;;  %v1186_v33 = vpop.f32.mrb[11].mxu1  ;;  %v2180_v1 = vsel %vm2158_vm2, %v2149_v55, 0.0  ;;  %v2214_v3 = vmul.f32 %v3728_v22, %v3728_v22  ;;  %v2257_v12 = vsel %vm2158_vm2, %v2229_v60, 0.0  ;;  %v2212_v20 = vmul.f32 %v3732_v27, %v3732_v27 }
 0x1eb   : > { %2124 = vst.msk [vmem:[%s3710_s8 + $0x14] sm:$0xf] %vm2118_vm1, %v2723_v32  ;;  %2240 = vadd.xlane.f32.xlu1 %v2239_v34  ;;  %v3052_v35 = vpop.f32.mrb[8].mxu0  ;;  %v2227_v14 = vmul.f32 %v3705_v53, %v2211_v61  ;;  %v2174_v18 = vsel %vm2158_vm2, %v2147_v2, 0.0 }
 0x1ec   : > { %v3750_v36 = vadd.f32 %v3052_v35, %v2956_v28  ;;  %v2007_v37 = vpop.f32.mrb[9].mxu0  ;;  %v2230_v19 = vmul.f32 %v3705_v53, %v2214_v3  ;;  %v2228_v26 = vmul.f32 %v3705_v53, %v2212_v20 }
 0x1ed   : > { %v3754_v40 = vadd.f32 %v2007_v37, %v1183_v30  ;;  %2249 = vadd.xlane.f32.xlu0 %v2248_v38  ;;  %v3053_v41 = vpop.f32.mrb[10].mxu0  ;;  %v2251_v22 = vsel %vm2158_vm2, %v2227_v14, 0.0 }
 0x1ee   : > { %v2728_v43 = vpack.c.bf16 %v3750_v36, %v3750_v36  ;;  %v3759_v44 = vadd.f32 %v3053_v41, %v2957_v11  ;;  %v2010_v45 = vpop.f32.mrb[11].mxu0  ;;  %v2152_v23 = vmul.f32 %v3750_v36, %v3705_v53  ;;  %v2260_v25 = vsel %vm2158_vm2, %v2230_v19, 0.0 }
 0x1ef   : > { %v2726_v48 = vpack.c.bf16 %v3754_v40, %v3754_v40  ;;  %v3764_v49 = vadd.f32 %v2010_v45, %v1186_v33  ;;  %v2960_v50 = vpop.f32.mrb[12].mxu1  ;;  %2178 = vadd.xlane.f32.xlu1 %v2177_v46  ;;  %v2150_v29 = vmul.f32 %v3754_v40, %v3705_v53  ;;  %v2217_v30 = vmul.f32 %v3750_v36, %v3750_v36 }
 0x1f0   : > { %2129 = vst.msk [vmem:[%s3710_s8 + $0x28] sm:$0xf] %vm2118_vm1, %v2728_v43  ;;  %v2729_v51 = vpack.c.bf16 %v3759_v44, %v3759_v44  ;;  %v1199_v52 = vpop.f32.mrb[13].mxu1  ;;  %v2189_v28 = vsel %vm2158_vm2, %v2152_v23, 0.0  ;;  %v2254_v31 = vsel %vm2158_vm2, %v2228_v26, 0.0  ;;  %v2153_v9 = vmul.f32 %v3759_v44, %v3705_v53 }
 0x1f1   : > { %2127 = vst.msk [vmem:[%s3710_s8 + $0x20] sm:$0xf] %vm2118_vm1, %v2726_v48  ;;  %v2727_v56 = vpack.c.bf16 %v3764_v49, %v3764_v49  ;;  %v2961_v57 = vpop.f32.mrb[14].mxu1  ;;  %2243 = vadd.xlane.f32.xlu0 %v2242_v54  ;;  %v2183_v32 = vsel %vm2158_vm2, %v2150_v29, 0.0  ;;  %v2233_v11 = vmul.f32 %v3705_v53, %v2217_v30  ;;  %v2215_v33 = vmul.f32 %v3754_v40, %v3754_v40 }
 0x1f2   : > { %2130 = vst.msk [vmem:[%s3710_s8 + $0x2c] sm:$0xf] %vm2118_vm1, %v2729_v51  ;;  %v1202_v58 = vpop.f32.mrb[15].mxu1  ;;  %v2192_v34 = vsel %vm2158_vm2, %v2153_v9, 0.0  ;;  %v2151_v13 = vmul.f32 %v3764_v49, %v3705_v53  ;;  %v2218_v35 = vmul.f32 %v3759_v44, %v3759_v44  ;;  %v2216_v40 = vmul.f32 %v3764_v49, %v3764_v49 }
 0x1f3   : > { %2128 = vst.msk [vmem:[%s3710_s8 + $0x24] sm:$0xf] %vm2118_vm1, %v2727_v56  ;;  %2172 = vadd.xlane.f32.xlu1 %v2171_v59  ;;  %v3056_v62 = vpop.f32.mrb[12].mxu0  ;;  %v2269_v36 = vsel %vm2158_vm2, %v2233_v11, 0.0  ;;  %v2231_v37 = vmul.f32 %v3705_v53, %v2215_v33 }
 0x1f4   : > { %v3783_v63 = vadd.f32 %v3056_v62, %v2960_v50  ;;  %v2023_v0 = vpop.f32.mrb[13].mxu0  ;;  %v2186_v38 = vsel %vm2158_vm2, %v2151_v13, 0.0  ;;  %v2234_v39 = vmul.f32 %v3705_v53, %v2218_v35  ;;  %v2232_v44 = vmul.f32 %v3705_v53, %v2216_v40 }
 0x1f5   : > { %v3079_v4 = vadd.f32 %v2023_v0, %v1199_v52  ;;  %2181 = vadd.xlane.f32.xlu0 %v2180_v1  ;;  %v3057_v5 = vpop.f32.mrb[14].mxu0  ;;  %v2263_v41 = vsel %vm2158_vm2, %v2231_v37, 0.0 }
 0x1f6   : > { %v2732_v6 = vpack.c.bf16 %v3783_v63, %v3783_v63  ;;  %v3080_v7 = vadd.f32 %v3057_v5, %v2961_v57  ;;  %v2026_v10 = vpop.f32.mrb[15].mxu0  ;;  %v2156_v42 = vmul.f32 %v3783_v63, %v3705_v53  ;;  %v2272_v43 = vsel %vm2158_vm2, %v2234_v39, 0.0 }
 0x1f7   : > { %v2730_v15 = vpack.c.bf16 %v3079_v4, %v3079_v4  ;;  %v3081_v16 = vadd.f32 %v2026_v10, %v1202_v58  ;;  %2258 = vadd.xlane.f32.xlu1 %v2257_v12  ;;  %v2154_v46 = vmul.f32 %v3079_v4, %v3705_v53  ;;  %v2219_v47 = vmul.f32 %v3079_v4, %v3079_v4 }
 0x1f8   : > { %2133 = vst.msk [vmem:[%s3710_s8 + $0x38] sm:$0xf] %vm2118_vm1, %v2732_v6  ;;  %v2733_v17 = vpack.c.bf16 %v3080_v7, %v3080_v7  ;;  %v2222_v24 = vmul.f32 %v3080_v7, %v3080_v7  ;;  %v2201_v45 = vsel %vm2158_vm2, %v2156_v42, 0.0  ;;  %v2266_v48 = vsel %vm2158_vm2, %v2232_v44, 0.0 }
 0x1f9   : > { %2131 = vst.msk [vmem:[%s3710_s8 + $0x30] sm:$0xf] %vm2118_vm1, %v2730_v15  ;;  %v2731_v21 = vpack.c.bf16 %v3081_v16, %v3081_v16  ;;  %2175 = vadd.xlane.f32.xlu0 %v2174_v18  ;;  %v2157_v49 = vmul.f32 %v3080_v7, %v3705_v53  ;;  %v2195_v50 = vsel %vm2158_vm2, %v2154_v46, 0.0  ;;  %v2235_v51 = vmul.f32 %v3705_v53, %v2219_v47 }
 0x1fa   : > { %2134 = vst.msk [vmem:[%s3710_s8 + $0x3c] sm:$0xf] %vm2118_vm1, %v2733_v17  ;;  %v2238_v27 = vmul.f32 %v3705_v53, %v2222_v24  ;;  %v2221_v52 = vmul.f32 %v3783_v63, %v3783_v63  ;;  %v2155_v55 = vmul.f32 %v3081_v16, %v3705_v53  ;;  %v2220_v56 = vmul.f32 %v3081_v16, %v3081_v16 }
 0x1fb   : > { %2132 = vst.msk [vmem:[%s3710_s8 + $0x34] sm:$0xf] %vm2118_vm1, %v2731_v21  ;;  %2252 = vadd.xlane.f32.xlu1 %v2251_v22  ;;  %v2204_v54 = vsel %vm2158_vm2, %v2157_v49, 0.0  ;;  %v2275_v57 = vsel %vm2158_vm2, %v2235_v51, 0.0 }
 0x1fc   : > { %v2284_v8 = vsel %vm2158_vm2, %v2238_v27, 0.0  ;;  %v2237_v58 = vmul.f32 %v3705_v53, %v2221_v52  ;;  %v2198_v59 = vsel %vm2158_vm2, %v2155_v55, 0.0  ;;  %v2236_v60 = vmul.f32 %v3705_v53, %v2220_v56 }
 0x1fd   : > { %2261 = vadd.xlane.f32.xlu0 %v2260_v25 }
 0x1fe   : > { %v2281_v61 = vsel %vm2158_vm2, %v2237_v58, 0.0  ;;  %v2278_v62 = vsel %vm2158_vm2, %v2236_v60, 0.0 }
 0x1ff   : > { %2190 = vadd.xlane.f32.xlu1 %v2189_v28 }
 0x201   : > { %2255 = vadd.xlane.f32.xlu0 %v2254_v31 }
 0x203   : > { %2184 = vadd.xlane.f32.xlu1 %v2183_v32 }
 0x205   : > { %2193 = vadd.xlane.f32.xlu0 %v2192_v34 }
 0x207   : > { %2270 = vadd.xlane.f32.xlu1 %v2269_v36 }
 0x209   : > { %2187 = vadd.xlane.f32.xlu0 %v2186_v38 }
 0x20b   : > { %2264 = vadd.xlane.f32.xlu1 %v2263_v41 }
 0x20d   : > { %2273 = vadd.xlane.f32.xlu0 %v2272_v43 }
 0x20f   : > { %2202 = vadd.xlane.f32.xlu1 %v2201_v45 }
 0x211   : > { %2267 = vadd.xlane.f32.xlu0 %v2266_v48 }
 0x213   : > { %2196 = vadd.xlane.f32.xlu1 %v2195_v50 }
 0x215   : > { %2205 = vadd.xlane.f32.xlu0 %v2204_v54 }
 0x217   : > { %2276 = vadd.xlane.f32.xlu1 %v2275_v57 }
 0x219   : > { %2199 = vadd.xlane.f32.xlu0 %v2198_v59 }
 0x21b   : > { %2282 = vadd.xlane.f32.xlu1 %v2281_v61 }
 0x21d   : > { %2279 = vadd.xlane.f32.xlu0 %v2278_v62 }
 0x221   : > { %2285 = vadd.xlane.f32.xlu0 %v2284_v8 }
 0x26e   : > { %v2167_v63 = vpop.xlane.xlu0 %2166 }
 0x270   : > { %v2247_v53 = vpop.xlane.xlu1 %2246 }
 0x271   : > { %v2290_v0 = vsel %vm2287_vm3, %v2167_v63, %v2247_v53 }
 0x272   : > { %2307 = vst.msk [vmem:[%s3861_s12 + $0x10] sm:$0xff] %vm2304_vm4, %v2290_v0  ;;  %v2161_v1 = vpop.xlane.xlu0 %2160 }
 0x274   : > { %v2164_v2 = vpop.xlane.xlu1 %2163 }
 0x276   : > { %v2170_v3 = vpop.xlane.xlu0 %2169 }
 0x278   : > { %v2241_v4 = vpop.xlane.xlu1 %2240 }
 0x279   : > { %v2288_v5 = vsel %vm2287_vm3, %v2161_v1, %v2241_v4 }
 0x27a   : > { %2305 = vst.msk [vmem:[%s3861_s12] sm:$0xff] %vm2304_vm4, %v2288_v5  ;;  %v2250_v6 = vpop.xlane.xlu0 %2249 }
 0x27b   : > { %v2291_v7 = vsel %vm2287_vm3, %v2170_v3, %v2250_v6 }
 0x27c   : > { %2308 = vst.msk [vmem:[%s3861_s12 + $0x18] sm:$0xff] %vm2304_vm4, %v2291_v7  ;;  %v2179_v10 = vpop.xlane.xlu1 %2178 }
 0x27e   : > { %v2244_v12 = vpop.xlane.xlu0 %2243 }
 0x27f   : > { %v2289_v14 = vsel %vm2287_vm3, %v2164_v2, %v2244_v12 }
 0x280   : > { %2306 = vst.msk [vmem:[%s3861_s12 + $0x8] sm:$0xff] %vm2304_vm4, %v2289_v14  ;;  %v2173_v15 = vpop.xlane.xlu1 %2172 }
 0x282   : > { %v2182_v16 = vpop.xlane.xlu0 %2181 }
 0x284   : > { %v2259_v17 = vpop.xlane.xlu1 %2258 }
 0x285   : > { %v2294_v18 = vsel %vm2287_vm3, %v2179_v10, %v2259_v17 }
 0x286   : > { %2311 = vst.msk [vmem:[%s3861_s12 + $0x30] sm:$0xff] %vm2304_vm4, %v2294_v18  ;;  %v2176_v19 = vpop.xlane.xlu0 %2175 }
 0x288   : > { %v2253_v20 = vpop.xlane.xlu1 %2252 }
 0x289   : > { %v2292_v21 = vsel %vm2287_vm3, %v2173_v15, %v2253_v20 }
 0x28a   : > { %2309 = vst.msk [vmem:[%s3861_s12 + $0x20] sm:$0xff] %vm2304_vm4, %v2292_v21  ;;  %v2262_v22 = vpop.xlane.xlu0 %2261 }
 0x28b   : > { %v2295_v23 = vsel %vm2287_vm3, %v2182_v16, %v2262_v22 }
 0x28c   : > { %2312 = vst.msk [vmem:[%s3861_s12 + $0x38] sm:$0xff] %vm2304_vm4, %v2295_v23  ;;  %v2191_v24 = vpop.xlane.xlu1 %2190 }
 0x28e   : > { %v2256_v25 = vpop.xlane.xlu0 %2255 }
 0x28f   : > { %v2293_v26 = vsel %vm2287_vm3, %v2176_v19, %v2256_v25 }
 0x290   : > { %2310 = vst.msk [vmem:[%s3861_s12 + $0x28] sm:$0xff] %vm2304_vm4, %v2293_v26  ;;  %v2185_v27 = vpop.xlane.xlu1 %2184 }
 0x292   : > { %v2194_v28 = vpop.xlane.xlu0 %2193 }
 0x294   : > { %v2271_v29 = vpop.xlane.xlu1 %2270 }
 0x295   : > { %v2298_v30 = vsel %vm2287_vm3, %v2191_v24, %v2271_v29 }
 0x296   : > { %2315 = vst.msk [vmem:[%s3861_s12 + $0x50] sm:$0xff] %vm2304_vm4, %v2298_v30  ;;  %v2188_v8 = vpop.xlane.xlu0 %2187 }
 0x298   : > { %v2265_v31 = vpop.xlane.xlu1 %2264 }
 0x299   : > { %v2296_v9 = vsel %vm2287_vm3, %v2185_v27, %v2265_v31 }
 0x29a   : > { %2313 = vst.msk [vmem:[%s3861_s12 + $0x40] sm:$0xff] %vm2304_vm4, %v2296_v9  ;;  %v2274_v32 = vpop.xlane.xlu0 %2273 }
 0x29b   : > { %v2299_v11 = vsel %vm2287_vm3, %v2194_v28, %v2274_v32 }
 0x29c   : > { %2316 = vst.msk [vmem:[%s3861_s12 + $0x58] sm:$0xff] %vm2304_vm4, %v2299_v11  ;;  %v2203_v33 = vpop.xlane.xlu1 %2202 }
 0x29e   : > { %v2268_v34 = vpop.xlane.xlu0 %2267 }
 0x29f   : > { %v2297_v13 = vsel %vm2287_vm3, %v2188_v8, %v2268_v34 }
 0x2a0   : > { %2314 = vst.msk [vmem:[%s3861_s12 + $0x48] sm:$0xff] %vm2304_vm4, %v2297_v13  ;;  %v2197_v35 = vpop.xlane.xlu1 %2196 }
 0x2a2   : > { %v2206_v36 = vpop.xlane.xlu0 %2205 }
 0x2a4   : > { %v2277_v37 = vpop.xlane.xlu1 %2276 }
 0x2a5   : > { %v2300_v38 = vsel %vm2287_vm3, %v2197_v35, %v2277_v37 }
 0x2a6   : > { %2317 = vst.msk [vmem:[%s3861_s12 + $0x60] sm:$0xff] %vm2304_vm4, %v2300_v38  ;;  %v2200_v39 = vpop.xlane.xlu0 %2199 }
 0x2a8   : > { %v2283_v40 = vpop.xlane.xlu1 %2282 }
 0x2a9   : > { %v2302_v41 = vsel %vm2287_vm3, %v2203_v33, %v2283_v40 }
 0x2aa   : > { %2319 = vst.msk [vmem:[%s3861_s12 + $0x70] sm:$0xff] %vm2304_vm4, %v2302_v41  ;;  %v2280_v42 = vpop.xlane.xlu0 %2279 }
 0x2ab   : > { %v2301_v43 = vsel %vm2287_vm3, %v2200_v39, %v2280_v42 }
 0x2ac   : > { %2318 = vst.msk [vmem:[%s3861_s12 + $0x68] sm:$0xff] %vm2304_vm4, %v2301_v43 }
 0x2ae   : > { %v2286_v44 = vpop.xlane.xlu0 %2285 }
 0x2af   : > { %v2303_v45 = vsel %vm2287_vm3, %v2206_v36, %v2286_v44 }
 0x2b0   : > { %2320 = vst.msk [vmem:[%s3861_s12 + $0x78] sm:$0xff] %vm2304_vm4, %v2303_v45 }
 0x2b1 PF: > { %s15_s15 = sadd.s32 1, %s3292_s15  }
 0x2b2   : > { %p12_p4 = scmp.ge.s32.totalorder %s15_s15, 4  }
 0x2b4   :  { %14 = sbr.rel (!%p12_p4) target bundleno = 1 (0x1), region = 82 }

// kernel: netg_forward.7
= control target key start
LH: loop header
LB: loop body
LE: loop exit
PB: predicated region body
PF: predicated region fallthrough
CT: control target
= control target key end

     0   :  { %s2009_s15 = smov 0   ;;  %s2271_s0 = inlined_call_operand.vmem [shape: bf16[2,32,128], index: 0, kind: input, shape index: {}]   ;;  %s2272_s1 = inlined_call_operand.vmem [shape: bf16[9,64,32], index: 1, kind: input, shape index: {}]   ;;  %s2273_s2 = inlined_call_operand.vmem [shape: f32[1,100], index: 2, kind: input, shape index: {}]   ;;  %s2274_s3 = inlined_call_operand.vmem [shape: bf16[2,64,100], index: 3, kind: output, shape index: {0}]   ;;  %s2275_s4 = inlined_call_operand.vmem [shape: f32[2,64,2], index: 4, kind: output, shape index: {1}]  }
   0x1 LB: > { %s1513_s16 = sadd.s32 4294967295, %s1974_s15   ;;  %p1517_p0 = scmp.ge.s32.totalorder %s1974_s15, 1  ;;  %s1974_s15 = sphi %s2009_s15, %s15_s15  }
   0x2   : > { %p165_p1 = scmp.lt.s32.totalorder %s1974_s15, 3 }
   0x4   : > { %p166_p2 = pnand %p1517_p0, %p165_p1 }
   0x5   : > { %p196_p3 = scmp.lt.s32.totalorder (!%p166_p2), %s1513_s16, 1  ;;  %v1932_v0 = vld [vmem:[%s2272_s1 + $0x20] sm:$0xff] (!%p166_p2)   ;;  %vm269_vm0 = vcmask (!%p166_p2), 261120   ;;  %s1976_s25 = smov (!%p166_p2), 127   ;;  %v1933_v8 = vld [vmem:[%s2272_s1 + $0x28] sm:$0xff] (!%p166_p2)   ;;  %v1936_v9 = vld [vmem:[%s2272_s1 + $0x30] sm:$0xff] (!%p166_p2)  }
   0x6   : > { %169 = sbr.rel (%p166_p2) target bundleno = 597 (0x255), region = 32  ;;  %1742 = vmatprep.mubr.msk.bf16.mxu1 (!%p166_p2), %vm269_vm0, %v1932_v0  ;;  %v1934_v1 = vld [vmem:[%s2272_s1 + $0x80] sm:$0xff] (!%p166_p2)   ;;  %s1977_s26 = smov (!%p166_p2), 117   ;;  %v1935_v11 = vld [vmem:[%s2272_s1 + $0x88] sm:$0xff] (!%p166_p2)   ;;  %v1937_v14 = vld [vmem:[%s2272_s1 + $0x38] sm:$0xff] (!%p166_p2)   ;;  %vm1318_vm1 = vcmask (!%p166_p2), 814080  }
   0x7   : > { %1790 = vmatprep.mubr.msk.bf16.mxu0 (!%p166_p2), %vm269_vm0, %v1934_v1  ;;  %s1978_s27 = smov (!%p166_p2), 116   ;;  %s1979_s28 = smov (!%p166_p2), 108   ;;  %v1939_v13 = vld [vmem:[%s2272_s1 + $0xa0] sm:$0xff] (!%p166_p2)   ;;  %v1940_v18 = vld [vmem:[%s2272_s1 + $0x8] sm:$0xff] (!%p166_p2)   ;;  %v1942_v20 = vld [vmem:[%s2272_s1 + $0x10] sm:$0xff] (!%p166_p2)   ;;  %vm1342_vm2 = vcmask (!%p166_p2), 818176  }
   0x8   : > { %s1980_s29 = smov (!%p166_p2), 126   ;;  %s1981_s30 = smov (!%p166_p2), 107   ;;  %v1938_v16 = vld [vmem:[%s2272_s1] sm:$0xff] (!%p166_p2)   ;;  %v1941_v19 = vld [vmem:[%s2272_s1 + $0xa8] sm:$0xff] (!%p166_p2)   ;;  %v1943_v21 = vld [vmem:[%s2272_s1 + $0xb0] sm:$0xff] (!%p166_p2)   ;;  %vm1407_vm3 = vcmask (!%p166_p2), 7168  }
   0x9   : > { %s1982_s5 = smov (!%p166_p2), 118   ;;  %s1983_s6 = smov (!%p166_p2), 106   ;;  %v1944_v25 = vld [vmem:[%s2272_s1 + $0x18] sm:$0xff] (!%p166_p2)   ;;  %v1946_v27 = vld [vmem:[%s2272_s1 + $0x40] sm:$0xff] (!%p166_p2)   ;;  %v1948_v30 = vld [vmem:[%s2272_s1 + $0x48] sm:$0xff] (!%p166_p2)   ;;  %vm1416_vm4 = vcmask (!%p166_p2), 15360  }
   0xa   : > { %v1945_v26 = vld [vmem:[%s2272_s1 + $0xb8] sm:$0xff] (!%p166_p2)   ;;  %v1947_v29 = vld [vmem:[%s2272_s1 + $0xc0] sm:$0xff] (!%p166_p2)   ;;  %v1949_v31 = vld [vmem:[%s2272_s1 + $0xc8] sm:$0xff] (!%p166_p2)  }
   0xb   : > { %v1950_v32 = vld [vmem:[%s2272_s1 + $0x50] sm:$0xff] (!%p166_p2)   ;;  %v1952_v37 = vld [vmem:[%s2272_s1 + $0x58] sm:$0xff] (!%p166_p2)   ;;  %v1954_v39 = vld [vmem:[%s2272_s1 + $0x60] sm:$0xff] (!%p166_p2)  }
   0xc   : > { %v1951_v35 = vld [vmem:[%s2272_s1 + $0xd0] sm:$0xff] (!%p166_p2)   ;;  %v1953_v38 = vld [vmem:[%s2272_s1 + $0xd8] sm:$0xff] (!%p166_p2)   ;;  %v1955_v40 = vld [vmem:[%s2272_s1 + $0xe0] sm:$0xff] (!%p166_p2)  }
   0xd   : > { %s2277_s16 = smov (!%p196_p3, %s1513_s16), 1  ;;  %v1956_v41 = vld [vmem:[%s2272_s1 + $0x68] sm:$0xff]   ;;  %v1958_v43 = vld [vmem:[%s2272_s1 + $0x70] sm:$0xff]   ;;  %v1960_v46 = vld [vmem:[%s2272_s1 + $0x78] sm:$0xff]  }
   0xe   : > { %s1673_s19 = sshll.u32 %s2277_s16, 4  ;;  %v1957_v42 = vld [vmem:[%s2272_s1 + $0xe8] sm:$0xff]   ;;  %v1959_v44 = vld [vmem:[%s2272_s1 + $0xf0] sm:$0xff]   ;;  %v1961_v47 = vld [vmem:[%s2272_s1 + $0xf8] sm:$0xff]   ;;  %s1675_s9 = sshll.u32 %s2277_s16, 6 }
   0xf   : > { %s200_s24 = scalar_lea.vmem %s2271_s0, %s1673_s19  ;;  %v1962_v48 = vld [vmem:[%s2272_s1 + $0x100] sm:$0xff]   ;;  %v1964_v49 = vld [vmem:[%s2272_s1 + $0x90] sm:$0xff]   ;;  %v1963_v50 = vld [vmem:[%s2272_s1 + $0x108] sm:$0xff]   ;;  %s2242_s12 = scalar_lea.vmem %s2275_s4, %s1675_s9 }
  0x10   : > { %v1930_v2 = vld [vmem:[%s200_s24] sm:$0xff]   ;;  %v1931_v3 = vld [vmem:[%s200_s24 + $0x8] sm:$0xff]   ;;  %v1966_v51 = vld [vmem:[%s2272_s1 + $0x110] sm:$0xff]  }
  0x11   : > { %263 = vrot.lane.b32.xlu0 %v1930_v2, %s1976_s25  ;;  %265 = vrot.lane.b32.xlu1 %v1931_v3, %s1976_s25  ;;  %v1965_v52 = vld [vmem:[%s2272_s1 + $0x98] sm:$0xff]   ;;  %v2183_v59 = vld [vmem:[%s2273_s2] ss:$0 sm:$0xff] }
  0x12   : > { %v1967_v53 = vld [vmem:[%s2272_s1 + $0x118] sm:$0xff]  }
  0x15   : > { %715 = vrot.lane.b32.xlu0 %v1930_v2, %s1977_s26  ;;  %717 = vrot.lane.b32.xlu1 %v1931_v3, %s1977_s26 }
  0x19   : > { %835 = vrot.lane.b32.xlu0 %v1930_v2, %s1978_s27  ;;  %837 = vrot.lane.b32.xlu1 %v1931_v3, %s1978_s27 }
  0x1d   : > { %955 = vrot.lane.b32.xlu0 %v1930_v2, %s1979_s28  ;;  %475 = vrot.lane.b32.xlu1 %v1930_v2, %s1980_s29 }
  0x21   : > { %957 = vrot.lane.b32.xlu0 %v1931_v3, %s1979_s28  ;;  %477 = vrot.lane.b32.xlu1 %v1931_v3, %s1980_s29  ;;  %s1674_s29 = sshll.u32 %s2277_s16, 5 }
  0x22   : > { %s2188_s8 = scalar_lea.vmem %s2274_s3, %s1674_s29 }
  0x25   : > { %1075 = vrot.lane.b32.xlu0 %v1930_v2, %s1981_s30  ;;  %595 = vrot.lane.b32.xlu1 %v1930_v2, %s1982_s5 }
  0x29   : > { %1077 = vrot.lane.b32.xlu0 %v1931_v3, %s1981_s30  ;;  %597 = vrot.lane.b32.xlu1 %v1931_v3, %s1982_s5 }
  0x2d   : > { %1195 = vrot.lane.b32.xlu0 %v1930_v2, %s1983_s6  ;;  %1197 = vrot.lane.b32.xlu1 %v1931_v3, %s1983_s6 }
  0x83   : > { %v264_v4 = vpop.permute.xlu0 %263  ;;  %v266_v5 = vpop.permute.xlu1 %265 }
  0x84   : > { %1738 = vmatprep.subr.bf16.mxu1 %v264_v4 }
  0x85   : > { %1739 = vmatpush3.bf16.msra.mxu1 %v264_v4 }
  0x86   : > { %1740 = vmatprep.subr.bf16.mxu1 %v266_v5 }
  0x87   : > { %v2031_v6 = vpop.permute.xlu0 %715  ;;  %v2034_v7 = vpop.permute.xlu1 %717 }
  0x88   : > { %1786 = vmatprep.subr.bf16.mxu0 %v2031_v6 }
  0x89   : > { %1741 = vmatpush3.bf16.msra.mxu1 %v266_v5  ;;  %1787 = vmatpush3.bf16.msra.mxu0 %v2031_v6 }
  0x8a   : > { %1788 = vmatprep.subr.bf16.mxu0 %v2034_v7  ;;  %1750 = vmatprep.subr.bf16.mxu1 %v1930_v2 }
  0x8b   : > { %v836_v10 = vpop.permute.xlu0 %835  ;;  %v838_v12 = vpop.permute.xlu1 %837 }
  0x8c   : > { %1743 = vmatmul.mubr.msk.bf16.vlgmr.msra.gmra.mrb[0].mxu1 %vm269_vm0, %v1933_v8 }
  0x8d   : > { %1789 = vmatpush3.bf16.msra.mxu0 %v2034_v7  ;;  %1746 = vmatprep.mubr.msk.bf16.mxu1 %vm269_vm0, %v1936_v9 }
  0x8e   : > { %1798 = vmatprep.subr.bf16.mxu0 %v836_v10  ;;  %1751 = vmatpush3.bf16.msra.mxu1 %v1930_v2 }
  0x8f   : > { %1752 = vmatprep.subr.bf16.mxu1 %v1931_v3  ;;  %v476_v15 = vpop.permute.xlu1 %475  ;;  %v956_v17 = vpop.permute.xlu0 %955 }
  0x90   : > { %1791 = vmatmul.mubr.msk.bf16.vlgmr.msra.gmra.mrb[0].mxu0 %vm269_vm0, %v1935_v11 }
  0x91   : > { %1799 = vmatpush3.bf16.msra.mxu0 %v836_v10  ;;  %1802 = vmatprep.mubr.msk.bf16.mxu0 %vm269_vm0, %v1939_v13 }
  0x92   : > { %1800 = vmatprep.subr.bf16.mxu0 %v838_v12  ;;  %1753 = vmatpush3.bf16.msra.mxu1 %v1931_v3 }
  0x93   : > { %1762 = vmatprep.subr.bf16.mxu1 %v476_v15  ;;  %v958_v22 = vpop.permute.xlu0 %957  ;;  %v478_v23 = vpop.permute.xlu1 %477 }
  0x94   : > { %1747 = vmatmul.mubr.msk.bf16.gmra.mrb[4].mxu1 %vm269_vm0, %v1937_v14 }
  0x95   : > { %1801 = vmatpush3.bf16.msra.mxu0 %v838_v12  ;;  %1754 = vmatprep.mubr.msk.bf16.mxu1 %vm269_vm0, %v1938_v16 }
  0x96   : > { %1810 = vmatprep.subr.bf16.mxu0 %v956_v17 }
  0x97   : > { %v1076_v24 = vpop.permute.xlu0 %1075  ;;  %v596_v28 = vpop.permute.xlu1 %595 }
  0x9b   : > { %v598_v33 = vpop.permute.xlu1 %597  ;;  %v1078_v34 = vpop.permute.xlu0 %1077 }
  0x9c   : > { %1755 = vmatmul.mubr.msk.bf16.vlgmr.msra.gmra.mrb[0].mxu1 %vm269_vm0, %v1940_v18  ;;  %1803 = vmatmul.mubr.msk.bf16.vlgmr.msra.gmra.mrb[0].mxu0 %vm269_vm0, %v1941_v19 }
  0x9d   : > { %1811 = vmatpush3.bf16.msra.mxu0 %v956_v17  ;;  %1758 = vmatprep.mubr.msk.bf16.mxu1 %vm269_vm0, %v1942_v20 }
  0x9e   : > { %1806 = vmatprep.mubr.msk.bf16.mxu0 %vm269_vm0, %v1943_v21  ;;  %1812 = vmatprep.subr.bf16.mxu0 %v958_v22 }
  0x9f   : > { %1763 = vmatpush3.bf16.msra.mxu1 %v476_v15  ;;  %v1196_v36 = vpop.permute.xlu0 %1195  ;;  %v1198_v45 = vpop.permute.xlu1 %1197 }
  0xa0   : > { %1764 = vmatprep.subr.bf16.mxu1 %v478_v23 }
  0xa1   : > { %1813 = vmatpush3.bf16.msra.mxu0 %v958_v22 }
  0xa2   : > { %1822 = vmatprep.subr.bf16.mxu0 %v1076_v24 }
  0xa3   : > { %1765 = vmatpush3.bf16.msra.mxu1 %v478_v23 }
  0xa4   : > { %1759 = vmatmul.mubr.msk.bf16.gmra.mrb[4].mxu1 %vm269_vm0, %v1944_v25  ;;  %1807 = vmatmul.mubr.msk.bf16.gmra.mrb[4].mxu0 %vm269_vm0, %v1945_v26 }
  0xa5   : > { %1766 = vmatprep.mubr.msk.bf16.mxu1 %vm269_vm0, %v1946_v27  ;;  %1774 = vmatprep.subr.bf16.mxu1 %v596_v28 }
  0xa6   : > { %1814 = vmatprep.mubr.msk.bf16.mxu0 %vm269_vm0, %v1947_v29 }
  0xac   : > { %1767 = vmatmul.mubr.msk.bf16.vlgmr.msra.gmra.mrb[0].mxu1 %vm269_vm0, %v1948_v30  ;;  %1815 = vmatmul.mubr.msk.bf16.vlgmr.msra.gmra.mrb[0].mxu0 %vm269_vm0, %v1949_v31 }
  0xad   : > { %1775 = vmatpush3.bf16.msra.mxu1 %v596_v28  ;;  %1823 = vmatpush3.bf16.msra.mxu0 %v1076_v24 }
  0xae   : > { %1776 = vmatprep.subr.bf16.mxu1 %v598_v33  ;;  %1770 = vmatprep.mubr.msk.bf16.mxu1 %vm269_vm0, %v1950_v32 }
  0xaf   : > { %1818 = vmatprep.mubr.msk.bf16.mxu0 %vm269_vm0, %v1951_v35  ;;  %1824 = vmatprep.subr.bf16.mxu0 %v1078_v34 }
  0xb1   : > { %1777 = vmatpush3.bf16.msra.mxu1 %v598_v33  ;;  %1825 = vmatpush3.bf16.msra.mxu0 %v1078_v34 }
  0xb2   : > { %1846 = vmatprep.subr.bf16.mxu1 %v2031_v6  ;;  %1834 = vmatprep.subr.bf16.mxu0 %v1196_v36 }
  0xb4   : > { %1771 = vmatmul.mubr.msk.bf16.gmra.mrb[4].mxu1 %vm269_vm0, %v1952_v37  ;;  %1819 = vmatmul.mubr.msk.bf16.gmra.mrb[4].mxu0 %vm269_vm0, %v1953_v38 }
  0xb5   : > { %1778 = vmatprep.mubr.msk.bf16.mxu1 %vm269_vm0, %v1954_v39  ;;  %1826 = vmatprep.mubr.msk.bf16.mxu0 %vm269_vm0, %v1955_v40 }
  0xbc   : > { %1779 = vmatmul.mubr.msk.bf16.vlgmr.msra.gmra.mrb[0].mxu1 %vm269_vm0, %v1956_v41  ;;  %1827 = vmatmul.mubr.msk.bf16.vlgmr.msra.gmra.mrb[0].mxu0 %vm269_vm0, %v1957_v42 }
  0xbd   : > { %1848 = vmatpush3.bf16.msra.mxu1 %v2031_v6  ;;  %1835 = vmatpush3.bf16.msra.mxu0 %v1196_v36 }
  0xbe   : > { %1847 = vmatprep.subr.bf16.mxu1 %v2034_v7  ;;  %1782 = vmatprep.mubr.msk.bf16.mxu1 %vm269_vm0, %v1958_v43 }
  0xbf   : > { %1830 = vmatprep.mubr.msk.bf16.mxu0 %vm269_vm0, %v1959_v44  ;;  %1836 = vmatprep.subr.bf16.mxu0 %v1198_v45 }
  0xc1   : > { %1849 = vmatpush3.bf16.msra.mxu1 %v2034_v7  ;;  %1837 = vmatpush3.bf16.msra.mxu0 %v1198_v45 }
  0xc4   : > { %1783 = vmatmul.mubr.msk.bf16.gmra.mrb[4].mxu1 %vm269_vm0, %v1960_v46  ;;  %1831 = vmatmul.mubr.msk.bf16.gmra.mrb[4].mxu0 %vm269_vm0, %v1961_v47 }
  0xc5   : > { %1838 = vmatprep.mubr.msk.bf16.mxu0 %vm269_vm0, %v1962_v48  ;;  %1794 = vmatprep.mubr.msk.bf16.mxu1 %vm269_vm0, %v1964_v49 }
  0xcc   : > { %1839 = vmatmul.mubr.msk.bf16.vlgmr.msra.gmra.mrb[0].mxu0 %vm269_vm0, %v1963_v50 }
  0xcd   : > { %1842 = vmatprep.mubr.msk.bf16.mxu0 %vm269_vm0, %v1966_v51 }
  0xd0   : > { %1795 = vmatmul.mubr.msk.bf16.vlgmr.msra.gmra.mrb[4].mxu1 %vm269_vm0, %v1965_v52 }
  0xd4   : > { %1843 = vmatmul.mubr.msk.bf16.gmra.mrb[4].mxu0 %vm269_vm0, %v1967_v53 }
 0x18f   : > { %v1780_v54 = vpop.f32.mrb[0].mxu1 }
 0x190   : > { %v647_v55 = vpop.f32.mrb[1].mxu1 }
 0x191   : > { %v1781_v56 = vpop.f32.mrb[2].mxu1 }
 0x192   : > { %v650_v57 = vpop.f32.mrb[3].mxu1 }
 0x19f   : > { %v1840_v58 = vpop.f32.mrb[0].mxu0 }
 0x1a0   : > { %v1850_v60 = vadd.f32 %v1840_v58, %v1780_v54  ;;  %v1247_v61 = vpop.f32.mrb[1].mxu0 }
 0x1a1   : > { %v1851_v62 = vadd.f32 %v1247_v61, %v647_v55  ;;  %v1841_v63 = vpop.f32.mrb[2].mxu0 }
 0x1a2   : > { %v1678_v0 = vpack.c.bf16 %v1850_v60, %v1850_v60  ;;  %v1852_v1 = vadd.f32 %v1841_v63, %v1781_v56  ;;  %v1250_v2 = vpop.f32.mrb[3].mxu0  ;;  %v1336_v3 = vmul.f32 %v1850_v60, %v2183_v59  ;;  %v1369_v4 = vmul.f32 %v1850_v60, %v1850_v60 }
 0x1a3   : > { %v1676_v5 = vpack.c.bf16 %v1851_v62, %v1851_v62  ;;  %v1853_v6 = vadd.f32 %v1250_v2, %v650_v57  ;;  %v1796_v7 = vpop.f32.mrb[4].mxu1  ;;  %v1334_v12 = vmul.f32 %v1851_v62, %v2183_v59  ;;  %v1367_v18 = vmul.f32 %v1851_v62, %v1851_v62 }
 0x1a4   : > { %1321 = vst.msk [vmem:[%s2188_s8 + $0x8] sm:$0xf] %vm1318_vm1, %v1678_v0  ;;  %v1679_v8 = vpack.c.bf16 %v1852_v1, %v1852_v1  ;;  %v783_v9 = vpop.f32.mrb[5].mxu1  ;;  %v1349_v10 = vsel %vm1342_vm2, %v1336_v3, 0.0  ;;  %v1377_v11 = vmul.f32 %v2183_v59, %v1369_v4  ;;  %v1337_v23 = vmul.f32 %v1852_v1, %v2183_v59 }
 0x1a5   : > { %1319 = vst.msk [vmem:[%s2188_s8] sm:$0xf] %vm1318_vm1, %v1676_v5  ;;  %v1677_v13 = vpack.c.bf16 %v1853_v6, %v1853_v6  ;;  %v1797_v14 = vpop.f32.mrb[6].mxu1  ;;  %1350 = vadd.xlane.f32.xlu0 %v1349_v10  ;;  %v1335_v17 = vmul.f32 %v1853_v6, %v2183_v59  ;;  %v1343_v22 = vsel %vm1342_vm2, %v1334_v12, 0.0  ;;  %v1370_v24 = vmul.f32 %v1852_v1, %v1852_v1 }
 0x1a6   : > { %1322 = vst.msk [vmem:[%s2188_s8 + $0xc] sm:$0xf] %vm1318_vm1, %v1679_v8  ;;  %v786_v15 = vpop.f32.mrb[7].mxu1  ;;  %v1389_v16 = vsel %vm1342_vm2, %v1377_v11, 0.0  ;;  %v1375_v31 = vmul.f32 %v2183_v59, %v1367_v18  ;;  %v1352_v35 = vsel %vm1342_vm2, %v1337_v23, 0.0  ;;  %v1368_v37 = vmul.f32 %v1853_v6, %v1853_v6 }
 0x1a7   : > { %1320 = vst.msk [vmem:[%s2188_s8 + $0x4] sm:$0xf] %vm1318_vm1, %v1677_v13  ;;  %1390 = vadd.xlane.f32.xlu1 %v1389_v16  ;;  %v1844_v19 = vpop.f32.mrb[4].mxu0  ;;  %v1346_v30 = vsel %vm1342_vm2, %v1335_v17, 0.0  ;;  %v1378_v36 = vmul.f32 %v2183_v59, %v1370_v24 }
 0x1a8   : > { %v1854_v20 = vadd.f32 %v1844_v19, %v1796_v7  ;;  %v1263_v21 = vpop.f32.mrb[5].mxu0  ;;  %v1383_v39 = vsel %vm1342_vm2, %v1375_v31, 0.0  ;;  %v1376_v42 = vmul.f32 %v2183_v59, %v1368_v37 }
 0x1a9   : > { %v1855_v25 = vadd.f32 %v1263_v21, %v783_v9  ;;  %1344 = vadd.xlane.f32.xlu0 %v1343_v22  ;;  %v1845_v26 = vpop.f32.mrb[6].mxu0  ;;  %v1392_v41 = vsel %vm1342_vm2, %v1378_v36, 0.0 }
 0x1aa   : > { %v1682_v27 = vpack.c.bf16 %v1854_v20, %v1854_v20  ;;  %v1856_v28 = vadd.f32 %v1845_v26, %v1797_v14  ;;  %v1266_v29 = vpop.f32.mrb[7].mxu0  ;;  %v1340_v40 = vmul.f32 %v1854_v20, %v2183_v59  ;;  %v1386_v46 = vsel %vm1342_vm2, %v1376_v42, 0.0 }
 0x1ab   : > { %v1680_v32 = vpack.c.bf16 %v1855_v25, %v1855_v25  ;;  %v1857_v33 = vadd.f32 %v1266_v29, %v786_v15  ;;  %1347 = vadd.xlane.f32.xlu1 %v1346_v30  ;;  %v1338_v44 = vmul.f32 %v1855_v25, %v2183_v59  ;;  %v1371_v45 = vmul.f32 %v1855_v25, %v1855_v25 }
 0x1ac   : > { %1325 = vst.msk [vmem:[%s2188_s8 + $0x18] sm:$0xf] %vm1318_vm1, %v1682_v27  ;;  %v1683_v34 = vpack.c.bf16 %v1856_v28, %v1856_v28  ;;  %v1361_v43 = vsel %vm1342_vm2, %v1340_v40, 0.0  ;;  %v1341_v47 = vmul.f32 %v1856_v28, %v2183_v59  ;;  %v1373_v50 = vmul.f32 %v1854_v20, %v1854_v20 }
 0x1ad   : > { %1323 = vst.msk [vmem:[%s2188_s8 + $0x10] sm:$0xf] %vm1318_vm1, %v1680_v32  ;;  %v1681_v38 = vpack.c.bf16 %v1857_v33, %v1857_v33  ;;  %1353 = vadd.xlane.f32.xlu0 %v1352_v35  ;;  %v1355_v48 = vsel %vm1342_vm2, %v1338_v44, 0.0  ;;  %v1379_v49 = vmul.f32 %v2183_v59, %v1371_v45  ;;  %v1339_v52 = vmul.f32 %v1857_v33, %v2183_v59 }
 0x1ae   : > { %1326 = vst.msk [vmem:[%s2188_s8 + $0x1c] sm:$0xf] %vm1318_vm1, %v1683_v34  ;;  %v1364_v51 = vsel %vm1342_vm2, %v1341_v47, 0.0  ;;  %v1372_v53 = vmul.f32 %v1857_v33, %v1857_v33  ;;  %v1381_v55 = vmul.f32 %v2183_v59, %v1373_v50  ;;  %v1374_v58 = vmul.f32 %v1856_v28, %v1856_v28 }
 0x1af   : > { %1324 = vst.msk [vmem:[%s2188_s8 + $0x14] sm:$0xf] %vm1318_vm1, %v1681_v38  ;;  %1384 = vadd.xlane.f32.xlu1 %v1383_v39  ;;  %v1395_v54 = vsel %vm1342_vm2, %v1379_v49, 0.0  ;;  %v1358_v56 = vsel %vm1342_vm2, %v1339_v52, 0.0 }
 0x1b0   : > { %v1380_v57 = vmul.f32 %v2183_v59, %v1372_v53  ;;  %v1401_v60 = vsel %vm1342_vm2, %v1381_v55, 0.0  ;;  %v1382_v62 = vmul.f32 %v2183_v59, %v1374_v58 }
 0x1b1   : > { %1393 = vadd.xlane.f32.xlu0 %v1392_v41 }
 0x1b2   : > { %v1398_v61 = vsel %vm1342_vm2, %v1380_v57, 0.0  ;;  %v1404_v63 = vsel %vm1342_vm2, %v1382_v62, 0.0 }
 0x1b3   : > { %1362 = vadd.xlane.f32.xlu1 %v1361_v43 }
 0x1b5   : > { %1387 = vadd.xlane.f32.xlu0 %v1386_v46 }
 0x1b7   : > { %1356 = vadd.xlane.f32.xlu1 %v1355_v48 }
 0x1b9   : > { %1365 = vadd.xlane.f32.xlu0 %v1364_v51 }
 0x1bb   : > { %1396 = vadd.xlane.f32.xlu1 %v1395_v54 }
 0x1bd   : > { %1359 = vadd.xlane.f32.xlu0 %v1358_v56 }
 0x1bf   : > { %1402 = vadd.xlane.f32.xlu1 %v1401_v60 }
 0x1c1   : > { %1399 = vadd.xlane.f32.xlu0 %v1398_v61 }
 0x1c5   : > { %1405 = vadd.xlane.f32.xlu0 %v1404_v63 }
 0x232   : > { %v1351_v0 = vpop.xlane.xlu0 %1350 }
 0x234   : > { %v1391_v1 = vpop.xlane.xlu1 %1390 }
 0x235   : > { %v1410_v59 = vsel %vm1407_vm3, %v1351_v0, %v1391_v1 }
 0x236   : > { %1419 = vst.msk [vmem:[%s2242_s12 + $0x10] sm:$0xff] %vm1416_vm4, %v1410_v59  ;;  %v1345_v2 = vpop.xlane.xlu0 %1344 }
 0x238   : > { %v1348_v3 = vpop.xlane.xlu1 %1347 }
 0x23a   : > { %v1354_v4 = vpop.xlane.xlu0 %1353 }
 0x23c   : > { %v1385_v5 = vpop.xlane.xlu1 %1384 }
 0x23d   : > { %v1408_v6 = vsel %vm1407_vm3, %v1345_v2, %v1385_v5 }
 0x23e   : > { %1417 = vst.msk [vmem:[%s2242_s12] sm:$0xff] %vm1416_vm4, %v1408_v6  ;;  %v1394_v7 = vpop.xlane.xlu0 %1393 }
 0x23f   : > { %v1411_v8 = vsel %vm1407_vm3, %v1354_v4, %v1394_v7 }
 0x240   : > { %1420 = vst.msk [vmem:[%s2242_s12 + $0x18] sm:$0xff] %vm1416_vm4, %v1411_v8  ;;  %v1363_v9 = vpop.xlane.xlu1 %1362 }
 0x242   : > { %v1388_v10 = vpop.xlane.xlu0 %1387 }
 0x243   : > { %v1409_v11 = vsel %vm1407_vm3, %v1348_v3, %v1388_v10 }
 0x244   : > { %1418 = vst.msk [vmem:[%s2242_s12 + $0x8] sm:$0xff] %vm1416_vm4, %v1409_v11  ;;  %v1357_v12 = vpop.xlane.xlu1 %1356 }
 0x246   : > { %v1366_v13 = vpop.xlane.xlu0 %1365 }
 0x248   : > { %v1397_v14 = vpop.xlane.xlu1 %1396 }
 0x249   : > { %v1412_v15 = vsel %vm1407_vm3, %v1357_v12, %v1397_v14 }
 0x24a   : > { %1421 = vst.msk [vmem:[%s2242_s12 + $0x20] sm:$0xff] %vm1416_vm4, %v1412_v15  ;;  %v1360_v16 = vpop.xlane.xlu0 %1359 }
 0x24c   : > { %v1403_v17 = vpop.xlane.xlu1 %1402 }
 0x24d   : > { %v1414_v18 = vsel %vm1407_vm3, %v1363_v9, %v1403_v17 }
 0x24e   : > { %1423 = vst.msk [vmem:[%s2242_s12 + $0x30] sm:$0xff] %vm1416_vm4, %v1414_v18  ;;  %v1400_v19 = vpop.xlane.xlu0 %1399 }
 0x24f   : > { %v1413_v20 = vsel %vm1407_vm3, %v1360_v16, %v1400_v19 }
 0x250   : > { %1422 = vst.msk [vmem:[%s2242_s12 + $0x28] sm:$0xff] %vm1416_vm4, %v1413_v20 }
 0x252   : > { %v1406_v21 = vpop.xlane.xlu0 %1405 }
 0x253   : > { %v1415_v22 = vsel %vm1407_vm3, %v1366_v13, %v1406_v21 }
 0x254   : > { %1424 = vst.msk [vmem:[%s2242_s12 + $0x38] sm:$0xff] %vm1416_vm4, %v1415_v22 }
 0x255 PF: > { %s15_s15 = sadd.s32 1, %s1974_s15  }
 0x256   : > { %p12_p4 = scmp.ge.s32.totalorder %s15_s15, 4  }
 0x258   :  { %14 = sbr.rel (!%p12_p4) target bundleno = 1 (0x1), region = 82 }

// kernel: squeeze.185
= control target key start
LH: loop header
LB: loop body
LE: loop exit
PB: predicated region body
PF: predicated region fallthrough
CT: control target
= control target key end

     0   :  { %s37_s8 = smov 104   ;;  %vm7_vm0 = vcmask 64512   ;;  %s38_s9 = smov 112   ;;  %s55_s0 = inlined_call_operand.vmem [shape: f32[32], index: 0, kind: input, shape index: {}]   ;;  %s56_s1 = inlined_call_operand.vmem [shape: f32[4,8], index: 1, kind: output, shape index: {}]  }
   0x1   :  { %v4_v0 = vld [vmem:[%s55_s0] sm:$0x1]  ;;  %s36_s0 = smov 120  }
   0x2   :  { %5 = vst [vmem:[#allocation1] sm:$0x1] %v4_v0 }
   0x9   :  { %v9_v1 = vld [vmem:[#allocation1] sm:$0x1]  }
   0xa   :  { %v21_v2 = vld [vmem:[#allocation1] sm:$0x1]   ;;  %10 = vrot.lane.b32.xlu0 %v9_v1, %s36_s0 }
   0xb   :  { %22 = vrot.lane.b32.xlu1 %v21_v2, %s37_s8  ;;  %v6_v3 = vld [vmem:[#allocation1] sm:$0x1]  }
   0xc   :  { %v15_v4 = vld [vmem:[#allocation1] sm:$0x1]   ;;  %8 = vst.msk [vmem:[#allocation0] sm:$0x1] %vm7_vm0, %v6_v3  }
   0xe   :  { %16 = vrot.lane.b32.xlu0 %v15_v4, %s38_s9 }
  0x7c   :  { %v11_v5 = vpop.permute.xlu0 %10  }
  0x7d   :  { %v23_v6 = vpop.permute.xlu1 %22   ;;  %14 = vst.msk [vmem:[#allocation0 + $0x1] sm:$0x1] %vm7_vm0, %v11_v5  }
  0x7e   :  { %26 = vst.msk [vmem:[#allocation0 + $0x3] sm:$0x1] %vm7_vm0, %v23_v6  }
  0x80   :  { %v17_v7 = vpop.permute.xlu0 %16  }
  0x81   :  { %20 = vst.msk [vmem:[#allocation0 + $0x2] sm:$0x1] %vm7_vm0, %v17_v7  }
  0x88   :  { %v30_v8 = vld [vmem:[#allocation0] sm:$0xf] }
  0x89   :  { %32 = vst [vmem:[%s56_s1] sm:$0xf] %v30_v8 }

// kernel: netg_forward.8
= control target key start
LH: loop header
LB: loop body
LE: loop exit
PB: predicated region body
PF: predicated region fallthrough
CT: control target
= control target key end

     0   :  { %s2137_s15 = smov 0   ;;  %s2377_s0 = inlined_call_operand.vmem [shape: bf16[2,16,384], index: 0, kind: input, shape index: {}]   ;;  %s2378_s1 = inlined_call_operand.vmem [shape: bf16[9,32,16], index: 1, kind: input, shape index: {}]   ;;  %s2379_s2 = inlined_call_operand.vmem [shape: f32[1,324], index: 2, kind: input, shape index: {}]   ;;  %s2380_s3 = inlined_call_operand.vmem [shape: bf16[2,32,324], index: 3, kind: output, shape index: {0}]   ;;  %s2381_s4 = inlined_call_operand.vmem [shape: f32[2,32,2], index: 4, kind: output, shape index: {1}]  }
   0x1 LB: > { %s1760_s16 = sadd.s32 4294967295, %s2101_s15   ;;  %p1764_p0 = scmp.ge.s32.totalorder %s2101_s15, 1  ;;  %s2101_s15 = sphi %s2137_s15, %s15_s15  }
   0x2   : > { %p165_p1 = scmp.lt.s32.totalorder %s2101_s15, 3 }
   0x4   : > { %p166_p2 = pnand %p1764_p0, %p165_p1 }
   0x5   : > { %p196_p3 = scmp.lt.s32.totalorder (!%p166_p2), %s1760_s16, 1  ;;  %v2103_v0 = vmov (!%p166_p2), 0   ;;  %s2104_s21 = smov (!%p166_p2), 127   ;;  %vm254_vm0 = vcmask (!%p166_p2), 1039360   ;;  %v2077_v10 = vld [vmem:[%s2378_s1 + $0x10] sm:$0xff] (!%p166_p2)   ;;  %vm511_vm1 = vcmask (!%p166_p2), 1031168  }
   0x6   : > { %169 = sbr.rel (%p166_p2) target bundleno = 643 (0x283), region = 32  ;;  %299 = vmatprep.mubr.bf16.mxu1 (!%p166_p2), %v2103_v0  ;;  %555 = vmatprep.mubr.bf16.mxu0 (!%p166_p2), %v2103_v0  ;;  %s2105_s22 = smov (!%p166_p2), 126   ;;  %vm260_vm2 = vcmask (!%p166_p2), 130048   ;;  %v2183_v15 = vld [vmem:[%s2378_s1 + $0x20] sm:$0xff] (!%p166_p2)   ;;  %vm658_vm3 = vcmask (!%p166_p2), 900096   ;;  %v2079_v19 = vld [vmem:[%s2378_s1 + $0x18] sm:$0xff] (!%p166_p2)  }
   0x7   : > { %s2106_s23 = smov (!%p166_p2), 110   ;;  %s2107_s24 = smov (!%p166_p2), 109   ;;  %v2080_v23 = vld [vmem:[%s2378_s1 + $0x28] sm:$0xff] (!%p166_p2)   ;;  %vm805_vm4 = vcmask (!%p166_p2), 891904   ;;  %v2081_v27 = vld [vmem:[%s2378_s1 + $0x30] sm:$0xff] (!%p166_p2)   ;;  %vm952_vm5 = vcmask (!%p166_p2), 883712  }
   0x8   : > { %s2108_s25 = smov (!%p166_p2), 108   ;;  %s2109_s26 = smov (!%p166_p2), 92   ;;  %v2082_v32 = vld [vmem:[%s2378_s1] sm:$0xff] (!%p166_p2)   ;;  %v2083_v33 = vld [vmem:[%s2378_s1 + $0x38] sm:$0xff] (!%p166_p2)   ;;  %v2084_v34 = vld [vmem:[%s2378_s1 + $0x8] sm:$0xff] (!%p166_p2)   ;;  %vm1099_vm6 = vcmask (!%p166_p2), 752640  }
   0x9   : > { %s2110_s27 = smov (!%p166_p2), 91   ;;  %s2111_s28 = smov (!%p166_p2), 90   ;;  %v2085_v36 = vld [vmem:[%s2378_s1 + $0x40] sm:$0xff] (!%p166_p2)   ;;  %v2086_v41 = vld [vmem:[%s2378_s1 + $0x48] sm:$0xff] (!%p166_p2)   ;;  %v2087_v43 = vld [vmem:[%s2378_s1 + $0x50] sm:$0xff] (!%p166_p2)   ;;  %vm1246_vm7 = vcmask (!%p166_p2), 744448  }
   0xa   : > { %v2088_v48 = vld [vmem:[%s2378_s1 + $0x58] sm:$0xff] (!%p166_p2)   ;;  %v2089_v50 = vld [vmem:[%s2378_s1 + $0x60] sm:$0xff] (!%p166_p2)   ;;  %vm1393_vm8 = vcmask (!%p166_p2), 736256   ;;  %v2090_v55 = vld [vmem:[%s2378_s1 + $0x68] sm:$0xff] (!%p166_p2)   ;;  %vm1560_vm9 = vcmask (!%p166_p2), 551936   ;;  %vm1598_vm10 = vcmask (!%p166_p2), 556032  }
   0xb   : > { %v2091_v57 = vld [vmem:[%s2378_s1 + $0x70] sm:$0xff] (!%p166_p2)   ;;  %v2092_v59 = vld [vmem:[%s2378_s1 + $0x78] sm:$0xff] (!%p166_p2)   ;;  %v2093_v60 = vld [vmem:[%s2378_s1 + $0x80] sm:$0xff] (!%p166_p2)   ;;  %vm1662_vm11 = vcmask (!%p166_p2), 7168   ;;  %vm1667_vm12 = vcmask (!%p166_p2), 15360  }
   0xc   : > { %v2094_v61 = vld [vmem:[%s2378_s1 + $0x88] sm:$0xff] (!%p166_p2)  }
   0xd   : > { %s2383_s16 = smov (!%p196_p3, %s1760_s16), 1 }
   0xe   : > { %s2054_s17 = smul.u32 24, %s2383_s16 }
   0xf   : > { %s2055_s19 = smul.u32 48, %s2383_s16 }
  0x10   : > { %s200_s20 = scalar_lea.vmem %s2377_s0, %s2054_s17 }
  0x11   : > { %v2073_v1 = vld [vmem:[%s200_s20 + $0x4] ss:$12 sps:$4 sm:$0xff]   ;;  %v2153_v2 = vld [vmem:[%s200_s20] ss:$12 sps:$4 sm:$0xff]   ;;  %v2156_v3 = vld [vmem:[%s200_s20 + $0x8] ss:$12 sps:$4 sm:$0xff]  }
  0x12   : > { %250 = vrot.lane.b32.xlu0 %v2073_v1, %s2104_s21  ;;  %248 = vrot.lane.b32.xlu1 %v2153_v2, %s2104_s21 }
  0x16   : > { %252 = vrot.lane.b32.xlu0 %v2156_v3, %s2104_s21  ;;  %507 = vrot.lane.b32.xlu1 %v2073_v1, %s2105_s22 }
  0x1a   : > { %509 = vrot.lane.b32.xlu0 %v2156_v3, %s2105_s22  ;;  %505 = vrot.lane.b32.xlu1 %v2153_v2, %s2105_s22  ;;  %s2334_s22 = scalar_lea.vmem %s2380_s3, %s2055_s19 }
  0x1e   : > { %654 = vrot.lane.b32.xlu0 %v2073_v1, %s2106_s23  ;;  %656 = vrot.lane.b32.xlu1 %v2156_v3, %s2106_s23 }
  0x22   : > { %652 = vrot.lane.b32.xlu0 %v2153_v2, %s2106_s23  ;;  %801 = vrot.lane.b32.xlu1 %v2073_v1, %s2107_s24  ;;  %s1868_s23 = sshll.u32 %s2383_s16, 5 }
  0x26   : > { %803 = vrot.lane.b32.xlu0 %v2156_v3, %s2107_s24  ;;  %799 = vrot.lane.b32.xlu1 %v2153_v2, %s2107_s24 }
  0x2a   : > { %948 = vrot.lane.b32.xlu0 %v2073_v1, %s2108_s25  ;;  %950 = vrot.lane.b32.xlu1 %v2156_v3, %s2108_s25 }
  0x2e   : > { %946 = vrot.lane.b32.xlu0 %v2153_v2, %s2108_s25  ;;  %1095 = vrot.lane.b32.xlu1 %v2073_v1, %s2109_s26 }
  0x32   : > { %1097 = vrot.lane.b32.xlu0 %v2156_v3, %s2109_s26  ;;  %1093 = vrot.lane.b32.xlu1 %v2153_v2, %s2109_s26  ;;  %s210_s26 = scalar_lea.vmem %s2381_s4, %s1868_s23 }
  0x36   : > { %1242 = vrot.lane.b32.xlu0 %v2073_v1, %s2110_s27  ;;  %1244 = vrot.lane.b32.xlu1 %v2156_v3, %s2110_s27 }
  0x3a   : > { %1240 = vrot.lane.b32.xlu0 %v2153_v2, %s2110_s27  ;;  %1389 = vrot.lane.b32.xlu1 %v2073_v1, %s2111_s28 }
  0x3e   : > { %1391 = vrot.lane.b32.xlu0 %v2156_v3, %s2111_s28  ;;  %1387 = vrot.lane.b32.xlu1 %v2153_v2, %s2111_s28 }
  0x84   : > { %v251_v4 = vpop.permute.xlu0 %250  ;;  %v249_v5 = vpop.permute.xlu1 %248 }
  0x85   : > { %v255_v9 = vsel %vm254_vm0, %v249_v5, %v251_v4 }
  0x88   : > { %v253_v6 = vpop.permute.xlu0 %252  ;;  %v508_v7 = vpop.permute.xlu1 %507 }
  0x89   : > { %v256_v8 = vsel %vm254_vm0, %v251_v4, %v253_v6 }
  0x8a   : > { %267 = vmatprep.subr.bf16.mxu1 %v256_v8 }
  0x8b   : > { %268 = vmatpush1.bf16.msra.mxu1 %v255_v9  ;;  %v2325_v9 = vld [vmem:[%s2379_s2] sm:$0x7] }
  0x8c   : > { %v2176_v11 = vpop.permute.xlu0 %509  ;;  %1904 = vmatprep.subr.bf16.mxu1 %v253_v6  ;;  %v506_v12 = vpop.permute.xlu1 %505 }
  0x8d   : > { %v513_v13 = vsel %vm511_vm1, %v508_v7, %v2176_v11  ;;  %v512_v14 = vsel %vm511_vm1, %v506_v12, %v508_v7 }
  0x8e   : > { %1778 = vmatmul.mubr.msk.bf16.vlgmr.msra.gmra.mrb[0].mxu1 %vm260_vm2, %v2077_v10  ;;  %523 = vmatprep.subr.bf16.mxu0 %v513_v13 }
  0x8f   : > { %1905 = vmatpush3.bf16.msra.mxu1 %v253_v6  ;;  %524 = vmatpush1.bf16.msra.mxu0 %v512_v14  ;;  %v1570_v6 = vlaneseq }
  0x90   : > { %v655_v16 = vpop.permute.xlu0 %654  ;;  %309 = vmatprep.mubr.bf16.mxu1 %v2103_v0  ;;  %v2186_v17 = vpop.permute.xlu1 %656  ;;  %388 = vmatprep.subr.bf16.mxu1 %v2073_v1 }
  0x91   : > { %v660_v18 = vsel %vm658_vm3, %v655_v16, %v2186_v17  ;;  %v2319_v7 = vshrl.u32 %v1570_v6, 7 }
  0x92   : > { %1794 = vmatmul.mubr.msk.bf16.vlgmr.msra.gmra.mrb[0].mxu0 %vm260_vm2, %v2183_v15  ;;  %670 = vmatprep.subr.bf16.mxu0 %v660_v18 }
  0x93   : > { %565 = vmatprep.mubr.bf16.mxu0 %v2103_v0  ;;  %v1572_v8 = vsub.s32 0, %v2319_v7 }
  0x94   : > { %v653_v20 = vpop.permute.xlu0 %652  ;;  %v802_v21 = vpop.permute.xlu1 %801 }
  0x95   : > { %v659_v22 = vsel %vm658_vm3, %v653_v20, %v655_v16 }
  0x96   : > { %1779 = vmatmul.mubr.msk.bf16.gmra.mrb[4].mxu1 %vm260_vm2, %v2079_v19  ;;  %671 = vmatpush1.bf16.msra.mxu0 %v659_v22 }
  0x97   : > { %1906 = vmatprep.mubr.msk.bf16.mxu1 %vm260_vm2, %v2077_v10  ;;  %v1576_v10 = vsub.s32 1, %v2319_v7 }
  0x98   : > { %v2200_v24 = vpop.permute.xlu0 %803  ;;  %v800_v26 = vpop.permute.xlu1 %799 }
  0x99   : > { %v807_v25 = vsel %vm805_vm4, %v802_v21, %v2200_v24  ;;  %v806_v29 = vsel %vm805_vm4, %v800_v26, %v802_v21  ;;  %v1577_v13 = vrot.slane %v2325_v9, %v1576_v10 }
  0x9a   : > { %1795 = vmatmul.mubr.msk.bf16.gmra.mrb[4].mxu0 %vm260_vm2, %v2080_v23  ;;  %817 = vmatprep.subr.bf16.mxu0 %v807_v25 }
  0x9b   : > { %702 = vmatprep.mubr.bf16.mxu0 %v2103_v0 }
  0x9c   : > { %v2209_v28 = vpop.permute.xlu1 %950  ;;  %v949_v30 = vpop.permute.xlu0 %948 }
  0x9d   : > { %v954_v31 = vsel %vm952_vm5, %v949_v30, %v2209_v28 }
  0x9e   : > { %1907 = vmatmul.mubr.msk.bf16.vlgmr.msra.gmra.mrb[8].mxu1 %vm260_vm2, %v2079_v19 }
  0x9f   : > { %389 = vmatpush1.bf16.msra.mxu1 %v2153_v2  ;;  %420 = vmatprep.mubr.bf16.mxu1 %v2103_v0 }
  0xa0   : > { %1910 = vmatprep.subr.bf16.mxu1 %v2156_v3  ;;  %v947_v35 = vpop.permute.xlu0 %946  ;;  %v1096_v39 = vpop.permute.xlu1 %1095 }
  0xa1   : > { %v953_v38 = vsel %vm952_vm5, %v947_v35, %v949_v30 }
  0xa2   : > { %1804 = vmatmul.mubr.msk.bf16.vlgmr.msra.gmra.mrb[0].mxu0 %vm260_vm2, %v2081_v27 }
  0xa3   : > { %712 = vmatprep.mubr.bf16.mxu0 %v2103_v0  ;;  %818 = vmatpush1.bf16.msra.mxu0 %v806_v29 }
  0xa4   : > { %964 = vmatprep.subr.bf16.mxu0 %v954_v31  ;;  %v2237_v37 = vpop.permute.xlu0 %1097  ;;  %v1094_v42 = vpop.permute.xlu1 %1093 }
  0xa5   : > { %v1101_v40 = vsel %vm1099_vm6, %v1096_v39, %v2237_v37  ;;  %v1100_v45 = vsel %vm1099_vm6, %v1094_v42, %v1096_v39 }
  0xa6   : > { %1784 = vmatmul.mubr.msk.bf16.vlgmr.msra.gmra.mrb[0].mxu1 %vm260_vm2, %v2082_v32 }
  0xa7   : > { %1911 = vmatpush3.bf16.msra.mxu1 %v2156_v3  ;;  %430 = vmatprep.mubr.bf16.mxu1 %v2103_v0 }
  0xa8   : > { %1916 = vmatprep.subr.bf16.mxu1 %v2176_v11  ;;  %v1245_v44 = vpop.permute.xlu1 %1244  ;;  %v1243_v46 = vpop.permute.xlu0 %1242 }
  0xa9   : > { %v1248_v47 = vsel %vm1246_vm7, %v1243_v46, %v1245_v44 }
  0xaa   : > { %1805 = vmatmul.mubr.msk.bf16.gmra.mrb[4].mxu0 %vm260_vm2, %v2083_v33 }
  0xab   : > { %849 = vmatprep.mubr.bf16.mxu0 %v2103_v0 }
  0xac   : > { %v1241_v49 = vpop.permute.xlu0 %1240  ;;  %v1390_v53 = vpop.permute.xlu1 %1389 }
  0xad   : > { %v1247_v52 = vsel %vm1246_vm7, %v1241_v49, %v1243_v46 }
  0xae   : > { %1785 = vmatmul.mubr.msk.bf16.gmra.mrb[4].mxu1 %vm260_vm2, %v2084_v34 }
  0xaf   : > { %1912 = vmatprep.mubr.msk.bf16.mxu1 %vm260_vm2, %v2082_v32 }
  0xb0   : > { %v1392_v51 = vpop.permute.xlu0 %1391  ;;  %v1388_v56 = vpop.permute.xlu1 %1387 }
  0xb1   : > { %v1395_v54 = vsel %vm1393_vm8, %v1390_v53, %v1392_v51  ;;  %v1394_v58 = vsel %vm1393_vm8, %v1388_v56, %v1390_v53 }
  0xb2   : > { %1814 = vmatmul.mubr.msk.bf16.vlgmr.msra.gmra.mrb[0].mxu0 %vm260_vm2, %v2085_v36 }
  0xb3   : > { %859 = vmatprep.mubr.bf16.mxu0 %v2103_v0  ;;  %965 = vmatpush1.bf16.msra.mxu0 %v953_v38 }
  0xb4   : > { %1111 = vmatprep.subr.bf16.mxu0 %v1101_v40 }
  0xb6   : > { %1913 = vmatmul.mubr.msk.bf16.vlgmr.msra.gmra.mrb[8].mxu1 %vm260_vm2, %v2084_v34 }
  0xb7   : > { %1917 = vmatpush3.bf16.msra.mxu1 %v2176_v11  ;;  %1918 = vmatprep.mubr.msk.bf16.mxu1 %vm260_vm2, %v2183_v15  ;;  %v1573_v11 = vrot.slane %v2325_v9, %v1572_v8 }
  0xb8   : > { %1922 = vmatprep.subr.bf16.mxu1 %v2186_v17 }
  0xba   : > { %1815 = vmatmul.mubr.msk.bf16.gmra.mrb[4].mxu0 %vm260_vm2, %v2086_v41 }
  0xbb   : > { %996 = vmatprep.mubr.bf16.mxu0 %v2103_v0 }
  0xc2   : > { %1919 = vmatmul.mubr.msk.bf16.vlgmr.msra.gmra.mrb[8].mxu1 %vm260_vm2, %v2080_v23  ;;  %1824 = vmatmul.mubr.msk.bf16.vlgmr.msra.gmra.mrb[0].mxu0 %vm260_vm2, %v2087_v43 }
  0xc3   : > { %1923 = vmatpush3.bf16.msra.mxu1 %v2186_v17  ;;  %1006 = vmatprep.mubr.bf16.mxu0 %v2103_v0 }
  0xc4   : > { %1928 = vmatprep.subr.bf16.mxu1 %v2200_v24  ;;  %1112 = vmatpush1.bf16.msra.mxu0 %v1100_v45 }
  0xc5   : > { %1924 = vmatprep.mubr.msk.bf16.mxu1 %vm260_vm2, %v2081_v27  ;;  %1258 = vmatprep.subr.bf16.mxu0 %v1248_v47 }
  0xca   : > { %1825 = vmatmul.mubr.msk.bf16.gmra.mrb[4].mxu0 %vm260_vm2, %v2088_v48 }
  0xcb   : > { %1143 = vmatprep.mubr.bf16.mxu0 %v2103_v0 }
  0xce   : > { %1925 = vmatmul.mubr.msk.bf16.vlgmr.msra.gmra.mrb[8].mxu1 %vm260_vm2, %v2083_v33 }
  0xcf   : > { %1929 = vmatpush3.bf16.msra.mxu1 %v2200_v24  ;;  %1930 = vmatprep.mubr.msk.bf16.mxu1 %vm260_vm2, %v2085_v36 }
  0xd0   : > { %1934 = vmatprep.subr.bf16.mxu1 %v2209_v28 }
  0xd2   : > { %1834 = vmatmul.mubr.msk.bf16.vlgmr.msra.gmra.mrb[0].mxu0 %vm260_vm2, %v2089_v50 }
  0xd3   : > { %1153 = vmatprep.mubr.bf16.mxu0 %v2103_v0  ;;  %1259 = vmatpush1.bf16.msra.mxu0 %v1247_v52 }
  0xd4   : > { %1405 = vmatprep.subr.bf16.mxu0 %v1395_v54 }
  0xda   : > { %1931 = vmatmul.mubr.msk.bf16.vlgmr.msra.gmra.mrb[8].mxu1 %vm260_vm2, %v2086_v41  ;;  %1835 = vmatmul.mubr.msk.bf16.gmra.mrb[4].mxu0 %vm260_vm2, %v2090_v55 }
  0xdb   : > { %1935 = vmatpush3.bf16.msra.mxu1 %v2209_v28  ;;  %1290 = vmatprep.mubr.bf16.mxu0 %v2103_v0 }
  0xdc   : > { %1940 = vmatprep.subr.bf16.mxu1 %v2237_v37  ;;  %1936 = vmatprep.mubr.msk.bf16.mxu1 %vm260_vm2, %v2087_v43 }
  0xe2   : > { %1844 = vmatmul.mubr.msk.bf16.vlgmr.msra.gmra.mrb[0].mxu0 %vm260_vm2, %v2091_v57 }
  0xe3   : > { %1300 = vmatprep.mubr.bf16.mxu0 %v2103_v0  ;;  %1406 = vmatpush1.bf16.msra.mxu0 %v1394_v58 }
  0xe6   : > { %1937 = vmatmul.mubr.msk.bf16.vlgmr.msra.gmra.mrb[8].mxu1 %vm260_vm2, %v2088_v48 }
  0xe7   : > { %1941 = vmatpush3.bf16.msra.mxu1 %v2237_v37  ;;  %1942 = vmatprep.mubr.msk.bf16.mxu1 %vm260_vm2, %v2089_v50 }
  0xe8   : > { %1946 = vmatprep.subr.bf16.mxu1 %v1245_v44 }
  0xea   : > { %1845 = vmatmul.mubr.msk.bf16.gmra.mrb[4].mxu0 %vm260_vm2, %v2092_v59 }
  0xeb   : > { %1437 = vmatprep.mubr.bf16.mxu0 %v2103_v0 }
  0xf2   : > { %1943 = vmatmul.mubr.msk.bf16.vlgmr.msra.gmra.mrb[8].mxu1 %vm260_vm2, %v2090_v55  ;;  %1854 = vmatmul.mubr.msk.bf16.vlgmr.msra.gmra.mrb[0].mxu0 %vm260_vm2, %v2093_v60 }
  0xf3   : > { %1947 = vmatpush3.bf16.msra.mxu1 %v1245_v44  ;;  %1447 = vmatprep.mubr.bf16.mxu0 %v2103_v0 }
  0xf4   : > { %1952 = vmatprep.subr.bf16.mxu1 %v1392_v51  ;;  %1948 = vmatprep.mubr.msk.bf16.mxu1 %vm260_vm2, %v2091_v57 }
  0xfa   : > { %1855 = vmatmul.mubr.msk.bf16.gmra.mrb[4].mxu0 %vm260_vm2, %v2094_v61 }
  0xfe   : > { %1949 = vmatmul.mubr.msk.bf16.vlgmr.msra.gmra.mrb[8].mxu1 %vm260_vm2, %v2092_v59 }
  0xff   : > { %1953 = vmatpush3.bf16.msra.mxu1 %v1392_v51  ;;  %1954 = vmatprep.mubr.msk.bf16.mxu1 %vm260_vm2, %v2093_v60 }
 0x10a   : > { %1955 = vmatmul.mubr.msk.bf16.vlgmr.msra.gmra.mrb[8].mxu1 %vm260_vm2, %v2094_v61 }
 0x179   : > { %v422_v62 = vpop.f32.mrb[0].mxu1 }
 0x17a   : > { %v424_v63 = vpop.f32.mrb[1].mxu1 }
 0x17b   : > { %v426_v0 = vpop.f32.mrb[2].mxu1 }
 0x17c   : > { %v428_v1 = vpop.f32.mrb[3].mxu1 }
 0x181   : > { %v432_v2 = vpop.f32.mrb[4].mxu1 }
 0x182   : > { %v434_v3 = vpop.f32.mrb[5].mxu1 }
 0x183   : > { %v436_v4 = vpop.f32.mrb[6].mxu1 }
 0x184   : > { %v438_v5 = vpop.f32.mrb[7].mxu1 }
 0x1c5   : > { %v1439_v12 = vpop.f32.mrb[0].mxu0 }
 0x1c6   : > { %v1958_v14 = vadd.f32 %v1439_v12, %v422_v62  ;;  %v1441_v15 = vpop.f32.mrb[1].mxu0 }
 0x1c7   : > { %v1959_v16 = vadd.f32 %v1441_v15, %v424_v63  ;;  %v1443_v17 = vpop.f32.mrb[2].mxu0  ;;  %v1580_v63 = vsub.s32 2, %v2319_v7 }
 0x1c8   : > { %v1585_v18 = vmul.f32 %v1958_v14, %v1573_v11  ;;  %v1618_v19 = vmul.f32 %v1958_v14, %v1958_v14  ;;  %v1960_v20 = vadd.f32 %v1443_v17, %v426_v0  ;;  %v1445_v21 = vpop.f32.mrb[3].mxu0 }
 0x1c9   : > { %v1869_v22 = vpack.c.bf16 %v1959_v16, %v1958_v14  ;;  %v1586_v23 = vmul.f32 %v1959_v16, %v1577_v13  ;;  %v1619_v24 = vmul.f32 %v1959_v16, %v1959_v16  ;;  %v1961_v25 = vadd.f32 %v1445_v21, %v428_v1 }
 0x1ca   : > { %v1588_v26 = vmul.f32 %v1960_v20, %v1573_v11  ;;  %v1621_v27 = vmul.f32 %v1960_v20, %v1960_v20  ;;  %v1630_v28 = vmul.f32 %v1618_v19, %v1573_v11 }
 0x1cb   : > { %1559 = vst [vmem:[%s2334_s22] sm:$0xff] %v1869_v22  ;;  %v1871_v29 = vpack.c.bf16 %v1961_v25, %v1960_v20  ;;  %v1589_v30 = vmul.f32 %v1961_v25, %v1577_v13  ;;  %v1622_v31 = vmul.f32 %v1961_v25, %v1961_v25  ;;  %v2337_v32 = vadd.f32 %v1586_v23, %v1585_v18 }
 0x1cc   : > { %v1631_v33 = vmul.f32 %v1619_v24, %v1577_v13  ;;  %v1633_v34 = vmul.f32 %v1621_v27, %v1573_v11 }
 0x1cd   : > { %1562 = vst [vmem:[%s2334_s22 + $0xc] sm:$0xff] %v1871_v29  ;;  %v1449_v35 = vpop.f32.mrb[4].mxu0  ;;  %v2340_v36 = vadd.f32 %v1589_v30, %v1588_v26  ;;  %v1634_v37 = vmul.f32 %v1622_v31, %v1577_v13 }
 0x1ce   : > { %v1962_v38 = vadd.f32 %v1449_v35, %v432_v2  ;;  %v1451_v39 = vpop.f32.mrb[5].mxu0  ;;  %v2342_v40 = vadd.f32 %v1631_v33, %v1630_v28  ;;  %v1581_v2 = vrot.slane %v2325_v9, %v1580_v63 }
 0x1cf   : > { %v1963_v41 = vadd.f32 %v1451_v39, %v434_v3  ;;  %v1453_v42 = vpop.f32.mrb[6].mxu0  ;;  %v2344_v43 = vadd.f32 %v1634_v37, %v1633_v34 }
 0x1d0   : > { %v1591_v44 = vmul.f32 %v1962_v38, %v1573_v11  ;;  %v1624_v45 = vmul.f32 %v1962_v38, %v1962_v38  ;;  %v1964_v46 = vadd.f32 %v1453_v42, %v436_v4  ;;  %v1455_v47 = vpop.f32.mrb[7].mxu0 }
 0x1d1   : > { %v1873_v48 = vpack.c.bf16 %v1963_v41, %v1962_v38  ;;  %v1592_v49 = vmul.f32 %v1963_v41, %v1577_v13  ;;  %v1625_v50 = vmul.f32 %v1963_v41, %v1963_v41  ;;  %v1965_v51 = vadd.f32 %v1455_v47, %v438_v5 }
 0x1d2   : > { %v1594_v52 = vmul.f32 %v1964_v46, %v1573_v11  ;;  %v1627_v53 = vmul.f32 %v1964_v46, %v1964_v46  ;;  %v1636_v54 = vmul.f32 %v1624_v45, %v1573_v11 }
 0x1d3   : > { %1564 = vst [vmem:[%s2334_s22 + $0x18] sm:$0xff] %v1873_v48  ;;  %v1875_v55 = vpack.c.bf16 %v1965_v51, %v1964_v46  ;;  %v1595_v56 = vmul.f32 %v1965_v51, %v1577_v13  ;;  %v1628_v57 = vmul.f32 %v1965_v51, %v1965_v51  ;;  %v1608_v58 = vadd.f32 %v1592_v49, %v1591_v44 }
 0x1d4   : > { %v1637_v59 = vmul.f32 %v1625_v50, %v1577_v13  ;;  %v1639_v60 = vmul.f32 %v1627_v53, %v1573_v11 }
 0x1d5   : > { %1566 = vst [vmem:[%s2334_s22 + $0x24] sm:$0xff] %v1875_v55  ;;  %v1613_v61 = vadd.f32 %v1595_v56, %v1594_v52  ;;  %v1640_v62 = vmul.f32 %v1628_v57, %v1577_v13 }
 0x1d6   : > { %v1652_v0 = vadd.f32 %v1637_v59, %v1636_v54 }
 0x1d7   : > { %v1657_v1 = vadd.f32 %v1640_v62, %v1639_v60 }
 0x1dd   : > { %v1956_v3 = vpop.f32.mrb[8].mxu1 }
 0x1de   : > { %v1874_v4 = vpack.c.bf16 %v1956_v3, %v1956_v3  ;;  %v1593_v5 = vmul.f32 %v1956_v3, %v1581_v2  ;;  %v1626_v6 = vmul.f32 %v1956_v3, %v1956_v3  ;;  %v1492_v8 = vpop.f32.mrb[9].mxu1 }
 0x1df   : > { %v1870_v10 = vpack.c.bf16 %v1492_v8, %v1492_v8  ;;  %v1587_v11 = vmul.f32 %v1581_v2, %v1492_v8  ;;  %v1620_v12 = vmul.f32 %v1492_v8, %v1492_v8  ;;  %v1957_v13 = vpop.f32.mrb[10].mxu1 }
 0x1e0   : > { %1565 = vst.msk [vmem:[%s2334_s22 + $0x20] sm:$0xf] %vm1560_vm9, %v1874_v4  ;;  %v1876_v7 = vpack.c.bf16 %v1957_v13, %v1957_v13  ;;  %v1596_v14 = vmul.f32 %v1957_v13, %v1581_v2  ;;  %v1629_v15 = vmul.f32 %v1957_v13, %v1957_v13  ;;  %v1495_v9 = vpop.f32.mrb[11].mxu1  ;;  %v1609_v16 = vsel %vm1598_vm10, %v1593_v5, 0.0 }
 0x1e1   : > { %1561 = vst.msk [vmem:[%s2334_s22 + $0x8] sm:$0xf] %vm1560_vm9, %v1870_v10  ;;  %v1872_v17 = vpack.c.bf16 %v1495_v9, %v1495_v9  ;;  %v1590_v18 = vmul.f32 %v1581_v2, %v1495_v9  ;;  %v1623_v19 = vmul.f32 %v1495_v9, %v1495_v9  ;;  %v1610_v20 = vadd.f32 %v1609_v16, %v1608_v58 }
 0x1e2   : > { %1567 = vst.msk [vmem:[%s2334_s22 + $0x2c] sm:$0xf] %vm1560_vm9, %v1876_v7  ;;  %v1599_v21 = vsel %vm1598_vm10, %v1587_v11, 0.0  ;;  %v1632_v22 = vmul.f32 %v1620_v12, %v1581_v2  ;;  %v1614_v23 = vsel %vm1598_vm10, %v1596_v14, 0.0  ;;  %v1638_v24 = vmul.f32 %v1626_v6, %v1581_v2 }
 0x1e3   : > { %1563 = vst.msk [vmem:[%s2334_s22 + $0x14] sm:$0xf] %vm1560_vm9, %v1872_v17  ;;  %v1635_v25 = vmul.f32 %v1623_v19, %v1581_v2  ;;  %1611 = vadd.xlane.f32.xlu0 %v1610_v20  ;;  %v1604_v26 = vsel %vm1598_vm10, %v1590_v18, 0.0  ;;  %v1600_v27 = vadd.f32 %v1599_v21, %v2337_v32  ;;  %v1615_v28 = vadd.f32 %v1614_v23, %v1613_v61 }
 0x1e4   : > { %v1605_v29 = vadd.f32 %v1604_v26, %v2340_v36  ;;  %v1643_v30 = vsel %vm1598_vm10, %v1632_v22, 0.0  ;;  %v1653_v31 = vsel %vm1598_vm10, %v1638_v24, 0.0  ;;  %v1641_v33 = vmul.f32 %v1629_v15, %v1581_v2 }
 0x1e5   : > { %v1644_v34 = vadd.f32 %v1643_v30, %v2342_v40  ;;  %v1654_v35 = vadd.f32 %v1653_v31, %v1652_v0  ;;  %v1648_v37 = vsel %vm1598_vm10, %v1635_v25, 0.0 }
 0x1e6   : > { %1606 = vadd.xlane.f32.xlu1 %v1605_v29  ;;  %v1649_v38 = vadd.f32 %v1648_v37, %v2344_v43  ;;  %v1658_v39 = vsel %vm1598_vm10, %v1641_v33, 0.0 }
 0x1e7   : > { %1601 = vadd.xlane.f32.xlu0 %v1600_v27  ;;  %v1659_v32 = vadd.f32 %v1658_v39, %v1657_v1 }
 0x1ea   : > { %1645 = vadd.xlane.f32.xlu1 %v1644_v34 }
 0x1eb   : > { %1616 = vadd.xlane.f32.xlu0 %v1615_v28 }
 0x1ee   : > { %1655 = vadd.xlane.f32.xlu1 %v1654_v35 }
 0x1ef   : > { %1650 = vadd.xlane.f32.xlu0 %v1649_v38 }
 0x1f3   : > { %1660 = vadd.xlane.f32.xlu0 %v1659_v32 }
 0x270   : > { %v1612_v36 = vpop.xlane.xlu0 %1611 }
 0x273   : > { %v1607_v41 = vpop.xlane.xlu1 %1606 }
 0x274   : > { %v1602_v42 = vpop.xlane.xlu0 %1601 }
 0x277   : > { %v1646_v40 = vpop.xlane.xlu1 %1645 }
 0x278   : > { %v1663_v43 = vsel %vm1662_vm11, %v1602_v42, %v1646_v40  ;;  %v1617_v44 = vpop.xlane.xlu0 %1616 }
 0x279   : > { %1668 = vst.msk [vmem:[%s210_s26] sm:$0xff] %vm1667_vm12, %v1663_v43 }
 0x27b   : > { %v1656_v45 = vpop.xlane.xlu1 %1655 }
 0x27c   : > { %v1665_v46 = vsel %vm1662_vm11, %v1612_v36, %v1656_v45  ;;  %v1651_v47 = vpop.xlane.xlu0 %1650 }
 0x27d   : > { %1670 = vst.msk [vmem:[%s210_s26 + $0x10] sm:$0xff] %vm1667_vm12, %v1665_v46  ;;  %v1664_v48 = vsel %vm1662_vm11, %v1607_v41, %v1651_v47 }
 0x27e   : > { %1669 = vst.msk [vmem:[%s210_s26 + $0x8] sm:$0xff] %vm1667_vm12, %v1664_v48 }
 0x280   : > { %v1661_v49 = vpop.xlane.xlu0 %1660 }
 0x281   : > { %v1666_v50 = vsel %vm1662_vm11, %v1617_v44, %v1661_v49 }
 0x282   : > { %1671 = vst.msk [vmem:[%s210_s26 + $0x18] sm:$0xff] %vm1667_vm12, %v1666_v50 }
 0x283 PF: > { %s15_s15 = sadd.s32 1, %s2101_s15  }
 0x284   : > { %p12_p4 = scmp.ge.s32.totalorder %s15_s15, 4  }
 0x286   :  { %14 = sbr.rel (!%p12_p4) target bundleno = 1 (0x1), region = 82 }

// kernel: netg_forward.9
= control target key start
LH: loop header
LB: loop body
LE: loop exit
PB: predicated region body
PF: predicated region fallthrough
CT: control target
= control target key end

     0   :  { %s3427_s12 = smov 0   ;;  %s4093_s0 = inlined_call_operand.vmem [shape: bf16[2,8,1280], index: 0, kind: input, shape index: {}]   ;;  %s4094_s1 = inlined_call_operand.vmem [shape: bf16[9,12,8], index: 1, kind: input, shape index: {}]   ;;  %s4095_s2 = inlined_call_operand.vmem [shape: f32[12,1], index: 2, kind: input, shape index: {}]   ;;  %s4096_s3 = inlined_call_operand.vmem [shape: f32[2,12,1156], index: 3, kind: output, shape index: {}]  }
   0x1 LB: > { %s3016_s13 = sadd.s32 4294967295, %s3396_s12   ;;  %p3020_p0 = scmp.ge.s32.totalorder %s3396_s12, 1  ;;  %s3396_s12 = sphi %s3427_s12, %s13_s12  }
   0x2   : > { %p137_p1 = scmp.lt.s32.totalorder %s3396_s12, 3 }
   0x4   : > { %p138_p2 = pnand %p3020_p0, %p137_p1 }
   0x5   : > { %p161_p3 = scmp.lt.s32.totalorder (!%p138_p2), %s3016_s13, 1  ;;  %v3398_v0 = vmov (!%p138_p2), 0   ;;  %vm246_vm0 = vcmask (!%p138_p2), 1043456   ;;  %s3399_s18 = smov (!%p138_p2), 127   ;;  %v3476_v13 = vld [vmem:[%s4094_s1] sm:$0x3f] (!%p138_p2)  }
   0x6   : > { %141 = sbr.rel (%p138_p2) target bundleno = 548 (0x224), region = 32  ;;  %648 = vmatprep.mubr.bf16.mxu0 (!%p138_p2), %v3398_v0  ;;  %309 = vmatprep.mubr.bf16.mxu1 (!%p138_p2), %v3398_v0  ;;  %vm242_vm1 = vcmask (!%p138_p2), 64512   ;;  %s3400_s21 = smov (!%p138_p2), 126   ;;  %vm232_vm2 = vcmask (!%p138_p2), 1039360   ;;  %vm773_vm3 = vcmask (!%p138_p2), 1031168   ;;  %vm1079_vm4 = vcmask (!%p138_p2), 769024  }
   0x7   : > { %3329 = vset.pattern.permute.xlu0 (!%p138_p2), %v3398_v0  ;;  %3330 = vset.pattern.permute.xlu1 (!%p138_p2), %v3398_v0  ;;  %s3401_s22 = smov (!%p138_p2), 94   ;;  %s3402_s23 = smov (!%p138_p2), 93   ;;  %v3592_v26 = vld [vmem:[%s4094_s1 + $0x8] sm:$0x3f] (!%p138_p2)   ;;  %v3610_v32 = vld [vmem:[%s4094_s1 + $0x10] sm:$0x3f] (!%p138_p2)  }
   0x8   : > { %s3403_s24 = smov (!%p138_p2), 92   ;;  %s3404_s25 = smov (!%p138_p2), 60   ;;  %vm1385_vm5 = vcmask (!%p138_p2), 760832   ;;  %vm1691_vm6 = vcmask (!%p138_p2), 752640   ;;  %vm1997_vm7 = vcmask (!%p138_p2), 490496   ;;  %vm2303_vm8 = vcmask (!%p138_p2), 482304  }
   0x9   : > { %s3405_s26 = smov (!%p138_p2), 59   ;;  %s3406_s4 = smov (!%p138_p2), 58   ;;  %vm2609_vm9 = vcmask (!%p138_p2), 474112   ;;  %vm2948_vm10 = vcmask (!%p138_p2), 31744   ;;  %vm2959_vm11 = vcmask (!%p138_p2), 27648  }
   0xd   : > { %s4098_s13 = smov (!%p161_p3, %s3016_s13), 1 }
   0xe   : > { %s3310_s14 = smul.u32 40, %s4098_s13 }
  0x10   : > { %s3445_s17 = scalar_lea.vmem %s4093_s0, %s3310_s14 }
  0x11   : > { %v175_v1 = vld [vmem:[%s3445_s17 + $0x8] sm:$0xff]  ;;  %v174_v2 = vld [vmem:[%s3445_s17] sm:$0xff]  ;;  %v176_v3 = vld [vmem:[%s3445_s17 + $0x10] sm:$0xff] }
  0x12   : > { %v3450_v4 = vcombine.low %v175_v1, %v175_v1  ;;  %v3452_v5 = vcombine.low %v174_v2, %v174_v2  ;;  %v3454_v6 = vcombine.low %v176_v3, %v176_v3  ;;  %v178_v7 = vld [vmem:[%s3445_s17 + $0x20] sm:$0xff]  ;;  %v3457_v8 = vcombine.high %v176_v3, %v176_v3  ;;  %v177_v16 = vld [vmem:[%s3445_s17 + $0x18] sm:$0xff] }
  0x13   : > { %v3463_v9 = vcombine.high %v174_v2, %v174_v2  ;;  %v3467_v11 = vcombine.low %v178_v7, %v178_v7  ;;  %v3469_v12 = vcombine.high %v178_v7, %v178_v7  ;;  %v3493_v15 = vcombine.high %v175_v1, %v175_v1  ;;  %v3692_v1 = vld [vmem:[%s4094_s1 + $0x18] sm:$0x3f]  }
  0x14   : > { %216 = vrot.lane.b32.xlu1 %v3450_v4, %s3399_s18  ;;  %212 = vrot.lane.b32.xlu0 %v3452_v5, %s3399_s18  ;;  %v513_v10 = vsel %vm246_vm0, %v3454_v6, 0  ;;  %v3507_v17 = vcombine.low %v177_v16, %v177_v16  ;;  %v3517_v18 = vcombine.high %v177_v16, %v177_v16 }
  0x15   : > { %3051 = vmatprep.subr.msk.bf16.mxu0 %vm246_vm0, %v3457_v8  ;;  %v525_v14 = vsel %vm246_vm0, %v3467_v11, 0 }
  0x16   : > { %617 = vmatpush1.bf16.msra.mxu0 %v513_v10 }
  0x17   : > { %3055 = vmatprep.subr.msk.bf16.mxu0 %vm246_vm0, %v3469_v12 }
  0x18   : > { %753 = vrot.lane.b32.xlu1 %v3452_v5, %s3400_s21  ;;  %214 = vrot.lane.b32.xlu0 %v3463_v9, %s3399_s18 }
  0x19   : > { %3052 = vmatmul.mubr.msk.bf16.vlgmr.msra.gmra.mrb[0].mxu0 %vm242_vm1, %v3476_v13 }
  0x1a   : > { %703 = vmatpush1.bf16.msra.mxu0 %v525_v14  ;;  %734 = vmatprep.mubr.bf16.mxu0 %v3398_v0 }
  0x1c   : > { %757 = vrot.lane.b32.xlu1 %v3450_v4, %s3400_s21  ;;  %755 = vrot.lane.b32.xlu0 %v3463_v9, %s3400_s21 }
  0x20   : > { %220 = vrot.lane.b32.xlu1 %v3454_v6, %s3399_s18  ;;  %218 = vrot.lane.b32.xlu0 %v3493_v15, %s3399_s18 }
  0x21   : > { %3056 = vmatmul.mubr.msk.bf16.vlgmr.msra.gmra.mrb[4].mxu0 %vm242_vm1, %v3476_v13 }
  0x22   : > { %848 = vmatprep.mubr.bf16.mxu0 %v3398_v0 }
  0x24   : > { %763 = vrot.lane.b32.xlu1 %v3457_v8, %s3400_s21  ;;  %761 = vrot.lane.b32.xlu0 %v3454_v6, %s3400_s21 }
  0x28   : > { %222 = vrot.lane.b32.xlu1 %v3457_v8, %s3399_s18  ;;  %765 = vrot.lane.b32.xlu0 %v3507_v17, %s3400_s21 }
  0x2c   : > { %769 = vrot.lane.b32.xlu1 %v3467_v11, %s3400_s21  ;;  %224 = vrot.lane.b32.xlu0 %v3507_v17, %s3399_s18 }
  0x30   : > { %226 = vrot.lane.b32.xlu1 %v3517_v18, %s3399_s18  ;;  %771 = vrot.lane.b32.xlu0 %v3469_v12, %s3400_s21 }
  0x34   : > { %1059 = vrot.lane.b32.xlu1 %v3452_v5, %s3401_s22  ;;  %228 = vrot.lane.b32.xlu0 %v3467_v11, %s3399_s18 }
  0x38   : > { %1063 = vrot.lane.b32.xlu1 %v3450_v4, %s3401_s22  ;;  %1061 = vrot.lane.b32.xlu0 %v3463_v9, %s3401_s22 }
  0x3c   : > { %1067 = vrot.lane.b32.xlu1 %v3454_v6, %s3401_s22  ;;  %230 = vrot.lane.b32.xlu0 %v3469_v12, %s3399_s18 }
  0x40   : > { %1071 = vrot.lane.b32.xlu1 %v3507_v17, %s3401_s22  ;;  %1069 = vrot.lane.b32.xlu0 %v3457_v8, %s3401_s22 }
  0x44   : > { %1077 = vrot.lane.b32.xlu1 %v3469_v12, %s3401_s22  ;;  %1075 = vrot.lane.b32.xlu0 %v3467_v11, %s3401_s22 }
  0x48   : > { %1367 = vrot.lane.b32.xlu1 %v3463_v9, %s3402_s23  ;;  %1365 = vrot.lane.b32.xlu0 %v3452_v5, %s3402_s23 }
  0x4c   : > { %1373 = vrot.lane.b32.xlu1 %v3454_v6, %s3402_s23  ;;  %1369 = vrot.lane.b32.xlu0 %v3450_v4, %s3402_s23 }
  0x50   : > { %1377 = vrot.lane.b32.xlu1 %v3507_v17, %s3402_s23  ;;  %1375 = vrot.lane.b32.xlu0 %v3457_v8, %s3402_s23 }
  0x54   : > { %1381 = vrot.lane.b32.xlu1 %v3467_v11, %s3402_s23  ;;  %759 = vrot.lane.b32.xlu0 %v3493_v15, %s3400_s21 }
  0x58   : > { %767 = vrot.lane.b32.xlu1 %v3517_v18, %s3400_s21  ;;  %1383 = vrot.lane.b32.xlu0 %v3469_v12, %s3402_s23 }
  0x5c   : > { %1673 = vrot.lane.b32.xlu1 %v3463_v9, %s3403_s24  ;;  %1671 = vrot.lane.b32.xlu0 %v3452_v5, %s3403_s24 }
  0x60   : > { %1065 = vrot.lane.b32.xlu1 %v3493_v15, %s3401_s22  ;;  %1675 = vrot.lane.b32.xlu0 %v3450_v4, %s3403_s24 }
  0x64   : > { %1681 = vrot.lane.b32.xlu1 %v3457_v8, %s3403_s24  ;;  %1679 = vrot.lane.b32.xlu0 %v3454_v6, %s3403_s24 }
  0x68   : > { %1073 = vrot.lane.b32.xlu1 %v3517_v18, %s3401_s22  ;;  %1683 = vrot.lane.b32.xlu0 %v3507_v17, %s3403_s24 }
  0x6c   : > { %1689 = vrot.lane.b32.xlu1 %v3469_v12, %s3403_s24  ;;  %1687 = vrot.lane.b32.xlu0 %v3467_v11, %s3403_s24 }
  0x70   : > { %1977 = vrot.lane.b32.xlu1 %v3452_v5, %s3404_s25  ;;  %1371 = vrot.lane.b32.xlu0 %v3493_v15, %s3402_s23 }
  0x74   : > { %1981 = vrot.lane.b32.xlu1 %v3450_v4, %s3404_s25  ;;  %1979 = vrot.lane.b32.xlu0 %v3463_v9, %s3404_s25 }
  0x78   : > { %1985 = vrot.lane.b32.xlu1 %v3454_v6, %s3404_s25  ;;  %1379 = vrot.lane.b32.xlu0 %v3517_v18, %s3402_s23  ;;  %s3311_s23 = smul.u32 160, %s4098_s13 }
  0x7c   : > { %1989 = vrot.lane.b32.xlu1 %v3507_v17, %s3404_s25  ;;  %1987 = vrot.lane.b32.xlu0 %v3457_v8, %s3404_s25 }
  0x80   : > { %1993 = vrot.lane.b32.xlu1 %v3467_v11, %s3404_s25  ;;  %1677 = vrot.lane.b32.xlu0 %v3493_v15, %s3403_s24 }
  0x84   : > { %1685 = vrot.lane.b32.xlu1 %v3517_v18, %s3403_s24  ;;  %1995 = vrot.lane.b32.xlu0 %v3469_v12, %s3404_s25 }
  0x86   : > { %v217_v19 = vpop.permute.xlu1 %216  ;;  %v213_v20 = vpop.permute.xlu0 %212 }
  0x88   : > { %2285 = vrot.lane.b32.xlu1 %v3463_v9, %s3405_s26  ;;  %2283 = vrot.lane.b32.xlu0 %v3452_v5, %s3405_s26 }
  0x8a   : > { %v754_v21 = vpop.permute.xlu1 %753  ;;  %v215_v22 = vpop.permute.xlu0 %214 }
  0x8b   : > { %v234_v23 = vsel %vm232_vm2, %v215_v22, %v217_v19  ;;  %v233_v24 = vsel %vm232_vm2, %v213_v20, %v215_v22 }
  0x8c   : > { %1983 = vrot.lane.b32.xlu1 %v3493_v15, %s3404_s25  ;;  %2287 = vrot.lane.b32.xlu0 %v3450_v4, %s3405_s26  ;;  %v248_v25 = vsel %vm246_vm0, %v233_v24, 0 }
  0x8d   : > { %3036 = vmatprep.subr.msk.bf16.mxu1 %vm246_vm0, %v234_v23  ;;  %v507_v23 = vsel %vm246_vm0, %v3450_v4, 0 }
  0x8e   : > { %278 = vmatpush1.bf16.msra.mxu1 %v248_v25  ;;  %v3594_v27 = vpop.permute.xlu1 %757  ;;  %v756_v28 = vpop.permute.xlu0 %755 }
  0x8f   : > { %v774_v29 = vsel %vm773_vm3, %v754_v21, %v756_v28  ;;  %v775_v30 = vsel %vm773_vm3, %v756_v28, %v3594_v27 }
  0x90   : > { %v787_v31 = vsel %vm246_vm0, %v774_v29, 0  ;;  %2293 = vrot.lane.b32.xlu1 %v3457_v8, %s3405_s26  ;;  %2291 = vrot.lane.b32.xlu0 %v3454_v6, %s3405_s26 }
  0x91   : > { %3060 = vmatprep.subr.msk.bf16.mxu0 %vm246_vm0, %v775_v30  ;;  %3037 = vmatmul.mubr.msk.bf16.vlgmr.msra.gmra.mrb[0].mxu1 %vm242_vm1, %v3592_v26  ;;  %v519_v30 = vsel %vm246_vm0, %v3507_v17, 0 }
  0x92   : > { %817 = vmatpush1.bf16.msra.mxu0 %v787_v31  ;;  %v221_v33 = vpop.permute.xlu1 %220  ;;  %v219_v34 = vpop.permute.xlu0 %218  ;;  %352 = vmatprep.mubr.bf16.mxu1 %v3398_v0 }
  0x93   : > { %v235_v35 = vsel %vm232_vm2, %v217_v19, %v219_v34  ;;  %v236_v36 = vsel %vm232_vm2, %v219_v34, %v221_v33 }
  0x94   : > { %v254_v37 = vsel %vm246_vm0, %v235_v35, 0  ;;  %1991 = vrot.lane.b32.xlu1 %v3517_v18, %s3404_s25  ;;  %2295 = vrot.lane.b32.xlu0 %v3507_v17, %s3405_s26 }
  0x95   : > { %3038 = vmatprep.subr.msk.bf16.mxu1 %vm246_vm0, %v236_v36  ;;  %3061 = vmatmul.mubr.msk.bf16.vlgmr.msra.gmra.mrb[8].mxu0 %vm242_vm1, %v3610_v32 }
  0x96   : > { %321 = vmatpush1.bf16.msra.mxu1 %v254_v37  ;;  %v764_v38 = vpop.permute.xlu1 %763  ;;  %v3623_v39 = vpop.permute.xlu0 %761  ;;  %934 = vmatprep.mubr.bf16.mxu0 %v3398_v0 }
  0x97   : > { %v778_v40 = vsel %vm773_vm3, %v3623_v39, %v764_v38 }
  0x98   : > { %2299 = vrot.lane.b32.xlu0 %v3467_v11, %s3405_s26  ;;  %2301 = vrot.lane.b32.xlu1 %v3469_v12, %s3405_s26  ;;  %v799_v44 = vsel %vm246_vm0, %v778_v40, 0 }
  0x99   : > { %3039 = vmatmul.mubr.msk.bf16.vlgmr.msra.gmra.mrb[4].mxu1 %vm242_vm1, %v3592_v26 }
  0x9a   : > { %v223_v41 = vpop.permute.xlu1 %222  ;;  %v3634_v42 = vpop.permute.xlu0 %765  ;;  %395 = vmatprep.mubr.bf16.mxu1 %v3398_v0 }
  0x9b   : > { %v779_v43 = vsel %vm773_vm3, %v764_v38, %v3634_v42  ;;  %v237_v45 = vsel %vm232_vm2, %v221_v33, %v223_v41  ;;  %v3770_v33 = vld [vmem:[%s4094_s1 + $0x20] sm:$0x3f]  }
  0x9c   : > { %2289 = vrot.lane.b32.xlu0 %v3493_v15, %s3405_s26  ;;  %3064 = vmatprep.subr.msk.bf16.mxu0 %vm246_vm0, %v779_v43  ;;  %v260_v49 = vsel %vm246_vm0, %v237_v45, 0 }
  0x9d   : > { %903 = vmatpush1.bf16.msra.mxu0 %v799_v44  ;;  %2589 = vrot.lane.b32.xlu1 %v3452_v5, %s3406_s4 }
  0x9e   : > { %v3646_v46 = vpop.permute.xlu1 %769  ;;  %v225_v47 = vpop.permute.xlu0 %224 }
  0x9f   : > { %v238_v48 = vsel %vm232_vm2, %v223_v41, %v225_v47 }
  0xa0   : > { %2591 = vrot.lane.b32.xlu0 %v3463_v9, %s3406_s4  ;;  %3040 = vmatprep.subr.msk.bf16.mxu1 %vm246_vm0, %v238_v48 }
  0xa1   : > { %3065 = vmatmul.mubr.msk.bf16.vlgmr.msra.gmra.mrb[0].mxu0 %vm242_vm1, %v3610_v32  ;;  %364 = vmatpush1.bf16.msra.mxu1 %v260_v49 }
  0xa2   : > { %v227_v50 = vpop.permute.xlu1 %226  ;;  %v772_v51 = vpop.permute.xlu0 %771  ;;  %1020 = vmatprep.mubr.bf16.mxu0 %v3398_v0  ;;  %2593 = vrot.lane.b32.xlu1 %v3450_v4, %s3406_s4 }
  0xa3   : > { %v782_v52 = vsel %vm773_vm3, %v3646_v46, %v772_v51  ;;  %3068 = vmatprep.subr.msk.bf16.mxu0 %vm246_vm0, %v772_v51  ;;  %v239_v54 = vsel %vm232_vm2, %v225_v47, %v227_v50 }
  0xa4   : > { %v811_v53 = vsel %vm246_vm0, %v782_v52, 0  ;;  %2297 = vrot.lane.b32.xlu0 %v3517_v18, %s3405_s26  ;;  %3041 = vmatmul.mubr.msk.bf16.vlgmr.msra.gmra.mrb[8].mxu1 %vm242_vm1, %v3592_v26  ;;  %v266_v58 = vsel %vm246_vm0, %v239_v54, 0  ;;  %s4051_s26 = scalar_lea.vmem %s4096_s3, %s3311_s23 }
  0xa5   : > { %989 = vmatpush1.bf16.msra.mxu0 %v811_v53  ;;  %438 = vmatprep.mubr.bf16.mxu1 %v3398_v0 }
  0xa6   : > { %v1060_v55 = vpop.permute.xlu1 %1059  ;;  %v229_v56 = vpop.permute.xlu0 %228  ;;  %2597 = vrot.lane.b32.xlu1 %v3454_v6, %s3406_s4 }
  0xa7   : > { %v240_v57 = vsel %vm232_vm2, %v227_v50, %v229_v56 }
  0xa8   : > { %3042 = vmatprep.subr.msk.bf16.mxu1 %vm246_vm0, %v240_v57  ;;  %2599 = vrot.lane.b32.xlu0 %v3457_v8, %s3406_s4 }
  0xa9   : > { %3069 = vmatmul.mubr.msk.bf16.vlgmr.msra.gmra.mrb[4].mxu0 %vm242_vm1, %v3610_v32  ;;  %407 = vmatpush1.bf16.msra.mxu1 %v266_v58 }
  0xaa   : > { %v3677_v59 = vpop.permute.xlu1 %1063  ;;  %v1062_v60 = vpop.permute.xlu0 %1061  ;;  %1154 = vmatprep.mubr.bf16.mxu0 %v3398_v0  ;;  %2601 = vrot.lane.b32.xlu1 %v3507_v17, %s3406_s4 }
  0xab   : > { %v1080_v61 = vsel %vm1079_vm4, %v1060_v55, %v1062_v60  ;;  %v1081_v62 = vsel %vm1079_vm4, %v1062_v60, %v3677_v59 }
  0xac   : > { %v1093_v63 = vsel %vm246_vm0, %v1080_v61, 0  ;;  %3043 = vmatmul.mubr.msk.bf16.vlgmr.msra.gmra.mrb[12].mxu1 %vm242_vm1, %v3592_v26  ;;  %3073 = vmatprep.subr.msk.bf16.mxu0 %vm246_vm0, %v1081_v62  ;;  %v3836_v61 = vld [vmem:[%s4094_s1 + $0x28] sm:$0x3f]  }
  0xad   : > { %1123 = vmatpush1.bf16.msra.mxu0 %v1093_v63  ;;  %2595 = vrot.lane.b32.xlu0 %v3493_v15, %s3406_s4 }
  0xae   : > { %v3696_v2 = vpop.permute.xlu1 %1067  ;;  %v231_v3 = vpop.permute.xlu0 %230  ;;  %481 = vmatprep.mubr.bf16.mxu1 %v3398_v0  ;;  %2605 = vrot.lane.b32.xlu1 %v3467_v11, %s3406_s4  ;;  %v501_v11 = vsel %vm246_vm0, %v3452_v5, 0 }
  0xaf   : > { %v241_v6 = vsel %vm232_vm2, %v229_v56, %v231_v3  ;;  %3044 = vmatprep.subr.msk.bf16.mxu1 %vm246_vm0, %v231_v3 }
  0xb0   : > { %v272_v7 = vsel %vm246_vm0, %v241_v6, 0 }
  0xb1   : > { %3074 = vmatmul.mubr.msk.bf16.vlgmr.msra.gmra.mrb[8].mxu0 %vm242_vm1, %v3692_v1  ;;  %450 = vmatpush1.bf16.msra.mxu1 %v272_v7 }
  0xb2   : > { %v3706_v8 = vpop.permute.xlu1 %1071  ;;  %v1070_v10 = vpop.permute.xlu0 %1069  ;;  %1240 = vmatprep.mubr.bf16.mxu0 %v3398_v0  ;;  %3047 = vmatprep.subr.msk.bf16.mxu1 %vm246_vm0, %v3463_v9 }
  0xb3   : > { %v1084_v14 = vsel %vm1079_vm4, %v3696_v2, %v1070_v10  ;;  %v1085_v16 = vsel %vm1079_vm4, %v1070_v10, %v3706_v8  ;;  %2603 = vrot.lane.b32.xlu1 %v3517_v18, %s3406_s4  ;;  %2607 = vrot.lane.b32.xlu0 %v3469_v12, %s3406_s4 }
  0xb4   : > { %v1105_v19 = vsel %vm246_vm0, %v1084_v14, 0  ;;  %3045 = vmatmul.mubr.msk.bf16.vlgmr.msra.gmra.mrb[16].mxu1 %vm242_vm1, %v3592_v26  ;;  %3077 = vmatprep.subr.msk.bf16.mxu0 %vm246_vm0, %v1085_v16 }
  0xb5   : > { %1209 = vmatpush1.bf16.msra.mxu0 %v1105_v19  ;;  %531 = vmatpush1.bf16.msra.mxu1 %v501_v11 }
  0xb6   : > { %v1078_v5 = vpop.permute.xlu1 %1077  ;;  %v3725_v9 = vpop.permute.xlu0 %1075  ;;  %562 = vmatprep.mubr.bf16.mxu1 %v3398_v0  ;;  %3049 = vmatprep.subr.msk.bf16.mxu1 %vm246_vm0, %v3493_v15 }
  0xb7   : > { %v1088_v12 = vsel %vm1079_vm4, %v3725_v9, %v1078_v5  ;;  %3081 = vmatprep.subr.msk.bf16.mxu0 %vm246_vm0, %v1078_v5 }
  0xb8   : > { %v1117_v20 = vsel %vm246_vm0, %v1088_v12, 0 }
  0xb9   : > { %3078 = vmatmul.mubr.msk.bf16.vlgmr.msra.gmra.mrb[0].mxu0 %vm242_vm1, %v3692_v1 }
  0xba   : > { %v1368_v21 = vpop.permute.xlu1 %1367  ;;  %v1366_v22 = vpop.permute.xlu0 %1365  ;;  %1295 = vmatpush1.bf16.msra.mxu0 %v1117_v20  ;;  %1326 = vmatprep.mubr.bf16.mxu0 %v3398_v0 }
  0xbb   : > { %v1386_v15 = vsel %vm1385_vm5, %v1366_v22, %v1368_v21 }
  0xbc   : > { %3048 = vmatmul.mubr.msk.bf16.vlgmr.msra.gmra.mrb[0].mxu1 %vm242_vm1, %v3476_v13  ;;  %v1399_v26 = vsel %vm246_vm0, %v1386_v15, 0 }
  0xbd   : > { %574 = vmatpush1.bf16.msra.mxu1 %v507_v23  ;;  %605 = vmatprep.mubr.bf16.mxu1 %v3398_v0 }
  0xbe   : > { %v3743_v24 = vpop.permute.xlu1 %1373  ;;  %v3745_v25 = vpop.permute.xlu0 %1369  ;;  %3053 = vmatprep.subr.msk.bf16.mxu1 %vm246_vm0, %v3517_v18 }
  0xbf   : > { %v1387_v4 = vsel %vm1385_vm5, %v1368_v21, %v3745_v25 }
  0xc0   : > { %3086 = vmatprep.subr.msk.bf16.mxu0 %vm246_vm0, %v1387_v4 }
  0xc1   : > { %3082 = vmatmul.mubr.msk.bf16.vlgmr.msra.gmra.mrb[4].mxu0 %vm242_vm1, %v3692_v1 }
  0xc2   : > { %v3755_v28 = vpop.permute.xlu1 %1377  ;;  %v1376_v29 = vpop.permute.xlu0 %1375  ;;  %1429 = vmatpush1.bf16.msra.mxu0 %v1399_v26  ;;  %1460 = vmatprep.mubr.bf16.mxu0 %v3398_v0 }
  0xc3   : > { %v1391_v18 = vsel %vm1385_vm5, %v1376_v29, %v3755_v28  ;;  %v1390_v31 = vsel %vm1385_vm5, %v3743_v24, %v1376_v29 }
  0xc4   : > { %3050 = vmatmul.mubr.msk.bf16.vlgmr.msra.gmra.mrb[4].mxu1 %vm242_vm1, %v3476_v13  ;;  %3090 = vmatprep.subr.msk.bf16.mxu0 %vm246_vm0, %v1391_v18  ;;  %v1411_v35 = vsel %vm246_vm0, %v1390_v31, 0 }
  0xc5   : > { %660 = vmatpush1.bf16.msra.mxu1 %v519_v30  ;;  %691 = vmatprep.mubr.bf16.mxu1 %v3398_v0 }
  0xc6   : > { %v3773_v17 = vpop.permute.xlu1 %1381  ;;  %v760_v34 = vpop.permute.xlu0 %759 }
  0xc7   : > { %v777_v36 = vsel %vm773_vm3, %v760_v34, %v3623_v39  ;;  %v776_v37 = vsel %vm773_vm3, %v3594_v27, %v760_v34 }
  0xc8   : > { %3062 = vmatprep.subr.msk.bf16.mxu1 %vm246_vm0, %v777_v36  ;;  %v793_v39 = vsel %vm246_vm0, %v776_v37, 0 }
  0xc9   : > { %3087 = vmatmul.mubr.msk.bf16.vlgmr.msra.gmra.mrb[8].mxu0 %vm242_vm1, %v3770_v33 }
  0xca   : > { %v768_v38 = vpop.permute.xlu1 %767  ;;  %v1384_v40 = vpop.permute.xlu0 %1383  ;;  %1515 = vmatpush1.bf16.msra.mxu0 %v1411_v35  ;;  %1546 = vmatprep.mubr.bf16.mxu0 %v3398_v0 }
  0xcb   : > { %v781_v41 = vsel %vm773_vm3, %v768_v38, %v3646_v46  ;;  %3094 = vmatprep.subr.msk.bf16.mxu0 %vm246_vm0, %v1384_v40  ;;  %v1394_v43 = vsel %vm1385_vm5, %v3773_v17, %v1384_v40  ;;  %v780_v46 = vsel %vm773_vm3, %v3634_v42, %v768_v38  ;;  %v2887_v38 = vld [vmem:[%s4095_s2] sm:$0xff]  ;;  %v2888_v40 = vld [vmem:[%s4095_s2 + $0x8] sm:$0xf] }
  0xcc   : > { %3054 = vmatmul.mubr.msk.bf16.vlgmr.msra.gmra.mrb[12].mxu1 %vm242_vm1, %v3476_v13  ;;  %v1423_v45 = vsel %vm246_vm0, %v1394_v43, 0  ;;  %v805_v50 = vsel %vm246_vm0, %v780_v46, 0  ;;  %2891 = vperm.xlu0 %3329, %v2887_v38  }
  0xcd   : > { %860 = vmatpush1.bf16.msra.mxu1 %v793_v39  ;;  %891 = vmatprep.mubr.bf16.mxu1 %v3398_v0 }
  0xce   : > { %3066 = vmatprep.subr.msk.bf16.mxu1 %vm246_vm0, %v781_v41  ;;  %v1674_v27 = vpop.permute.xlu1 %1673  ;;  %v1672_v44 = vpop.permute.xlu0 %1671  ;;  %2896 = vperm.xlu1 %3330, %v2888_v40  }
  0xcf   : > { %v1692_v51 = vsel %vm1691_vm6, %v1672_v44, %v1674_v27 }
  0xd0   : > { %v1705_v53 = vsel %vm246_vm0, %v1692_v51, 0 }
  0xd1   : > { %3091 = vmatmul.mubr.msk.bf16.vlgmr.msra.gmra.mrb[0].mxu0 %vm242_vm1, %v3770_v33 }
  0xd2   : > { %v1066_v47 = vpop.permute.xlu1 %1065  ;;  %v3799_v48 = vpop.permute.xlu0 %1675  ;;  %1601 = vmatpush1.bf16.msra.mxu0 %v1423_v45  ;;  %1632 = vmatprep.mubr.bf16.mxu0 %v3398_v0 }
  0xd3   : > { %v1083_v13 = vsel %vm1079_vm4, %v1066_v47, %v3696_v2  ;;  %v1693_v49 = vsel %vm1691_vm6, %v1674_v27, %v3799_v48  ;;  %v1082_v54 = vsel %vm1079_vm4, %v3677_v59, %v1066_v47 }
  0xd4   : > { %3063 = vmatmul.mubr.msk.bf16.vlgmr.msra.gmra.mrb[4].mxu1 %vm242_vm1, %v3610_v32  ;;  %3099 = vmatprep.subr.msk.bf16.mxu0 %vm246_vm0, %v1693_v49  ;;  %v1099_v60 = vsel %vm246_vm0, %v1082_v54, 0 }
  0xd5   : > { %946 = vmatpush1.bf16.msra.mxu1 %v805_v50  ;;  %977 = vmatprep.mubr.bf16.mxu1 %v3398_v0 }
  0xd6   : > { %3075 = vmatprep.subr.msk.bf16.mxu1 %vm246_vm0, %v1083_v13  ;;  %v1682_v42 = vpop.permute.xlu1 %1681  ;;  %v3813_v52 = vpop.permute.xlu0 %1679 }
  0xd7   : > { %v1696_v59 = vsel %vm1691_vm6, %v3813_v52, %v1682_v42 }
  0xd8   : > { %v1717_v2 = vsel %vm246_vm0, %v1696_v59, 0  ;;  %v3961_v59 = vld [vmem:[%s4094_s1 + $0x38] sm:$0x3f]  }
  0xd9   : > { %3095 = vmatmul.mubr.msk.bf16.vlgmr.msra.gmra.mrb[4].mxu0 %vm242_vm1, %v3770_v33 }
  0xda   : > { %v1074_v55 = vpop.permute.xlu1 %1073  ;;  %v3820_v56 = vpop.permute.xlu0 %1683  ;;  %1735 = vmatpush1.bf16.msra.mxu0 %v1705_v53  ;;  %1766 = vmatprep.mubr.bf16.mxu0 %v3398_v0 }
  0xdb   : > { %v1087_v57 = vsel %vm1079_vm4, %v1074_v55, %v3725_v9  ;;  %v1697_v58 = vsel %vm1691_vm6, %v1682_v42, %v3820_v56 }
  0xdc   : > { %3067 = vmatmul.mubr.msk.bf16.vlgmr.msra.gmra.mrb[12].mxu1 %vm242_vm1, %v3610_v32  ;;  %3103 = vmatprep.subr.msk.bf16.mxu0 %vm246_vm0, %v1697_v58  ;;  %v1086_v32 = vsel %vm1079_vm4, %v3706_v8, %v1074_v55 }
  0xdd   : > { %1166 = vmatpush1.bf16.msra.mxu1 %v1099_v60  ;;  %1197 = vmatprep.mubr.bf16.mxu1 %v3398_v0  ;;  %v1111_v10 = vsel %vm246_vm0, %v1086_v32, 0 }
  0xde   : > { %3079 = vmatprep.subr.msk.bf16.mxu1 %vm246_vm0, %v1087_v57  ;;  %v1690_v62 = vpop.permute.xlu1 %1689  ;;  %v3840_v63 = vpop.permute.xlu0 %1687 }
  0xdf   : > { %v1700_v11 = vsel %vm1691_vm6, %v3840_v63, %v1690_v62 }
  0xe0   : > { %v1729_v16 = vsel %vm246_vm0, %v1700_v11, 0 }
  0xe1   : > { %3100 = vmatmul.mubr.msk.bf16.vlgmr.msra.gmra.mrb[8].mxu0 %vm242_vm1, %v3836_v61 }
  0xe2   : > { %v1978_v3 = vpop.permute.xlu1 %1977  ;;  %v1372_v6 = vpop.permute.xlu0 %1371  ;;  %1821 = vmatpush1.bf16.msra.mxu0 %v1717_v2  ;;  %1852 = vmatprep.mubr.bf16.mxu0 %v3398_v0 }
  0xe3   : > { %v1389_v7 = vsel %vm1385_vm5, %v1372_v6, %v3743_v24  ;;  %3107 = vmatprep.subr.msk.bf16.mxu0 %vm246_vm0, %v1690_v62  ;;  %v1388_v5 = vsel %vm1385_vm5, %v3745_v25, %v1372_v6 }
  0xe4   : > { %3076 = vmatmul.mubr.msk.bf16.vlgmr.msra.gmra.mrb[4].mxu1 %vm242_vm1, %v3692_v1  ;;  %v1405_v21 = vsel %vm246_vm0, %v1388_v5, 0 }
  0xe5   : > { %1252 = vmatpush1.bf16.msra.mxu1 %v1111_v10  ;;  %1283 = vmatprep.mubr.bf16.mxu1 %v3398_v0 }
  0xe6   : > { %3088 = vmatprep.subr.msk.bf16.mxu1 %vm246_vm0, %v1389_v7  ;;  %v3858_v8 = vpop.permute.xlu1 %1981  ;;  %v1980_v14 = vpop.permute.xlu0 %1979 }
  0xe7   : > { %v1999_v19 = vsel %vm1997_vm7, %v1980_v14, %v3858_v8  ;;  %v1998_v22 = vsel %vm1997_vm7, %v1978_v3, %v1980_v14 }
  0xe8   : > { %v2011_v24 = vsel %vm246_vm0, %v1998_v22, 0 }
  0xe9   : > { %3104 = vmatmul.mubr.msk.bf16.vlgmr.msra.gmra.mrb[0].mxu0 %vm242_vm1, %v3836_v61 }
  0xea   : > { %v3867_v9 = vpop.permute.xlu1 %1985  ;;  %v1380_v12 = vpop.permute.xlu0 %1379  ;;  %1907 = vmatpush1.bf16.msra.mxu0 %v1729_v16  ;;  %1938 = vmatprep.mubr.bf16.mxu0 %v3398_v0 }
  0xeb   : > { %v1393_v20 = vsel %vm1385_vm5, %v1380_v12, %v3773_v17  ;;  %3112 = vmatprep.subr.msk.bf16.mxu0 %vm246_vm0, %v1999_v19  ;;  %v1392_v26 = vsel %vm1385_vm5, %v3755_v28, %v1380_v12  ;;  %v3902_v28 = vld [vmem:[%s4094_s1 + $0x30] sm:$0x3f]  }
  0xec   : > { %3080 = vmatmul.mubr.msk.bf16.vlgmr.msra.gmra.mrb[12].mxu1 %vm242_vm1, %v3692_v1  ;;  %v1417_v30 = vsel %vm246_vm0, %v1392_v26, 0 }
  0xed   : > { %1472 = vmatpush1.bf16.msra.mxu1 %v1405_v21  ;;  %1503 = vmatprep.mubr.bf16.mxu1 %v3398_v0 }
  0xee   : > { %3092 = vmatprep.subr.msk.bf16.mxu1 %vm246_vm0, %v1393_v20  ;;  %v3879_v23 = vpop.permute.xlu1 %1989  ;;  %v1988_v15 = vpop.permute.xlu0 %1987 }
  0xef   : > { %v2003_v25 = vsel %vm1997_vm7, %v1988_v15, %v3879_v23  ;;  %v2002_v18 = vsel %vm1997_vm7, %v3867_v9, %v1988_v15 }
  0xf0   : > { %v2023_v34 = vsel %vm246_vm0, %v2002_v18, 0 }
  0xf1   : > { %3108 = vmatmul.mubr.msk.bf16.vlgmr.msra.gmra.mrb[4].mxu0 %vm242_vm1, %v3836_v61 }
  0xf2   : > { %v3888_v1 = vpop.permute.xlu1 %1993  ;;  %v1678_v4 = vpop.permute.xlu0 %1677  ;;  %2041 = vmatpush1.bf16.msra.mxu0 %v2011_v24  ;;  %2072 = vmatprep.mubr.bf16.mxu0 %v3398_v0 }
  0xf3   : > { %v1695_v29 = vsel %vm1691_vm6, %v1678_v4, %v3813_v52  ;;  %3116 = vmatprep.subr.msk.bf16.mxu0 %vm246_vm0, %v2003_v25  ;;  %v1694_v35 = vsel %vm1691_vm6, %v3799_v48, %v1678_v4 }
  0xf4   : > { %3089 = vmatmul.mubr.msk.bf16.vlgmr.msra.gmra.mrb[4].mxu1 %vm242_vm1, %v3770_v33  ;;  %v1711_v41 = vsel %vm246_vm0, %v1694_v35, 0 }
  0xf5   : > { %1558 = vmatpush1.bf16.msra.mxu1 %v1417_v30  ;;  %1589 = vmatprep.mubr.bf16.mxu1 %v3398_v0 }
  0xf6   : > { %3101 = vmatprep.subr.msk.bf16.mxu1 %vm246_vm0, %v1695_v29  ;;  %v1686_v31 = vpop.permute.xlu1 %1685  ;;  %v1996_v17 = vpop.permute.xlu0 %1995  ;;  %v3349_v29 = vld [vmem:[%s4094_s1 + $0x40] sm:$0x3f]  }
  0xf7   : > { %v2006_v39 = vsel %vm1997_vm7, %v3888_v1, %v1996_v17  ;;  %v1699_v43 = vsel %vm1691_vm6, %v1686_v31, %v3840_v63  ;;  %v1698_v47 = vsel %vm1691_vm6, %v3820_v56, %v1686_v31 }
  0xf8   : > { %v2035_v45 = vsel %vm246_vm0, %v2006_v39, 0  ;;  %v1723_v13 = vsel %vm246_vm0, %v1698_v47, 0 }
  0xf9   : > { %3113 = vmatmul.mubr.msk.bf16.vlgmr.msra.gmra.mrb[8].mxu0 %vm242_vm1, %v3902_v28 }
  0xfa   : > { %v2286_v36 = vpop.permute.xlu1 %2285  ;;  %v2284_v37 = vpop.permute.xlu0 %2283  ;;  %2127 = vmatpush1.bf16.msra.mxu0 %v2023_v34  ;;  %2158 = vmatprep.mubr.bf16.mxu0 %v3398_v0 }
  0xfb   : > { %3120 = vmatprep.subr.msk.bf16.mxu0 %vm246_vm0, %v1996_v17  ;;  %v2304_v49 = vsel %vm2303_vm8, %v2284_v37, %v2286_v36 }
  0xfc   : > { %3093 = vmatmul.mubr.msk.bf16.vlgmr.msra.gmra.mrb[12].mxu1 %vm242_vm1, %v3770_v33  ;;  %v2317_v52 = vsel %vm246_vm0, %v2304_v49, 0 }
  0xfd   : > { %1778 = vmatpush1.bf16.msra.mxu1 %v1711_v41  ;;  %1809 = vmatprep.mubr.bf16.mxu1 %v3398_v0 }
  0xfe   : > { %3105 = vmatprep.subr.msk.bf16.mxu1 %vm246_vm0, %v1699_v43  ;;  %v1984_v27 = vpop.permute.xlu1 %1983  ;;  %v2288_v44 = vpop.permute.xlu0 %2287 }
  0xff   : > { %v2305_v46 = vsel %vm2303_vm8, %v2286_v36, %v2288_v44  ;;  %v2001_v50 = vsel %vm1997_vm7, %v1984_v27, %v3867_v9  ;;  %v2000_v54 = vsel %vm1997_vm7, %v3858_v8, %v1984_v27 }
 0x100   : > { %v2017_v57 = vsel %vm246_vm0, %v2000_v54, 0 }
 0x101   : > { %3117 = vmatmul.mubr.msk.bf16.vlgmr.msra.gmra.mrb[0].mxu0 %vm242_vm1, %v3902_v28 }
 0x102   : > { %v2294_v33 = vpop.permute.xlu1 %2293  ;;  %v2292_v48 = vpop.permute.xlu0 %2291  ;;  %2213 = vmatpush1.bf16.msra.mxu0 %v2035_v45  ;;  %2244 = vmatprep.mubr.bf16.mxu0 %v3398_v0 }
 0x103   : > { %3125 = vmatprep.subr.msk.bf16.mxu0 %vm246_vm0, %v2305_v46  ;;  %v2308_v58 = vsel %vm2303_vm8, %v2292_v48, %v2294_v33 }
 0x104   : > { %3102 = vmatmul.mubr.msk.bf16.vlgmr.msra.gmra.mrb[4].mxu1 %vm242_vm1, %v3836_v61  ;;  %v2329_v63 = vsel %vm246_vm0, %v2308_v58, 0 }
 0x105   : > { %1864 = vmatpush1.bf16.msra.mxu1 %v1723_v13  ;;  %1895 = vmatprep.mubr.bf16.mxu1 %v3398_v0 }
 0x106   : > { %3114 = vmatprep.subr.msk.bf16.mxu1 %vm246_vm0, %v2001_v50  ;;  %v1992_v51 = vpop.permute.xlu1 %1991  ;;  %v2296_v42 = vpop.permute.xlu0 %2295 }
 0x107   : > { %v2309_v53 = vsel %vm2303_vm8, %v2294_v33, %v2296_v42  ;;  %v2005_v60 = vsel %vm1997_vm7, %v1992_v51, %v3888_v1 }
 0x109   : > { %3121 = vmatmul.mubr.msk.bf16.vlgmr.msra.gmra.mrb[4].mxu0 %vm242_vm1, %v3902_v28 }
 0x10a   : > { %v2300_v55 = vpop.permute.xlu0 %2299  ;;  %2347 = vmatpush1.bf16.msra.mxu0 %v2317_v52  ;;  %2378 = vmatprep.mubr.bf16.mxu0 %v3398_v0  ;;  %v2302_v56 = vpop.permute.xlu1 %2301 }
 0x10b   : > { %3129 = vmatprep.subr.msk.bf16.mxu0 %vm246_vm0, %v2309_v53  ;;  %v2312_v6 = vsel %vm2303_vm8, %v2300_v55, %v2302_v56 }
 0x10c   : > { %3106 = vmatmul.mubr.msk.bf16.vlgmr.msra.gmra.mrb[12].mxu1 %vm242_vm1, %v3836_v61  ;;  %v2004_v61 = vsel %vm1997_vm7, %v3879_v23, %v1992_v51  ;;  %v2341_v11 = vsel %vm246_vm0, %v2312_v6, 0 }
 0x10d   : > { %2084 = vmatpush1.bf16.msra.mxu1 %v2017_v57  ;;  %2115 = vmatprep.mubr.bf16.mxu1 %v3398_v0  ;;  %v2029_v3 = vsel %vm246_vm0, %v2004_v61, 0 }
 0x10e   : > { %3118 = vmatprep.subr.msk.bf16.mxu1 %vm246_vm0, %v2005_v60  ;;  %v2290_v62 = vpop.permute.xlu0 %2289 }
 0x10f   : > { %v2590_v2 = vpop.permute.xlu1 %2589  ;;  %v2307_v10 = vsel %vm2303_vm8, %v2290_v62, %v2292_v48  ;;  %v2306_v19 = vsel %vm2303_vm8, %v2288_v44, %v2290_v62 }
 0x110   : > { %v2323_v9 = vsel %vm246_vm0, %v2306_v19, 0 }
 0x111   : > { %3126 = vmatmul.mubr.msk.bf16.vlgmr.msra.gmra.mrb[8].mxu0 %vm242_vm1, %v3961_v59 }
 0x112   : > { %v2592_v32 = vpop.permute.xlu0 %2591  ;;  %2433 = vmatpush1.bf16.msra.mxu0 %v2329_v63  ;;  %2464 = vmatprep.mubr.bf16.mxu0 %v3398_v0 }
 0x113   : > { %3133 = vmatprep.subr.msk.bf16.mxu0 %vm246_vm0, %v2302_v56  ;;  %v2610_v12 = vsel %vm2609_vm9, %v2590_v2, %v2592_v32 }
 0x114   : > { %3115 = vmatmul.mubr.msk.bf16.vlgmr.msra.gmra.mrb[4].mxu1 %vm242_vm1, %v3902_v28  ;;  %v2594_v7 = vpop.permute.xlu1 %2593  ;;  %v2623_v22 = vsel %vm246_vm0, %v2610_v12, 0 }
 0x115   : > { %2170 = vmatpush1.bf16.msra.mxu1 %v2029_v3  ;;  %2201 = vmatprep.mubr.bf16.mxu1 %v3398_v0  ;;  %v2611_v14 = vsel %vm2609_vm9, %v2592_v32, %v2594_v7 }
 0x116   : > { %3127 = vmatprep.subr.msk.bf16.mxu1 %vm246_vm0, %v2307_v10  ;;  %v2298_v8 = vpop.permute.xlu0 %2297 }
 0x117   : > { %v2311_v5 = vsel %vm2303_vm8, %v2298_v8, %v2300_v55  ;;  %v2310_v15 = vsel %vm2303_vm8, %v2296_v42, %v2298_v8 }
 0x118   : > { %v2598_v16 = vpop.permute.xlu1 %2597  ;;  %v2335_v26 = vsel %vm246_vm0, %v2310_v15, 0 }
 0x119   : > { %3130 = vmatmul.mubr.msk.bf16.vlgmr.msra.gmra.mrb[0].mxu0 %vm242_vm1, %v3961_v59 }
 0x11a   : > { %2519 = vmatpush1.bf16.msra.mxu0 %v2341_v11  ;;  %2550 = vmatprep.mubr.bf16.mxu0 %v3398_v0  ;;  %v2600_v20 = vpop.permute.xlu0 %2599 }
 0x11b   : > { %3138 = vmatprep.subr.msk.bf16.mxu0 %vm246_vm0, %v2611_v14  ;;  %v2614_v1 = vsel %vm2609_vm9, %v2598_v16, %v2600_v20 }
 0x11c   : > { %3119 = vmatmul.mubr.msk.bf16.vlgmr.msra.gmra.mrb[12].mxu1 %vm242_vm1, %v3902_v28  ;;  %v2602_v21 = vpop.permute.xlu1 %2601  ;;  %v2635_v30 = vsel %vm246_vm0, %v2614_v1, 0 }
 0x11d   : > { %2390 = vmatpush1.bf16.msra.mxu1 %v2323_v9  ;;  %2421 = vmatprep.mubr.bf16.mxu1 %v3398_v0  ;;  %v2615_v23 = vsel %vm2609_vm9, %v2600_v20, %v2602_v21 }
 0x11e   : > { %3131 = vmatprep.subr.msk.bf16.mxu1 %vm246_vm0, %v2311_v5 }
 0x11f   : > { %v2596_v24 = vpop.permute.xlu0 %2595 }
 0x120   : > { %v2613_v25 = vsel %vm2609_vm9, %v2596_v24, %v2598_v16  ;;  %v2606_v4 = vpop.permute.xlu1 %2605  ;;  %v2612_v28 = vsel %vm2609_vm9, %v2594_v7, %v2596_v24 }
 0x121   : > { %3134 = vmatmul.mubr.msk.bf16.vlgmr.msra.gmra.mrb[4].mxu0 %vm242_vm1, %v3961_v59  ;;  %v2629_v34 = vsel %vm246_vm0, %v2612_v28, 0 }
 0x122   : > { %2653 = vmatpush1.bf16.msra.mxu0 %v2623_v22  ;;  %2684 = vmatprep.mubr.bf16.mxu0 %v3398_v0 }
 0x123   : > { %3142 = vmatprep.subr.msk.bf16.mxu0 %vm246_vm0, %v2615_v23 }
 0x124   : > { %3128 = vmatmul.mubr.msk.bf16.vlgmr.msra.gmra.mrb[4].mxu1 %vm242_vm1, %v3961_v59 }
 0x125   : > { %2476 = vmatpush1.bf16.msra.mxu1 %v2335_v26  ;;  %2507 = vmatprep.mubr.bf16.mxu1 %v3398_v0  ;;  %v2608_v18 = vpop.permute.xlu0 %2607  ;;  %v2604_v31 = vpop.permute.xlu1 %2603 }
 0x126   : > { %3140 = vmatprep.subr.msk.bf16.mxu1 %vm246_vm0, %v2613_v25  ;;  %v2617_v17 = vsel %vm2609_vm9, %v2604_v31, %v2606_v4  ;;  %v2618_v35 = vsel %vm2609_vm9, %v2606_v4, %v2608_v18  ;;  %v2616_v37 = vsel %vm2609_vm9, %v2602_v21, %v2604_v31 }
 0x127   : > { %v2647_v36 = vsel %vm246_vm0, %v2618_v35, 0  ;;  %v2641_v38 = vsel %vm246_vm0, %v2616_v37, 0 }
 0x129   : > { %3139 = vmatmul.mubr.msk.bf16.vlgmr.msra.gmra.mrb[8].mxu0 %vm242_vm1, %v3349_v29 }
 0x12a   : > { %2739 = vmatpush1.bf16.msra.mxu0 %v2635_v30  ;;  %2770 = vmatprep.mubr.bf16.mxu0 %v3398_v0 }
 0x12b   : > { %3146 = vmatprep.subr.msk.bf16.mxu0 %vm246_vm0, %v2608_v18 }
 0x12c   : > { %3132 = vmatmul.mubr.msk.bf16.vlgmr.msra.gmra.mrb[12].mxu1 %vm242_vm1, %v3961_v59 }
 0x12d   : > { %2696 = vmatpush1.bf16.msra.mxu1 %v2629_v34  ;;  %2727 = vmatprep.mubr.bf16.mxu1 %v3398_v0 }
 0x12e   : > { %3144 = vmatprep.subr.msk.bf16.mxu1 %vm246_vm0, %v2617_v17 }
 0x131   : > { %3143 = vmatmul.mubr.msk.bf16.vlgmr.msra.gmra.mrb[0].mxu0 %vm242_vm1, %v3349_v29 }
 0x132   : > { %2825 = vmatpush1.bf16.msra.mxu0 %v2647_v36  ;;  %2856 = vmatprep.mubr.bf16.mxu0 %v3398_v0 }
 0x134   : > { %3141 = vmatmul.mubr.msk.bf16.vlgmr.msra.gmra.mrb[4].mxu1 %vm242_vm1, %v3349_v29 }
 0x135   : > { %2782 = vmatpush1.bf16.msra.mxu1 %v2641_v38  ;;  %2813 = vmatprep.mubr.bf16.mxu1 %v3398_v0 }
 0x139   : > { %3147 = vmatmul.mubr.msk.bf16.vlgmr.msra.gmra.mrb[4].mxu0 %vm242_vm1, %v3349_v29 }
 0x13c   : > { %3145 = vmatmul.mubr.msk.bf16.vlgmr.msra.gmra.mrb[12].mxu1 %vm242_vm1, %v3349_v29 }
 0x14b   : > { %v4037_v49 = vpop.permute.xlu0 %2891 }
 0x14d   : > { %v4039_v53 = vpop.permute.xlu1 %2896 }
 0x177   : > { %v397_v40 = vpop.f32.mrb[8].mxu1 }
 0x178   : > { %v399_v41 = vpop.f32.mrb[9].mxu1 }
 0x179   : > { %v401_v39 = vpop.f32.mrb[10].mxu1 }
 0x17a   : > { %v403_v43 = vpop.f32.mrb[11].mxu1 }
 0x187   : > { %v483_v27 = vpop.f32.mrb[16].mxu1 }
 0x188   : > { %v4031_v44 = vpop.f32.mrb[17].mxu1 }
 0x189   : > { %v4033_v45 = vpop.f32.mrb[18].mxu1 }
 0x18a   : > { %v4035_v46 = vpop.f32.mrb[19].mxu1 }
 0x18f   : > { %v564_v47 = vpop.f32.mrb[0].mxu1 }
 0x190   : > { %v566_v33 = vpop.f32.mrb[1].mxu1 }
 0x191   : > { %v568_v48 = vpop.f32.mrb[2].mxu1 }
 0x192   : > { %v570_v13 = vpop.f32.mrb[3].mxu1 }
 0x1fc   : > { %v2686_v0 = vpop.f32.mrb[8].mxu0 }
 0x1fd   : > { %v3150_v50 = vadd.f32 %v2686_v0, %v564_v47  ;;  %v2688_v51 = vpop.f32.mrb[9].mxu0 }
 0x1fe   : > { %v3151_v42 = vadd.f32 %v2688_v51, %v566_v33  ;;  %v2690_v52 = vpop.f32.mrb[10].mxu0 }
 0x1ff   : > { %v3152_v54 = vadd.f32 %v2690_v52, %v568_v48  ;;  %v2899_v55 = vadd.f32 %v3150_v50, %v4037_v49  ;;  %v2692_v56 = vpop.f32.mrb[11].mxu0 }
 0x200   : > { %v2900_v57 = vadd.f32 %v3151_v42, %v4037_v49  ;;  %v3153_v58 = vadd.f32 %v2692_v56, %v570_v13 }
 0x201   : > { %3350 = vtanh.f32 %v2899_v55  ;;  %v2909_v60 = vadd.f32 %v3152_v54, %v4039_v53 }
 0x202   : > { %3352 = vtanh.f32 %v2900_v57  ;;  %v2910_v59 = vadd.f32 %v3153_v58, %v4039_v53 }
 0x203   : > { %3354 = vtanh.f32 %v2909_v60 }
 0x204   : > { %3356 = vtanh.f32 %v2910_v59  ;;  %v2772_v62 = vpop.f32.mrb[0].mxu0 }
 0x205   : > { %v3154_v63 = vadd.f32 %v2772_v62, %v397_v40  ;;  %v2774_v2 = vpop.f32.mrb[1].mxu0 }
 0x206   : > { %v3155_v61 = vadd.f32 %v2774_v2, %v399_v41  ;;  %v2776_v32 = vpop.f32.mrb[2].mxu0 }
 0x207   : > { %v2903_v3 = vadd.f32 %v3154_v63, %v4037_v49  ;;  %v3156_v6 = vadd.f32 %v2776_v32, %v401_v39  ;;  %v2778_v7 = vpop.f32.mrb[3].mxu0  ;;  %v2729_v10 = vpop.f32.mrb[4].mxu1 }
 0x208   : > { %v2904_v11 = vadd.f32 %v3155_v61, %v4037_v49  ;;  %v3157_v8 = vadd.f32 %v2778_v7, %v403_v43  ;;  %v2731_v14 = vpop.f32.mrb[5].mxu1  ;;  %v2901_v19 = vadd.f32 %v4037_v49, %v2729_v10 }
 0x209   : > { %3358 = vtanh.f32 %v2903_v3  ;;  %v2913_v16 = vadd.f32 %v3156_v6, %v4039_v53  ;;  %v2733_v5 = vpop.f32.mrb[6].mxu1  ;;  %v2902_v12 = vadd.f32 %v4037_v49, %v2731_v14 }
 0x20a   : > { %3360 = vtanh.f32 %v2904_v11  ;;  %v2914_v9 = vadd.f32 %v3157_v8, %v4039_v53  ;;  %v2735_v20 = vpop.f32.mrb[7].mxu1  ;;  %v2911_v22 = vadd.f32 %v4039_v53, %v2733_v5 }
 0x20b   : > { %v3351_v21 = vpop.eup %3350  ;;  %3362 = vtanh.f32 %v2913_v16  ;;  %v2912_v15 = vadd.f32 %v4039_v53, %v2735_v20 }
 0x20c   : > { %v3353_v23 = vpop.eup %3352  ;;  %2939 = vst [vmem:[%s4051_s26] sm:$0xff] %v3351_v21  ;;  %3364 = vtanh.f32 %v2914_v9  ;;  %v2858_v24 = vpop.f32.mrb[4].mxu0 }
 0x20d   : > { %v3355_v25 = vpop.eup %3354  ;;  %2940 = vst [vmem:[%s4051_s26 + $0x8] sm:$0xff] %v3353_v23  ;;  %3366 = vtanh.f32 %v2901_v19  ;;  %v3158_v26 = vadd.f32 %v2858_v24, %v483_v27  ;;  %v2860_v1 = vpop.f32.mrb[5].mxu0 }
 0x20e   : > { %v3357_v4 = vpop.eup %3356  ;;  %2950 = vst [vmem:[%s4051_s26 + $0x50] sm:$0xf] %v3355_v25  ;;  %3368 = vtanh.f32 %v2902_v12  ;;  %v3159_v29 = vadd.f32 %v2860_v1, %v4031_v44  ;;  %v2862_v30 = vpop.f32.mrb[6].mxu0 }
 0x20f   : > { %2951 = vst [vmem:[%s4051_s26 + $0x58] sm:$0xf] %v3357_v4  ;;  %3370 = vtanh.f32 %v2911_v22  ;;  %v2907_v18 = vadd.f32 %v3158_v26, %v4037_v49  ;;  %v3160_v28 = vadd.f32 %v2862_v30, %v4033_v45  ;;  %v2864_v31 = vpop.f32.mrb[7].mxu0  ;;  %v2815_v17 = vpop.f32.mrb[12].mxu1 }
 0x210   : > { %3372 = vtanh.f32 %v2912_v15  ;;  %v2908_v34 = vadd.f32 %v3159_v29, %v4037_v49  ;;  %v3161_v35 = vadd.f32 %v2864_v31, %v4035_v46  ;;  %v2817_v36 = vpop.f32.mrb[13].mxu1  ;;  %v2905_v38 = vadd.f32 %v4037_v49, %v2815_v17 }
 0x211   : > { %3374 = vtanh.f32 %v2907_v18  ;;  %v2917_v37 = vadd.f32 %v3160_v28, %v4039_v53  ;;  %v2819_v40 = vpop.f32.mrb[14].mxu1  ;;  %v2906_v39 = vadd.f32 %v4037_v49, %v2817_v36 }
 0x212   : > { %3376 = vtanh.f32 %v2908_v34  ;;  %v2918_v41 = vadd.f32 %v3161_v35, %v4039_v53  ;;  %v2821_v43 = vpop.f32.mrb[15].mxu1  ;;  %v2915_v44 = vadd.f32 %v4039_v53, %v2819_v40 }
 0x213   : > { %v3359_v27 = vpop.eup %3358  ;;  %3378 = vtanh.f32 %v2917_v37  ;;  %v2916_v46 = vadd.f32 %v4039_v53, %v2821_v43 }
 0x214   : > { %v3361_v45 = vpop.eup %3360  ;;  %2943 = vst [vmem:[%s4051_s26 + $0x20] sm:$0xff] %v3359_v27  ;;  %3380 = vtanh.f32 %v2918_v41 }
 0x215   : > { %v3363_v47 = vpop.eup %3362  ;;  %2944 = vst [vmem:[%s4051_s26 + $0x28] sm:$0xff] %v3361_v45  ;;  %3382 = vtanh.f32 %v2905_v38 }
 0x216   : > { %v3365_v33 = vpop.eup %3364  ;;  %2954 = vst [vmem:[%s4051_s26 + $0x70] sm:$0xf] %v3363_v47  ;;  %3384 = vtanh.f32 %v2906_v39 }
 0x217   : > { %v3367_v48 = vpop.eup %3366  ;;  %2955 = vst [vmem:[%s4051_s26 + $0x78] sm:$0xf] %v3365_v33  ;;  %3386 = vtanh.f32 %v2915_v44 }
 0x218   : > { %v3369_v13 = vpop.eup %3368  ;;  %2941 = vst [vmem:[%s4051_s26 + $0x10] sm:$0xff] %v3367_v48  ;;  %3388 = vtanh.f32 %v2916_v46 }
 0x219   : > { %v3371_v0 = vpop.eup %3370  ;;  %2942 = vst [vmem:[%s4051_s26 + $0x18] sm:$0xff] %v3369_v13 }
 0x21a   : > { %v3373_v49 = vpop.eup %3372  ;;  %2952 = vst [vmem:[%s4051_s26 + $0x60] sm:$0xf] %v3371_v0 }
 0x21b   : > { %v3375_v50 = vpop.eup %3374  ;;  %2953 = vst [vmem:[%s4051_s26 + $0x68] sm:$0xf] %v3373_v49 }
 0x21c   : > { %v3377_v51 = vpop.eup %3376  ;;  %2947 = vst [vmem:[%s4051_s26 + $0x40] sm:$0xff] %v3375_v50 }
 0x21d   : > { %v3379_v42 = vpop.eup %3378  ;;  %2949 = vst.msk [vmem:[%s4051_s26 + $0x48] sm:$0xff] %vm2948_vm10, %v3377_v51 }
 0x21e   : > { %v3381_v52 = vpop.eup %3380  ;;  %2958 = vst [vmem:[%s4051_s26 + $0x90] sm:$0xf] %v3379_v42 }
 0x21f   : > { %v3383_v53 = vpop.eup %3382  ;;  %2960 = vst.msk [vmem:[%s4051_s26 + $0x98] sm:$0xf] %vm2959_vm11, %v3381_v52 }
 0x220   : > { %v3385_v54 = vpop.eup %3384  ;;  %2945 = vst [vmem:[%s4051_s26 + $0x30] sm:$0xff] %v3383_v53 }
 0x221   : > { %v3387_v55 = vpop.eup %3386  ;;  %2946 = vst [vmem:[%s4051_s26 + $0x38] sm:$0xff] %v3385_v54 }
 0x222   : > { %v3389_v56 = vpop.eup %3388  ;;  %2956 = vst [vmem:[%s4051_s26 + $0x80] sm:$0xf] %v3387_v55 }
 0x223   : > { %2957 = vst [vmem:[%s4051_s26 + $0x88] sm:$0xf] %v3389_v56 }
 0x224 PF: > { %s13_s12 = sadd.s32 1, %s3396_s12  }
 0x225   : > { %p10_p4 = scmp.ge.s32.totalorder %s13_s12, 4  }
 0x227   :  { %12 = sbr.rel (!%p10_p4) target bundleno = 1 (0x1), region = 70 }

</bundles_post_ra>
